<compile_context>
chip_gen: v6e
topology: v6e:2x2x1
jax: 0.10.0
libtpu: 0.0.40
codegen_flags: <defaults>
</compile_context>

<pallas_src>
import jax
import jax.numpy as jnp
import numpy as np
from jax import lax
from jax.experimental import pallas as pl
from jax.experimental.pallas import tpu as pltpu

B = 2                 # batch
H_IN = W_IN = 28      # MNIST spatial size (implied by d1 = Linear(26*26*32,128))
KH = KW = 3
C_OUT = 32
H_OUT = W_OUT = 26
FLAT = C_OUT * H_OUT * W_OUT        # 21632
HID = 128
NCLS = 10

W_PAD = W_IN                        # conv-output row stride after padding (28)
S_PAD = H_OUT * W_PAD               # 728 lanes per (channel, batch)
X_LEN = H_IN * W_IN                 # 784
X_PAD = 896                         # 784 padded so every tap slice stays in range
N_TAPS = KH * KW                    # 9
CG = 16                             # conv channels handled per grid step
N_STEPS = C_OUT // CG               # 2 K-steps over d1's contraction dim
TAP_OFFSETS = tuple(dy * W_IN + dx for dy in range(KH) for dx in range(KW))


# ---------------------------------------------------------------------------
# Fused kernel
# ---------------------------------------------------------------------------
def fused_kernel(taps_ref, wc_ref, bc_ref, w1_ref, b1_ref, w2_ref, b2_ref,
                 out_ref, acc_ref):
    k = pl.program_id(0)

    @pl.when(k == 0)
    def _init():
        acc_ref[...] = jnp.zeros_like(acc_ref)

    # ---- conv for this step's CG channels, directly in (CG, B, 728) ----
    wc = wc_ref[...]                                   # (CG, 1, 9)  f32
    conv = jnp.zeros((CG, B, S_PAD), jnp.float32)
    for t in range(N_TAPS):
        # (CG,1,1) * (1,B,728) -> (CG,B,728); taps are pre-shifted & aligned.
        conv = conv + wc[:, :, t:t + 1] * taps_ref[t:t + 1, :, :]
    h = jnp.maximum(conv + bc_ref[...], 0.0).astype(jnp.bfloat16)   # (CG,B,728)

    # ---- single batched contraction against this step's (CG,728,128) bf16 w1 ----
    pc = lax.dot_general(h, w1_ref[...],
                         dimension_numbers=(((2,), (1,)), ((0,), (0,))),
                         preferred_element_type=jnp.float32)        # (CG,B,128)
    acc_ref[...] += jnp.sum(pc, axis=0)                             # (B,128)

    # ---- epilogue: bias + ReLU + d2 + softmax on the final step ----
    @pl.when(k == pl.num_programs(0) - 1)
    def _finish():
        hid = jnp.maximum(acc_ref[...] + b1_ref[...], 0.0)          # (B, 128)
        logits = jnp.dot(hid, w2_ref[...],
                         preferred_element_type=jnp.float32) + b2_ref[...]
        m = jnp.max(logits, axis=-1, keepdims=True)
        e = jnp.exp(logits - m)
        out_ref[...] = e / jnp.sum(e, axis=-1, keepdims=True)       # (B, 10)


def _fused_call(taps, wc3, bc3, w1p, b1_row, w2, b2_row):
    return pl.pallas_call(
        fused_kernel,
        out_shape=jax.ShapeDtypeStruct((B, NCLS), jnp.float32),
        grid_spec=pltpu.PrefetchScalarGridSpec(
            num_scalar_prefetch=0,
            grid=(N_STEPS,),
            in_specs=[
                pl.BlockSpec((N_TAPS, B, S_PAD), lambda k: (0, 0, 0)),  # taps (resident)
                pl.BlockSpec((CG, 1, N_TAPS), lambda k: (k, 0, 0)),     # conv weights
                pl.BlockSpec((CG, 1, 1), lambda k: (k, 0, 0)),          # conv bias
                pl.BlockSpec((CG, S_PAD, HID), lambda k: (k, 0, 0)),    # w1 block (bf16)
                pl.BlockSpec((1, HID), lambda k: (0, 0)),               # b1
                pl.BlockSpec((HID, NCLS), lambda k: (0, 0)),            # w2
                pl.BlockSpec((1, NCLS), lambda k: (0, 0)),              # b2
            ],
            out_specs=pl.BlockSpec((B, NCLS), lambda k: (0, 0)),
            scratch_shapes=[pltpu.VMEM((B, HID), jnp.float32)],
        ),
        compiler_params=pltpu.CompilerParams(
            dimension_semantics=("arbitrary",)),
    )(taps, wc3, bc3, w1p, b1_row, w2, b2_row)


# ---------------------------------------------------------------------------
# One-time host-side weight re-layout (outside the jitted forward).
# ---------------------------------------------------------------------------
def prepare_params(wc_oihw, bc, w1, b1, w2, b2):
    wc3 = wc_oihw.reshape(C_OUT, 1, KH * KW).astype(jnp.float32)       # (32,1,9)
    bc3 = bc.reshape(C_OUT, 1, 1).astype(jnp.float32)                  # (32,1,1)
    # w1 rows are NCHW-flat (c*676 + oy*26 + ox); pad each spatial row 26 -> 28
    # with zero rows so it matches the kernel's stride-28 activation layout.
    w1r = w1.reshape(C_OUT, H_OUT, W_OUT, HID)
    w1p = jnp.pad(w1r, ((0, 0), (0, 0), (0, W_PAD - W_OUT), (0, 0)))
    w1p = w1p.reshape(C_OUT, S_PAD, HID).astype(jnp.bfloat16)          # (32,728,128)
    return (wc3, bc3, w1p,
            b1.reshape(1, HID).astype(jnp.float32),
            w2.astype(jnp.float32),
            b2.reshape(1, NCLS).astype(jnp.float32))


@jax.jit
def my_model_forward(x_nchw, wc3, bc3, w1p, b1_row, w2, b2_row):
    # x_nchw: (B, 1, 28, 28) f32 -> flatten, zero-pad, and pre-shift the 9
    # conv taps ONCE in the wrapper (52 KB), so the kernel only does aligned reads.
    xflat = x_nchw.reshape(B, X_LEN)
    xpad = jnp.pad(xflat, ((0, 0), (0, X_PAD - X_LEN)))
    taps = jnp.stack([xpad[:, off:off + S_PAD] for off in TAP_OFFSETS],
                     axis=0)                                           # (9, B, 728)
    return _fused_call(taps, wc3, bc3, w1p, b1_row, w2, b2_row)


# ---------------------------------------------------------------------------
# Plain-JAX reference (true module semantics, f32).
# ---------------------------------------------------------------------------
def ref_forward(x_nchw, wc_oihw, bc, w1, b1, w2, b2):
    y = lax.conv_general_dilated(x_nchw, wc_oihw, window_strides=(1, 1),
                                 padding="VALID",
                                 dimension_numbers=("NCHW", "OIHW", "NCHW"))
    y = jnp.maximum(y + bc[None, :, None, None], 0.0)
    flat = y.reshape(x_nchw.shape[0], FLAT)
    h = jnp.maximum(flat @ w1 + b1, 0.0)
    logits = h @ w2 + b2
    return jax.nn.softmax(logits, axis=-1)


if __name__ == "__main__":
    key = jax.random.PRNGKey(0)
    kx, kwc, kbc, kw1, kb1, kw2, kb2 = jax.random.split(key, 7)

    x = jax.random.normal(kx, (B, 1, H_IN, W_IN), dtype=jnp.float32)

    # PyTorch-style uniform init bounds
    bc_bound = 1.0 / np.sqrt(1 * KH * KW)
    b1_bound = 1.0 / np.sqrt(FLAT)
    b2_bound = 1.0 / np.sqrt(HID)

    wc_oihw = jax.random.uniform(kwc, (C_OUT, 1, KH, KW), jnp.float32,
                                 -bc_bound, bc_bound)
    bc = jax.random.uniform(kbc, (C_OUT,), jnp.float32, -bc_bound, bc_bound)
    w1 = jax.random.uniform(kw1, (FLAT, HID), jnp.float32, -b1_bound, b1_bound)
    b1 = jax.random.uniform(kb1, (HID,), jnp.float32, -b1_bound, b1_bound)
    w2 = jax.random.uniform(kw2, (HID, NCLS), jnp.float32, -b2_bound, b2_bound)
    b2 = jax.random.uniform(kb2, (NCLS,), jnp.float32, -b2_bound, b2_bound)

    prepped = prepare_params(wc_oihw, bc, w1, b1, w2, b2)

    out = jax.block_until_ready(my_model_forward(x, *prepped))

    # Tight check vs a reference that uses the same bf16-rounded w1 (verifies
    # the kernel math / layout exactly), plus a sanity check vs pure f32.
    w1_bf = w1.astype(jnp.bfloat16).astype(jnp.float32)
    ref_bf = jax.block_until_ready(ref_forward(x, wc_oihw, bc, w1_bf, b1, w2, b2))
    ref_f32 = jax.block_until_ready(ref_forward(x, wc_oihw, bc, w1, b1, w2, b2))

    assert out.shape == (B, NCLS)
    np.testing.assert_allclose(np.asarray(out), np.asarray(ref_bf),
                               atol=2e-3, rtol=2e-3)
    np.testing.assert_allclose(np.asarray(out), np.asarray(ref_f32),
                               atol=1e-2, rtol=1e-2)
    np.testing.assert_allclose(np.asarray(out).sum(axis=-1),
                               np.ones(B), atol=1e-4)

    print("KERNEL_OK")
</pallas_src>

<mosaic_0001>
module attributes {stable_mosaic.version = 11 : i64} {
  func.func @fused_kernel(%arg0: i32, %arg1: memref<9x2x728xf32, #tpu.memory_space<vmem>>, %arg2: memref<16x1x9xf32, #tpu.memory_space<vmem>>, %arg3: memref<16x1x1xf32, #tpu.memory_space<vmem>>, %arg4: memref<16x728x128xbf16, #tpu.memory_space<vmem>>, %arg5: memref<1x128xf32, #tpu.memory_space<vmem>>, %arg6: memref<128x10xf32, #tpu.memory_space<vmem>>, %arg7: memref<1x10xf32, #tpu.memory_space<vmem>>, %arg8: memref<2x10xf32, #tpu.memory_space<vmem>>, %arg9: memref<2x128xf32, #tpu.memory_space<vmem>>) attributes {dimension_semantics = [#tpu.dimension_semantics<arbitrary>], iteration_bounds = array<i64: 2>, scalar_prefetch = 0 : i64, scratch_operands = 1 : i64, tpu.core_type = #tpu.core_type<tc>, window_params = [{pipeline_mode = #tpu.pipeline_mode<synchronous>, transform_indices = @transform_0, window_bounds = array<i64: 9, 2, 728>}, {transform_indices = @transform_1, window_bounds = array<i64: 16, 1, 9>}, {transform_indices = @transform_2, window_bounds = array<i64: 16, 1, 1>}, {transform_indices = @transform_3, window_bounds = array<i64: 16, 728, 128>}, {pipeline_mode = #tpu.pipeline_mode<synchronous>, transform_indices = @transform_4, window_bounds = array<i64: 1, 128>}, {pipeline_mode = #tpu.pipeline_mode<synchronous>, transform_indices = @transform_5, window_bounds = array<i64: 128, 10>}, {pipeline_mode = #tpu.pipeline_mode<synchronous>, transform_indices = @transform_6, window_bounds = array<i64: 1, 10>}, {pipeline_mode = #tpu.pipeline_mode<synchronous>, transform_indices = @transform_7, window_bounds = array<i64: 2, 10>}]} {
    %c0_i32 = arith.constant 0 : i32
    %0 = arith.cmpi eq, %arg0, %c0_i32 : i32
    %1 = arith.extui %0 : i1 to i32
    %c0_i32_0 = arith.constant 0 : i32
    %2 = arith.cmpi ne, %1, %c0_i32_0 : i32
    scf.if %2 {
      %cst_36 = arith.constant 0.000000e+00 : f32
      %74 = vector.broadcast %cst_36 : f32 to vector<2x128xf32>
      %c0_37 = arith.constant 0 : index
      %c0_38 = arith.constant 0 : index
      %75 = vector.load %arg9[%c0_37, %c0_38] : memref<2x128xf32, #tpu.memory_space<vmem>>, vector<2x128xf32>
      tpu.vector_store %arg9[%c0_37, %c0_38], %74 {strides = array<i32>} : memref<2x128xf32, #tpu.memory_space<vmem>>, vector<2x128xf32>,
    } else {
    }
    %c0 = arith.constant 0 : index
    %c0_1 = arith.constant 0 : index
    %c0_2 = arith.constant 0 : index
    %3 = vector.load %arg2[%c0, %c0_1, %c0_2] : memref<16x1x9xf32, #tpu.memory_space<vmem>>, vector<16x1x9xf32>
    %cst = arith.constant 0.000000e+00 : f32
    %4 = vector.broadcast %cst : f32 to vector<16x2x728xf32>
    %5 = vector.extract_strided_slice %3 {offsets = [0, 0, 0], sizes = [16, 1, 1], strides = [1, 1, 1]} : vector<16x1x9xf32> to vector<16x1x1xf32>
    %c0_3 = arith.constant 0 : index
    %c0_4 = arith.constant 0 : index
    %c0_5 = arith.constant 0 : index
    %6 = vector.load %arg1[%c0_3, %c0_4, %c0_5] : memref<9x2x728xf32, #tpu.memory_space<vmem>>, vector<1x2x728xf32>
    %7 = vector.broadcast %5 : vector<16x1x1xf32> to vector<16x2x728xf32>
    %8 = vector.broadcast %6 : vector<1x2x728xf32> to vector<16x2x728xf32>
    %9 = arith.mulf %7, %8 : vector<16x2x728xf32>
    %10 = arith.addf %4, %9 : vector<16x2x728xf32>
    %11 = vector.extract_strided_slice %3 {offsets = [0, 0, 1], sizes = [16, 1, 1], strides = [1, 1, 1]} : vector<16x1x9xf32> to vector<16x1x1xf32>
    %c1 = arith.constant 1 : index
    %c0_6 = arith.constant 0 : index
    %c0_7 = arith.constant 0 : index
    %12 = vector.load %arg1[%c1, %c0_6, %c0_7] : memref<9x2x728xf32, #tpu.memory_space<vmem>>, vector<1x2x728xf32>
    %13 = vector.broadcast %11 : vector<16x1x1xf32> to vector<16x2x728xf32>
    %14 = vector.broadcast %12 : vector<1x2x728xf32> to vector<16x2x728xf32>
    %15 = arith.mulf %13, %14 : vector<16x2x728xf32>
    %16 = arith.addf %10, %15 : vector<16x2x728xf32>
    %17 = vector.extract_strided_slice %3 {offsets = [0, 0, 2], sizes = [16, 1, 1], strides = [1, 1, 1]} : vector<16x1x9xf32> to vector<16x1x1xf32>
    %c2 = arith.constant 2 : index
    %c0_8 = arith.constant 0 : index
    %c0_9 = arith.constant 0 : index
    %18 = vector.load %arg1[%c2, %c0_8, %c0_9] : memref<9x2x728xf32, #tpu.memory_space<vmem>>, vector<1x2x728xf32>
    %19 = vector.broadcast %17 : vector<16x1x1xf32> to vector<16x2x728xf32>
    %20 = vector.broadcast %18 : vector<1x2x728xf32> to vector<16x2x728xf32>
    %21 = arith.mulf %19, %20 : vector<16x2x728xf32>
    %22 = arith.addf %16, %21 : vector<16x2x728xf32>
    %23 = vector.extract_strided_slice %3 {offsets = [0, 0, 3], sizes = [16, 1, 1], strides = [1, 1, 1]} : vector<16x1x9xf32> to vector<16x1x1xf32>
    %c3 = arith.constant 3 : index
    %c0_10 = arith.constant 0 : index
    %c0_11 = arith.constant 0 : index
    %24 = vector.load %arg1[%c3, %c0_10, %c0_11] : memref<9x2x728xf32, #tpu.memory_space<vmem>>, vector<1x2x728xf32>
    %25 = vector.broadcast %23 : vector<16x1x1xf32> to vector<16x2x728xf32>
    %26 = vector.broadcast %24 : vector<1x2x728xf32> to vector<16x2x728xf32>
    %27 = arith.mulf %25, %26 : vector<16x2x728xf32>
    %28 = arith.addf %22, %27 : vector<16x2x728xf32>
    %29 = vector.extract_strided_slice %3 {offsets = [0, 0, 4], sizes = [16, 1, 1], strides = [1, 1, 1]} : vector<16x1x9xf32> to vector<16x1x1xf32>
    %c4 = arith.constant 4 : index
    %c0_12 = arith.constant 0 : index
    %c0_13 = arith.constant 0 : index
    %30 = vector.load %arg1[%c4, %c0_12, %c0_13] : memref<9x2x728xf32, #tpu.memory_space<vmem>>, vector<1x2x728xf32>
    %31 = vector.broadcast %29 : vector<16x1x1xf32> to vector<16x2x728xf32>
    %32 = vector.broadcast %30 : vector<1x2x728xf32> to vector<16x2x728xf32>
    %33 = arith.mulf %31, %32 : vector<16x2x728xf32>
    %34 = arith.addf %28, %33 : vector<16x2x728xf32>
    %35 = vector.extract_strided_slice %3 {offsets = [0, 0, 5], sizes = [16, 1, 1], strides = [1, 1, 1]} : vector<16x1x9xf32> to vector<16x1x1xf32>
    %c5 = arith.constant 5 : index
    %c0_14 = arith.constant 0 : index
    %c0_15 = arith.constant 0 : index
    %36 = vector.load %arg1[%c5, %c0_14, %c0_15] : memref<9x2x728xf32, #tpu.memory_space<vmem>>, vector<1x2x728xf32>
    %37 = vector.broadcast %35 : vector<16x1x1xf32> to vector<16x2x728xf32>
    %38 = vector.broadcast %36 : vector<1x2x728xf32> to vector<16x2x728xf32>
    %39 = arith.mulf %37, %38 : vector<16x2x728xf32>
    %40 = arith.addf %34, %39 : vector<16x2x728xf32>
    %41 = vector.extract_strided_slice %3 {offsets = [0, 0, 6], sizes = [16, 1, 1], strides = [1, 1, 1]} : vector<16x1x9xf32> to vector<16x1x1xf32>
    %c6 = arith.constant 6 : index
    %c0_16 = arith.constant 0 : index
    %c0_17 = arith.constant 0 : index
    %42 = vector.load %arg1[%c6, %c0_16, %c0_17] : memref<9x2x728xf32, #tpu.memory_space<vmem>>, vector<1x2x728xf32>
    %43 = vector.broadcast %41 : vector<16x1x1xf32> to vector<16x2x728xf32>
    %44 = vector.broadcast %42 : vector<1x2x728xf32> to vector<16x2x728xf32>
    %45 = arith.mulf %43, %44 : vector<16x2x728xf32>
    %46 = arith.addf %40, %45 : vector<16x2x728xf32>
    %47 = vector.extract_strided_slice %3 {offsets = [0, 0, 7], sizes = [16, 1, 1], strides = [1, 1, 1]} : vector<16x1x9xf32> to vector<16x1x1xf32>
    %c7 = arith.constant 7 : index
    %c0_18 = arith.constant 0 : index
    %c0_19 = arith.constant 0 : index
    %48 = vector.load %arg1[%c7, %c0_18, %c0_19] : memref<9x2x728xf32, #tpu.memory_space<vmem>>, vector<1x2x728xf32>
    %49 = vector.broadcast %47 : vector<16x1x1xf32> to vector<16x2x728xf32>
    %50 = vector.broadcast %48 : vector<1x2x728xf32> to vector<16x2x728xf32>
    %51 = arith.mulf %49, %50 : vector<16x2x728xf32>
    %52 = arith.addf %46, %51 : vector<16x2x728xf32>
    %53 = vector.extract_strided_slice %3 {offsets = [0, 0, 8], sizes = [16, 1, 1], strides = [1, 1, 1]} : vector<16x1x9xf32> to vector<16x1x1xf32>
    %c8 = arith.constant 8 : index
    %c0_20 = arith.constant 0 : index
    %c0_21 = arith.constant 0 : index
    %54 = vector.load %arg1[%c8, %c0_20, %c0_21] : memref<9x2x728xf32, #tpu.memory_space<vmem>>, vector<1x2x728xf32>
    %55 = vector.broadcast %53 : vector<16x1x1xf32> to vector<16x2x728xf32>
    %56 = vector.broadcast %54 : vector<1x2x728xf32> to vector<16x2x728xf32>
    %57 = arith.mulf %55, %56 : vector<16x2x728xf32>
    %58 = arith.addf %52, %57 : vector<16x2x728xf32>
    %c0_22 = arith.constant 0 : index
    %c0_23 = arith.constant 0 : index
    %c0_24 = arith.constant 0 : index
    %59 = vector.load %arg3[%c0_22, %c0_23, %c0_24] : memref<16x1x1xf32, #tpu.memory_space<vmem>>, vector<16x1x1xf32>
    %60 = vector.broadcast %59 : vector<16x1x1xf32> to vector<16x2x728xf32>
    %61 = arith.addf %58, %60 : vector<16x2x728xf32>
    %cst_25 = arith.constant 0.000000e+00 : f32
    %62 = vector.broadcast %cst_25 : f32 to vector<16x2x728xf32>
    %63 = arith.maximumf %61, %62 : vector<16x2x728xf32>
    %64 = arith.truncf %63 : vector<16x2x728xf32> to vector<16x2x728xbf16>
    %c0_26 = arith.constant 0 : index
    %c0_27 = arith.constant 0 : index
    %c0_28 = arith.constant 0 : index
    %65 = vector.load %arg4[%c0_26, %c0_27, %c0_28] : memref<16x728x128xbf16, #tpu.memory_space<vmem>>, vector<16x728x128xbf16>
    %cst_29 = arith.constant dense<0.000000e+00> : vector<16x2x128xf32>
    %66 = tpu.matmul %64, %65, %cst_29 {dimension_numbers = #tpu.dot_dimension_numbers<[2], [1], [1], [2], [0, 0, 0, 1, 1, 2], [0], [0]>} : vector<16x2x728xbf16>, vector<16x728x128xbf16>, vector<16x2x128xf32> -> vector<16x2x128xf32>
    %c0_30 = arith.constant 0 : index
    %c0_31 = arith.constant 0 : index
    %67 = vector.load %arg9[%c0_30, %c0_31] : memref<2x128xf32, #tpu.memory_space<vmem>>, vector<2x128xf32>
    %cst_32 = arith.constant dense<0.000000e+00> : vector<2x128xf32>
    %68 = vector.multi_reduction <add>, %66, %cst_32 [0] : vector<16x2x128xf32> to vector<2x128xf32>
    %69 = arith.addf %67, %68 : vector<2x128xf32>
    %c0_33 = arith.constant 0 : index
    %c0_34 = arith.constant 0 : index
    %70 = vector.load %arg9[%c0_33, %c0_34] : memref<2x128xf32, #tpu.memory_space<vmem>>, vector<2x128xf32>
    tpu.vector_store %arg9[%c0_33, %c0_34], %69 {strides = array<i32>} : memref<2x128xf32, #tpu.memory_space<vmem>>, vector<2x128xf32>,
    %c1_i32 = arith.constant 1 : i32
    %71 = arith.cmpi eq, %arg0, %c1_i32 : i32
    %72 = arith.extui %71 : i1 to i32
    %c0_i32_35 = arith.constant 0 : i32
    %73 = arith.cmpi ne, %72, %c0_i32_35 : i32
    scf.if %73 {
      %c0_36 = arith.constant 0 : index
      %c0_37 = arith.constant 0 : index
      %74 = vector.load %arg9[%c0_36, %c0_37] : memref<2x128xf32, #tpu.memory_space<vmem>>, vector<2x128xf32>
      %c0_38 = arith.constant 0 : index
      %c0_39 = arith.constant 0 : index
      %75 = vector.load %arg5[%c0_38, %c0_39] : memref<1x128xf32, #tpu.memory_space<vmem>>, vector<1x128xf32>
      %76 = vector.broadcast %75 : vector<1x128xf32> to vector<2x128xf32>
      %77 = arith.addf %74, %76 : vector<2x128xf32>
      %cst_40 = arith.constant 0.000000e+00 : f32
      %78 = vector.broadcast %cst_40 : f32 to vector<2x128xf32>
      %79 = arith.maximumf %77, %78 : vector<2x128xf32>
      %c0_41 = arith.constant 0 : index
      %c0_42 = arith.constant 0 : index
      %80 = vector.load %arg6[%c0_41, %c0_42] : memref<128x10xf32, #tpu.memory_space<vmem>>, vector<128x10xf32>
      %cst_43 = arith.constant dense<0.000000e+00> : vector<2x10xf32>
      %81 = tpu.matmul %79, %80, %cst_43 {dimension_numbers = #tpu.dot_dimension_numbers<[1], [0], [0], [1], [0, 0, 1, 1], [], []>} : vector<2x128xf32>, vector<128x10xf32>, vector<2x10xf32> -> vector<2x10xf32>
      %c0_44 = arith.constant 0 : index
      %c0_45 = arith.constant 0 : index
      %82 = vector.load %arg7[%c0_44, %c0_45] : memref<1x10xf32, #tpu.memory_space<vmem>>, vector<1x10xf32>
      %83 = vector.broadcast %82 : vector<1x10xf32> to vector<2x10xf32>
      %84 = arith.addf %81, %83 : vector<2x10xf32>
      %cst_46 = arith.constant dense<0xFF800000> : vector<2xf32>
      %85 = vector.multi_reduction <maximumf>, %84, %cst_46 [1] : vector<2x10xf32> to vector<2xf32>
      %86 = vector.shape_cast %85 : vector<2xf32> to vector<2x1xf32>
      %87 = vector.broadcast %86 : vector<2x1xf32> to vector<2x10xf32>
      %88 = arith.subf %84, %87 : vector<2x10xf32>
      %89 = math.exp %88 : vector<2x10xf32>
      %cst_47 = arith.constant dense<0.000000e+00> : vector<2xf32>
      %90 = vector.multi_reduction <add>, %89, %cst_47 [1] : vector<2x10xf32> to vector<2xf32>
      %91 = vector.shape_cast %90 : vector<2xf32> to vector<2x1xf32>
      %92 = vector.broadcast %91 : vector<2x1xf32> to vector<2x10xf32>
      %93 = arith.divf %89, %92 : vector<2x10xf32>
      %c0_48 = arith.constant 0 : index
      %c0_49 = arith.constant 0 : index
      %94 = vector.load %arg8[%c0_48, %c0_49] : memref<2x10xf32, #tpu.memory_space<vmem>>, vector<2x10xf32>
      tpu.vector_store %arg8[%c0_48, %c0_49], %93 {strides = array<i32>} : memref<2x10xf32, #tpu.memory_space<vmem>>, vector<2x10xf32>,
    } else {
    }
    return
  }
  func.func @transform_0(%arg0: i32) -> (i32, i32, i32) {
    %c0_i32 = arith.constant 0 : i32
    %c0_i32_0 = arith.constant 0 : i32
    %c0_i32_1 = arith.constant 0 : i32
    %c0_i32_2 = arith.constant 0 : i32
    return %c0_i32, %c0_i32_0, %c0_i32_1 : i32, i32, i32
  }
  func.func @transform_1(%arg0: i32) -> (i32, i32, i32) {
    %c0_i32 = arith.constant 0 : i32
    %c0_i32_0 = arith.constant 0 : i32
    %c0_i32_1 = arith.constant 0 : i32
    return %arg0, %c0_i32, %c0_i32_0 : i32, i32, i32
  }
  func.func @transform_2(%arg0: i32) -> (i32, i32, i32) {
    %c0_i32 = arith.constant 0 : i32
    %c0_i32_0 = arith.constant 0 : i32
    %c0_i32_1 = arith.constant 0 : i32
    return %arg0, %c0_i32, %c0_i32_0 : i32, i32, i32
  }
  func.func @transform_3(%arg0: i32) -> (i32, i32, i32) {
    %c0_i32 = arith.constant 0 : i32
    %c0_i32_0 = arith.constant 0 : i32
    %c0_i32_1 = arith.constant 0 : i32
    return %arg0, %c0_i32, %c0_i32_0 : i32, i32, i32
  }
  func.func @transform_4(%arg0: i32) -> (i32, i32) {
    %c0_i32 = arith.constant 0 : i32
    %c0_i32_0 = arith.constant 0 : i32
    %c0_i32_1 = arith.constant 0 : i32
    return %c0_i32, %c0_i32_0 : i32, i32
  }
  func.func @transform_5(%arg0: i32) -> (i32, i32) {
    %c0_i32 = arith.constant 0 : i32
    %c0_i32_0 = arith.constant 0 : i32
    %c0_i32_1 = arith.constant 0 : i32
    return %c0_i32, %c0_i32_0 : i32, i32
  }
  func.func @transform_6(%arg0: i32) -> (i32, i32) {
    %c0_i32 = arith.constant 0 : i32
    %c0_i32_0 = arith.constant 0 : i32
    %c0_i32_1 = arith.constant 0 : i32
    return %c0_i32, %c0_i32_0 : i32, i32
  }
  func.func @transform_7(%arg0: i32) -> (i32, i32) {
    %c0_i32 = arith.constant 0 : i32
    %c0_i32_0 = arith.constant 0 : i32
    %c0_i32_1 = arith.constant 0 : i32
    return %c0_i32, %c0_i32_0 : i32, i32
  }
}

</mosaic_0001>

<bundles_post_ra>
// kernel: my_model_forward.1
= control target key start
LH: loop header
LB: loop body
LE: loop exit
PB: predicated region body
PF: predicated region fallthrough
CT: control target
= control target key end

     0   :  { %12 = vsyncpa [#allocation4], 0  ;;  %s16992_s0 = inlined_call_operand.vmem [shape: f32[9,2,728], index: 0, kind: input, shape index: {}]   ;;  %s16993_s1 = inlined_call_operand.vmem [shape: f32[32,1,9], index: 1, kind: input, shape index: {}]   ;;  %s16994_s2 = inlined_call_operand.vmem [shape: f32[32,1,1], index: 2, kind: input, shape index: {}]   ;;  %s16995_s3 = inlined_call_operand.hbm [shape: bf16[32,728,128], index: 3, kind: input, shape index: {}]   ;;  %s16996_s4 = inlined_call_operand.hbm [shape: f32[1,128], index: 4, kind: input, shape index: {}]   ;;  %s16997_s5 = inlined_call_operand.vmem [shape: f32[128,10], index: 5, kind: input, shape index: {}]   ;;  %s16998_s6 = inlined_call_operand.hbm [shape: f32[1,10], index: 6, kind: input, shape index: {}]   ;;  %s16999_s7 = inlined_call_operand.hbm [shape: f32[2,10], index: 7, kind: output, shape index: {}]  }
   0x1   :  { %14 = vsyncpa [#allocation4 + $0x1], 0 }
   0x2   :  { %15 = vsyncpa [#allocation7], 0 }
   0x3   :  { %16 = vsyncpa [#allocation5], 0  ;;  %s13442_s24 = smov 0   ;;  %s13444_s25 = smov 0  }
   0x4   :  { %s13446_s26 = smov 0   ;;  %s13448_s27 = smov 0  }
   0x5 LB: > { %s13461_s28 = sadd.s32 4294967295, %s13381_s27   ;;  %s13464_s29 = sadd.s32 1, %s13381_s27   ;;  %s13381_s27 = sphi %s13448_s27, %s17016_s27   ;;  %s13377_s26 = sphi %s13446_s26, %s17015_s26   ;;  %s13373_s25 = sphi %s13444_s25, %s17014_s25   ;;  %s13369_s24 = sphi %s13442_s24, %s17013_s24  }
   0x6   : > { %s99_s30 = ssub.s32 %s13381_s27, %s13464_s29  ;;  %s102_s8 = sadd.s32 1, %s13377_s26 }
   0x7   : > { %p100_p0 = scmp.eq.s32.totalorder %s99_s30, 0  ;;  %p109_p1 = scmp.ne.s32.totalorder %s13377_s26, %s13373_s25 }
   0x8   : > { %p110_p2 = scmp.eq.s32.totalorder %s13381_s27, 0  ;;  %p115_p3 = scmp.ne.s32.totalorder %s13373_s25, %s13369_s24 }
   0x9   : > { %s13474_s9 = scalar_select %p100_p0, %s13377_s26, %s102_s8  }
   0xa   : > { %p13476_p4 = por %p110_p2, %p109_p1  ;;  %p17000_p5 = scmp.eq.s32.totalorder %s13461_s28, 0 }
   0xb   : > { %p10570_p6 = scmp.ge.s32.totalorder %s13381_s27, 1  ;;  %p210_p7 = scmp.lt.s32.totalorder %s13381_s27, 3 }
   0xc   : > { %p13485_p8 = por %p17000_p5, %p115_p3  ;;  %s13383_s13 = smov [#allocation6]  }
   0xd   : > { %p13490_p10 = pnand %p10570_p6, %p210_p7  ;;  %s226_s14 = sshll.u32 %s13383_s13, 4  ;;  %s227_s14 = int_to_ptr.vmem [resolvable:$true] %s226_s14 }
   0xe   : > { %s17004_s11 = scalar_select %p13485_p8, 1, 0 }
   0xf   : > { %s17005_s12 = scalar_select %p13490_p10, 1, 0 }
  0x10   : > { %p12163_p11 = pneg %p13490_p10  ;;  %p12176_p12 = scmp.lt.s32.totalorder %s13381_s27, 2 }
  0x11   : > { %s13384_s16 = smov [#allocation8]   ;;  %s267_s19 = sand.u32 1, %s13377_s26  }
  0x12   : > { %p13499_p13 = pnand %p12163_p11, %p17000_p5  ;;  %s240_s17 = sshll.u32 %s13384_s16, 4  ;;  %s241_s17 = int_to_ptr.vmem [resolvable:$true] %s240_s17 }
  0x13   : > { %p13505_p0 = pnand %p12176_p12, %p13476_p4  ;;  %s13246_s20 = scalar_lea.vmem %s227_s14, 16 }
  0x14   : > { %p13237_p1 = pneg %p13499_p13  ;;  %p13247_p2 = scmp.ne.s32.totalorder %s227_s14, %s13246_s20 }
  0x15   : > { %s13253_s21 = scalar_lea.vmem %s227_s14, 32  ;;  %p13254_p7 = scmp.lt.s32.totalorder %s227_s14, %s227_s14 }
  0x16   : > { %p13249_p3 = pnand %p13247_p2, %p13237_p1  ;;  %p13255_p11 = scmp.lt.s32.totalorder %s13253_s21, %s13246_s20 }
  0x18   : > { %p13250_p6 = pneg %p13249_p3  ;;  %p13256_p9 = por %p13255_p11, %p13254_p7 }
  0x1a   : > { %p13257_p5 = pnand %p13256_p9, %p13250_p6 }
  0x1c   : > { %13260 = shalt.err (!%p13257_p5)
}
  0x1d   : > { %12166 = dma.hbm_to_vmem [thread:$0]  (!%p13499_p13), %s16996_s4, 16, %s227_s14, [#allocation7]  }
  0x1e   : > { %s13272_s24 = scalar_lea.vmem %s241_s17, 16  ;;  %s13279_s30 = scalar_lea.vmem %s241_s17, 32 }
  0x1f   : > { %p13273_p4 = scmp.ne.s32.totalorder %s241_s17, %s13272_s24  ;;  %p13280_p3 = scmp.lt.s32.totalorder %s241_s17, %s241_s17 }
  0x20   : > { %p13281_p8 = scmp.lt.s32.totalorder %s13279_s30, %s13272_s24 }
  0x21   : > { %p13275_p12 = pnand %p13273_p4, %p13237_p1 }
  0x22   : > { %p13282_p10 = por %p13281_p8, %p13280_p3 }
  0x23   : > { %p13276_p2 = pneg %p13275_p12 }
  0x25   : > { %p13283_p7 = pnand %p13282_p10, %p13276_p2 }
  0x27   : > { %13286 = shalt.err (!%p13283_p7)
}
  0x28   : > { %12169 = dma.hbm_to_vmem [thread:$0]  (!%p13499_p13), %s16998_s6, 16, %s241_s17, [#allocation7]  }
  0x29   : > { %s12146_s13 = smul.u32 5824, %s267_s19  ;;  %s13540_s23 = scalar_lea.sflag [#allocation4], %s267_s19 }
  0x2a   : > { %s12147_s14 = smul.u32 93184, %s13381_s27  ;;  %p13289_p8 = pneg %p13505_p0 }
  0x2b   : > { %s271_s15 = scalar_lea.vmem [#allocation3], %s12146_s13  ;;  %s13292_s30 = scalar_lea.hbm %s16995_s3, 186368 }
  0x2c   : > { %s13534_s21 = scalar_lea.hbm %s16995_s3, %s12147_s14  ;;  %s279_s22 = sshll.u32 %s271_s15, 4  ;;  %s13536_s22 = int_to_ptr.vmem [resolvable:$true] %s279_s22 }
  0x2d   : > { %s13287_s24 = scalar_lea.hbm %s13534_s21, 93184  ;;  %p13293_p13 = scmp.lt.s32.totalorder %s13534_s21, %s16995_s3 }
  0x2e   : > { %p13288_p5 = scmp.ne.s32.totalorder %s13534_s21, %s13287_s24  ;;  %p13294_p1 = scmp.lt.s32.totalorder %s13292_s30, %s13287_s24 }
  0x30   : > { %p13290_p9 = pnand %p13289_p8, %p13288_p5  ;;  %p13295_p6 = por %p13294_p1, %p13293_p13 }
  0x32   : > { %p13291_p10 = pneg %p13290_p9 }
  0x34   : > { %p13296_p11 = pnand %p13295_p6, %p13291_p10 }
  0x36   : > { %13299 = shalt.err (!%p13296_p11)
}
  0x37   : > { %s13300_s19 = scalar_lea.vmem %s13536_s22, 93184  ;;  %s13385_s13 = smov [#allocation3]  }
  0x38   : > { %p13301_p4 = scmp.ne.s32.totalorder %s13536_s22, %s13300_s19  ;;  %s13305_s14 = sshll.u32 %s13385_s13, 4  ;;  %s13306_s14 = int_to_ptr.vmem [resolvable:$false] %s13305_s14 }
  0x39   : > { %s13307_s16 = scalar_lea.vmem %s13306_s14, 186368  ;;  %p13308_p3 = scmp.lt.s32.totalorder %s13536_s22, %s13306_s14 }
  0x3a   : > { %p13303_p12 = pnand %p13301_p4, %p13289_p8  ;;  %p13309_p7 = scmp.lt.s32.totalorder %s13307_s16, %s13300_s19 }
  0x3c   : > { %p13304_p2 = pneg %p13303_p12  ;;  %p13310_p5 = por %p13309_p7, %p13308_p3 }
  0x3e   : > { %p13311_p9 = pnand %p13310_p5, %p13304_p2 }
  0x40   : > { %13314 = shalt.err (!%p13311_p9)
}
  0x41   : > { %s13386_s20 = smov 64   ;;  %s13387_s15 = smov 4  }
  0x42   : > { %12173 = dma.hbm_to_vmem [thread:$0]  (!%p13505_p0), %s13534_s21, 93184, %s13536_s22, %s13540_s23, %s13386_s20, %s13386_s20, %s13387_s15  }
  0x43   : > { %p17008_p8 = scmp.ne.s32.totalorder %s17005_s12, 0 }
  0x44   : > { %s293_s24 = sand.u32 (!%p17008_p8), 1, %s13373_s25   ;;  %p17009_p10 = scmp.ne.s32.totalorder (!%p17008_p8), %s17004_s11, 0 }
  0x45   : > { %291 = sbr.rel (%p17008_p8) target bundleno = 1951 (0x79f), region = 48  ;;  %s294_s17 = scalar_lea.sflag (!%p17008_p8), [#allocation4], %s293_s24 }
  0x46   : > { %s12148_s27 = smul.u32 (!%p17008_p8), 5824, %s293_s24 }
  0x48   : > { %s13564_s30 = scalar_lea.vmem (!%p17008_p8), [#allocation3], %s12148_s27 }
  0x4a   : > { %13356 = dma.done.wait (%p17009_p10), %s294_s17, 93184  }
  0x4b   : > { %13358 = vsyncadd (%p17009_p10), %s294_s17, 4294874112  ;;  %p17010_p13 = scmp.eq.s32.totalorder %s13461_s28, 0 }
  0x4d   : > { %13360 = dma.done.wait (%p17010_p13), [#allocation7], 32   ;;  %p17011_p0 = pmov %p17010_p13 }
  0x4e   : > { %s10580_s12 = sshll.u32 %s13461_s28, 4  ;;  %p17012_p6 = scmp.ne.s32.totalorder %s13461_s28, 0 }
  0x4f   : > { %13362 = vsyncadd (%p17011_p0), [#allocation7], 4294967264  ;;  %p340_p1 = scmp.lt.s32.totalorder %s10580_s12, 31 }
  0x50   : > { %354 = sbr.rel (%p17012_p6) target bundleno = 87 (0x57), region = 64 }
  0x51   : > { %s17018_s12 = smov (!%p340_p1, %s10580_s12), 31 }
  0x52   : > { %s13578_s22 = scalar_lea.vmem %s16993_s1, %s17018_s12  ;;  %s13583_s11 = scalar_lea.vmem %s16994_s2, %s17018_s12 }
  0x55   : > { %v13388_v0 = vmov 0.0  }
  0x56   : > { %355 = vst [vmem:[#allocation2] sm:$0x3] %v13388_v0 }
  0x57 PF: > { %v10583_v1 = vld [vmem:[%s13578_s22] ss:$0 sm:$0xff]  ;;  %v13389_v2 = vmov 2   ;;  %v13390_v3 = vmov 0   ;;  %v13391_v5 = vmov 3   ;;  %v13392_v6 = vmov 1  }
  0x58   : > { %12233 = vset.pattern.permute.xlu1 %v13389_v2  ;;  %12231 = vset.pattern.permute.xlu0 %v13390_v3  ;;  %v12387_v4 = vld [vmem:[%s13564_s30 + $0x78] sm:$0xff]   ;;  %v12391_v10 = vld [vmem:[%s13564_s30 + $0x70] sm:$0xff]   ;;  %v13393_v11 = vmov 4   ;;  %v13394_v12 = vmov 5   ;;  %v12395_v16 = vld [vmem:[%s13564_s30 + $0x68] sm:$0xff]   ;;  %v13395_v17 = vmov 6  }
  0x59   : > { %717 = vperm.xlu1 %12233, %v10583_v1   ;;  %455 = vperm.xlu0 %12231, %v10583_v1   ;;  %v12388_v7 = vld [vmem:[%s13564_s30 + $0x38] sm:$0xff]   ;;  %v12392_v13 = vld [vmem:[%s13564_s30 + $0x30] sm:$0xff]   ;;  %v13396_v18 = vmov 8   ;;  %v12396_v19 = vld [vmem:[%s13564_s30 + $0x28] sm:$0xff]   ;;  %v13397_v24 = vmov 7   ;;  %vm4207_vm0 = vcmask 719872  }
  0x5a   : > { %11390 = vmatprep.subr.bf16.mxu0 %v12387_v4  ;;  %v12389_v8 = vld [vmem:[%s13564_s30 + $0xf8] sm:$0xff]   ;;  %v12393_v14 = vld [vmem:[%s13564_s30 + $0xf0] sm:$0xff]   ;;  %v12397_v21 = vld [vmem:[%s13564_s30 + $0xe8] sm:$0xff]   ;;  %vm4211_vm1 = vcmask 1043456   ;;  %vm10321_vm2 = vcmask 1041408   ;;  %p11383_p11 = scmp.ne.s32.totalorder %s13461_s28, 1 }
  0x5b   : > { %11391 = vmatpush3.bf16.msra.mxu0 %v12388_v7  ;;  %v12390_v9 = vld [vmem:[%s13564_s30 + $0xb8] sm:$0xff]   ;;  %11412 = vmatprep.subr.bf16.mxu1 %v12389_v8  ;;  %v12394_v15 = vld [vmem:[%s13564_s30 + $0xb0] sm:$0xff]   ;;  %v12398_v22 = vld [vmem:[%s13564_s30 + $0xa8] sm:$0xff]  }
  0x5c   : > { %11413 = vmatpush3.bf16.msra.mxu1 %v12390_v9  ;;  %11392 = vmatprep.subr.bf16.mxu0 %v12391_v10  ;;  %v13607_v20 = vld [vmem:[%s13578_s22 + $0x1] ss:$0 sm:$0xff]  ;;  %v12399_v23 = vld [vmem:[%s13564_s30 + $0x60] sm:$0xff]   ;;  %v10615_v27 = vld [vmem:[%s13583_s11] ss:$0 sm:$0xff] }
  0x5d   : > { %12234 = vset.pattern.permute.xlu1 %v13391_v5  ;;  %12232 = vset.pattern.permute.xlu0 %v13392_v6  ;;  %v12400_v25 = vld [vmem:[%s13564_s30 + $0x20] sm:$0xff]   ;;  %v12403_v29 = vld [vmem:[%s13564_s30 + $0x58] sm:$0xff]   ;;  %v12407_v33 = vld [vmem:[%s13564_s30 + $0x50] sm:$0xff]  }
  0x5e   : > { %848 = vperm.xlu1 %12234, %v10583_v1   ;;  %586 = vperm.xlu0 %12232, %v10583_v1   ;;  %v12401_v26 = vld [vmem:[%s13564_s30 + $0xe0] sm:$0xff]   ;;  %v12404_v30 = vld [vmem:[%s13564_s30 + $0x18] sm:$0xff]   ;;  %v12408_v34 = vld [vmem:[%s13564_s30 + $0x10] sm:$0xff]  }
  0x5f   : > { %11393 = vmatpush3.bf16.msra.mxu0 %v12392_v13  ;;  %11414 = vmatprep.subr.bf16.mxu1 %v12393_v14  ;;  %v12402_v28 = vld [vmem:[%s13564_s30 + $0xa0] sm:$0xff]   ;;  %v12405_v31 = vld [vmem:[%s13564_s30 + $0xd8] sm:$0xff]   ;;  %v12409_v35 = vld [vmem:[%s13564_s30 + $0xd0] sm:$0xff]  }
  0x60   : > { %11415 = vmatpush3.bf16.msra.mxu1 %v12394_v15  ;;  %11394 = vmatprep.subr.bf16.mxu0 %v12395_v16  ;;  %v12406_v32 = vld [vmem:[%s13564_s30 + $0x98] sm:$0xff]   ;;  %v12410_v36 = vld [vmem:[%s13564_s30 + $0x90] sm:$0xff]   ;;  %v13634_v37 = vld [vmem:[%s13578_s22 + $0x2] ss:$0 sm:$0xff] }
  0x61   : > { %11416 = vmatprep.subr.bf16.mxu1 %v12397_v21  ;;  %v12411_v38 = vld [vmem:[%s13564_s30 + $0x48] sm:$0xff]   ;;  %v12415_v42 = vld [vmem:[%s13564_s30 + $0x40] sm:$0xff]   ;;  %v10616_v49 = vld [vmem:[%s13583_s11 + $0x1] ss:$0 sm:$0xff] }
  0x62   : > { %12235 = vset.pattern.permute.xlu1 %v13393_v11  ;;  %12236 = vset.pattern.permute.xlu0 %v13394_v12  ;;  %v12412_v39 = vld [vmem:[%s13564_s30 + $0x8] sm:$0xff]   ;;  %v12416_v43 = vld [vmem:[%s13564_s30] sm:$0xff]   ;;  %v13718_v57 = vld [vmem:[%s16992_s0 + $0x18] sm:$0xff] }
  0x63   : > { %979 = vperm.xlu1 %12235, %v10583_v1   ;;  %1110 = vperm.xlu0 %12236, %v10583_v1   ;;  %v12413_v40 = vld [vmem:[%s13564_s30 + $0xc8] sm:$0xff]   ;;  %v12417_v44 = vld [vmem:[%s13564_s30 + $0xc0] sm:$0xff]   ;;  %v13728_v59 = vld [vmem:[%s16992_s0 + $0x14] sm:$0xf] }
  0x64   : > { %11395 = vmatpush3.bf16.msra.mxu0 %v12396_v19  ;;  %11417 = vmatpush3.bf16.msra.mxu1 %v12398_v22  ;;  %v12414_v41 = vld [vmem:[%s13564_s30 + $0x88] sm:$0xff]   ;;  %v12418_v45 = vld [vmem:[%s13564_s30 + $0x80] sm:$0xff]   ;;  %v13753_v9 = vld [vmem:[%s16992_s0 + $0x38] sm:$0xf] }
  0x65   : > { %11396 = vmatprep.subr.bf16.mxu0 %v12399_v23  ;;  %11418 = vmatprep.subr.bf16.mxu1 %v12401_v26  ;;  %v12420_v46 = vld [vmem:[%s13564_s30 + $0x1e4] sm:$0xff]   ;;  %v10617_v47 = vld [vmem:[%s13583_s11 + $0x2] ss:$0 sm:$0xff]  ;;  %v10586_v48 = vld [vmem:[%s13578_s22 + $0x3] ss:$0 sm:$0xff] }
  0x66   : > { %v13676_v50 = vld [vmem:[%s13578_s22 + $0x4] ss:$0 sm:$0xff]  ;;  %v10618_v51 = vld [vmem:[%s13583_s11 + $0x3] ss:$0 sm:$0xff]  ;;  %v13708_v55 = vld [vmem:[%s16992_s0 + $0x8] sm:$0xf] }
  0x67   : > { %12237 = vset.pattern.permute.xlu1 %v13395_v17  ;;  %12239 = vset.pattern.permute.xlu0 %v13396_v18  ;;  %v13703_v54 = vld [vmem:[%s16992_s0] sm:$0xff]  ;;  %v13713_v56 = vld [vmem:[%s16992_s0 + $0xc] sm:$0xff] }
  0x68   : > { %1241 = vperm.xlu1 %12237, %v10583_v1   ;;  %1503 = vperm.xlu0 %12239, %v10583_v1   ;;  %v13723_v58 = vld [vmem:[%s16992_s0 + $0x20] sm:$0xf]  ;;  %v13733_v60 = vld [vmem:[%s16992_s0 + $0x24] sm:$0xff]  ;;  %v13738_v61 = vld [vmem:[%s16992_s0 + $0x2c] sm:$0xf] }
  0x69   : > { %11397 = vmatpush3.bf16.msra.mxu0 %v12400_v25  ;;  %11419 = vmatpush3.bf16.msra.mxu1 %v12402_v28  ;;  %v13748_v8 = vld [vmem:[%s16992_s0 + $0x30] sm:$0xff]  ;;  %v13760_v16 = vld [vmem:[%s16992_s0 + $0x3c] sm:$0xff]  ;;  %v13768_v25 = vld [vmem:[%s16992_s0 + $0x44] sm:$0xf] }
  0x6a   : > { %11398 = vmatprep.subr.bf16.mxu0 %v12403_v29  ;;  %11420 = vmatprep.subr.bf16.mxu1 %v12405_v31 }
  0x6c   : > { %12238 = vset.pattern.permute.xlu1 %v13397_v24  ;;  %12241 = vset.pattern.permute.xlu0 %v13392_v6 }
  0x6d   : > { %1372 = vperm.xlu1 %12238, %v10583_v1   ;;  %590 = vperm.xlu0 %12241, %v13607_v20  }
  0x6e   : > { %11399 = vmatpush3.bf16.msra.mxu0 %v12404_v30  ;;  %11421 = vmatpush3.bf16.msra.mxu1 %v12406_v32 }
  0x6f   : > { %11400 = vmatprep.subr.bf16.mxu0 %v12407_v33  ;;  %11422 = vmatprep.subr.bf16.mxu1 %v12409_v35  ;;  %v13778_v33 = vld [vmem:[%s16992_s0 + $0x48] sm:$0xff] }
  0x71   : > { %12240 = vset.pattern.permute.xlu1 %v13390_v3  ;;  %12244 = vset.pattern.permute.xlu0 %v13393_v11 }
  0x72   : > { %1727 = vperm.xlu1 %12240, %v10615_v27   ;;  %983 = vperm.xlu0 %12244, %v13607_v20  }
  0x73   : > { %11401 = vmatpush3.bf16.msra.mxu0 %v12408_v34  ;;  %11423 = vmatpush3.bf16.msra.mxu1 %v12410_v36  ;;  %v13783_v36 = vld [vmem:[%s16992_s0 + $0x50] sm:$0xf] }
  0x74   : > { %11402 = vmatprep.subr.bf16.mxu0 %v12411_v38  ;;  %11424 = vmatprep.subr.bf16.mxu1 %v12413_v40  ;;  %v13789_v38 = vld [vmem:[%s16992_s0 + $0x60] sm:$0xff] }
  0x76   : > { %459 = vperm.xlu1 %12240, %v13607_v20   ;;  %12247 = vset.pattern.permute.xlu0 %v13397_v24 }
  0x77   : > { %1376 = vperm.xlu0 %12247, %v13607_v20   ;;  %11403 = vmatpush3.bf16.msra.mxu0 %v12412_v39  ;;  %v13795_v39 = vld [vmem:[%s16992_s0 + $0x54] sm:$0xff] }
  0x78   : > { %11404 = vmatprep.subr.bf16.mxu0 %v12415_v42  ;;  %11425 = vmatpush3.bf16.msra.mxu1 %v12414_v41 }
  0x79   : > { %11426 = vmatprep.subr.bf16.mxu1 %v12417_v44  ;;  %v13802_v44 = vld [vmem:[%s16992_s0 + $0x68] sm:$0xf] }
  0x7a   : > { %12242 = vset.pattern.permute.xlu1 %v13389_v2 }
  0x7b   : > { %721 = vperm.xlu1 %12242, %v13607_v20   ;;  %12250 = vset.pattern.permute.xlu0 %v13390_v3 }
  0x7c   : > { %463 = vperm.xlu0 %12250, %v13634_v37   ;;  %11405 = vmatpush3.bf16.msra.mxu0 %v12416_v43 }
  0x7d   : > { %4295 = vmatprep.subr.bf16.mxu0 %v13390_v3  ;;  %11427 = vmatpush3.bf16.msra.mxu1 %v12418_v45 }
  0x7e   : > { %11434 = vmatprep.subr.bf16.mxu1 %v12420_v46  ;;  %v13807_v46 = vld [vmem:[%s16992_s0 + $0x5c] sm:$0xf] }
  0x7f   : > { %12243 = vset.pattern.permute.xlu1 %v13391_v5 }
  0x80   : > { %852 = vperm.xlu1 %12243, %v13607_v20   ;;  %12253 = vset.pattern.permute.xlu0 %v13391_v5 }
  0x81   : > { %856 = vperm.xlu0 %12253, %v13634_v37  }
  0x84   : > { %12245 = vset.pattern.permute.xlu1 %v13394_v12 }
  0x85   : > { %1114 = vperm.xlu1 %12245, %v13607_v20   ;;  %12256 = vset.pattern.permute.xlu0 %v13395_v17 }
  0x86   : > { %1249 = vperm.xlu0 %12256, %v13634_v37  }
  0x89   : > { %12246 = vset.pattern.permute.xlu1 %v13395_v17 }
  0x8a   : > { %1245 = vperm.xlu1 %12246, %v13607_v20   ;;  %12259 = vset.pattern.permute.xlu0 %v13390_v3 }
  0x8b   : > { %1735 = vperm.xlu0 %12259, %v10617_v47   ;;  %v13398_v47 = vmov 1983009808  }
  0x8e   : > { %12248 = vset.pattern.permute.xlu1 %v13396_v18 }
  0x8f   : > { %1507 = vperm.xlu1 %12248, %v13607_v20   ;;  %12262 = vset.pattern.permute.xlu0 %v13389_v2 }
  0x90   : > { %729 = vperm.xlu0 %12262, %v10586_v48  }
  0x93   : > { %12249 = vset.pattern.permute.xlu1 %v13390_v3 }
  0x94   : > { %1731 = vperm.xlu1 %12249, %v10616_v49   ;;  %12265 = vset.pattern.permute.xlu0 %v13394_v12  ;;  %v1890_v49 = vlaneseq }
  0x95   : > { %1122 = vperm.xlu0 %12265, %v10586_v48  }
  0x98   : > { %12251 = vset.pattern.permute.xlu1 %v13392_v6 }
  0x99   : > { %594 = vperm.xlu1 %12251, %v13634_v37   ;;  %12268 = vset.pattern.permute.xlu0 %v13396_v18 }
  0x9a   : > { %1515 = vperm.xlu0 %12268, %v10586_v48  }
  0x9d   : > { %12252 = vset.pattern.permute.xlu1 %v13389_v2 }
  0x9e   : > { %725 = vperm.xlu1 %12252, %v13634_v37   ;;  %12270 = vset.pattern.permute.xlu0 %v13392_v6 }
  0x9f   : > { %602 = vperm.xlu0 %12270, %v13676_v50  }
  0xa2   : > { %12254 = vset.pattern.permute.xlu1 %v13393_v11 }
  0xa3   : > { %987 = vperm.xlu1 %12254, %v13634_v37   ;;  %12273 = vset.pattern.permute.xlu0 %v13393_v11 }
  0xa4   : > { %995 = vperm.xlu0 %12273, %v13676_v50  }
  0xa7   : > { %12255 = vset.pattern.permute.xlu1 %v13394_v12 }
  0xa8   : > { %1118 = vperm.xlu1 %12255, %v13634_v37   ;;  %12276 = vset.pattern.permute.xlu0 %v13397_v24 }
  0xa9   : > { %1388 = vperm.xlu0 %12276, %v13676_v50  }
  0xac   : > { %12257 = vset.pattern.permute.xlu1 %v13397_v24 }
  0xad   : > { %1380 = vperm.xlu1 %12257, %v13634_v37   ;;  %12279 = vset.pattern.permute.xlu0 %v13390_v3 }
  0xb1   : > { %12258 = vset.pattern.permute.xlu1 %v13396_v18 }
  0xb2   : > { %1511 = vperm.xlu1 %12258, %v13634_v37  }
  0xb6   : > { %12260 = vset.pattern.permute.xlu1 %v13390_v3 }
  0xb7   : > { %467 = vperm.xlu1 %12260, %v10586_v48  }
  0xbb   : > { %12261 = vset.pattern.permute.xlu1 %v13392_v6 }
  0xbc   : > { %598 = vperm.xlu1 %12261, %v10586_v48  }
  0xc0   : > { %12263 = vset.pattern.permute.xlu1 %v13391_v5 }
  0xc1   : > { %860 = vperm.xlu1 %12263, %v10586_v48  }
  0xc5   : > { %12264 = vset.pattern.permute.xlu1 %v13393_v11 }
  0xc6   : > { %991 = vperm.xlu1 %12264, %v10586_v48  }
  0xca   : > { %12266 = vset.pattern.permute.xlu1 %v13395_v17 }
  0xcb   : > { %1253 = vperm.xlu1 %12266, %v10586_v48  }
  0xcf   : > { %12267 = vset.pattern.permute.xlu1 %v13397_v24 }
  0xd0   : > { %1384 = vperm.xlu1 %12267, %v10586_v48   ;;  %v1888_v48 = vunpack.c.l.s4 %v13398_v47 }
  0xd4   : > { %v718_v52 = vpop.permute.xlu1 %717  ;;  %v456_v53 = vpop.permute.xlu0 %455  ;;  %12269 = vset.pattern.permute.xlu1 %v13390_v3 }
  0xd5   : > { %1739 = vperm.xlu1 %12269, %v10618_v51   ;;  %v518_v0 = vmul.f32 %v456_v53, %v13703_v54  ;;  %v519_v1 = vmul.f32 %v456_v53, %v13708_v55  ;;  %v780_v10 = vmul.f32 %v13718_v57, %v718_v52  ;;  %v781_v13 = vmul.f32 %v13723_v58, %v718_v52 }
  0xd9   : > { %v849_v62 = vpop.permute.xlu1 %848  ;;  %v587_v63 = vpop.permute.xlu0 %586  ;;  %471 = vperm.xlu1 %12269, %v13676_v50  }
  0xda   : > { %v649_v4 = vmul.f32 %v13713_v56, %v587_v63  ;;  %v650_v7 = vmul.f32 %v13728_v59, %v587_v63  ;;  %v911_v19 = vmul.f32 %v13733_v60, %v849_v62  ;;  %v912_v20 = vmul.f32 %v13738_v61, %v849_v62 }
  0xdc   : > { %v681_v14 = vadd.f32 %v649_v4, %v518_v0  ;;  %v682_v15 = vadd.f32 %v650_v7, %v519_v1 }
  0xdd   : > { %12271 = vset.pattern.permute.xlu1 %v13389_v2 }
  0xde   : > { %v812_v21 = vadd.f32 %v780_v10, %v681_v14  ;;  %v813_v22 = vadd.f32 %v781_v13, %v682_v15  ;;  %v980_v23 = vpop.permute.xlu1 %979  ;;  %v1111_v26 = vpop.permute.xlu0 %1110  ;;  %733 = vperm.xlu1 %12271, %v13676_v50   ;;  %v1889_v10 = vunpack.c.0.s8 %v1888_v48  ;;  %v1891_v13 = vshrl.u32 %v1890_v49, 7  ;;  %v13816_v14 = vld [vmem:[%s13578_s22 + $0x5] ss:$0 sm:$0xff] }
  0xdf   : > { %v1042_v27 = vmul.f32 %v13748_v8, %v980_v23  ;;  %v1043_v28 = vmul.f32 %v13753_v9, %v980_v23  ;;  %v1173_v31 = vmul.f32 %v13760_v16, %v1111_v26  ;;  %v1174_v32 = vmul.f32 %v13768_v25, %v1111_v26  ;;  %475 = vperm.xlu0 %12279, %v13816_v14  }
  0xe0   : > { %v943_v29 = vadd.f32 %v911_v19, %v812_v21  ;;  %v944_v30 = vadd.f32 %v912_v20, %v813_v22  ;;  %v13821_v21 = vsub.s32 %v1889_v10, %v1891_v13 }
  0xe2   : > { %v1074_v34 = vadd.f32 %v1042_v27, %v943_v29  ;;  %v1075_v35 = vadd.f32 %v1043_v28, %v944_v30  ;;  %12272 = vset.pattern.permute.xlu1 %v13391_v5 }
  0xe3   : > { %v1242_v37 = vpop.permute.xlu1 %1241  ;;  %864 = vperm.xlu1 %12272, %v13676_v50   ;;  %v1504_v45 = vpop.permute.xlu0 %1503  ;;  %12282 = vset.pattern.permute.xlu0 %v13391_v5 }
  0xe4   : > { %v1205_v40 = vadd.f32 %v1173_v31, %v1074_v34  ;;  %v1206_v41 = vadd.f32 %v1174_v32, %v1075_v35  ;;  %v1304_v42 = vmul.f32 %v13778_v33, %v1242_v37  ;;  %v1305_v43 = vmul.f32 %v13783_v36, %v1242_v37  ;;  %868 = vperm.xlu0 %12282, %v13816_v14   ;;  %v10619_v34 = vld [vmem:[%s13583_s11 + $0x4] ss:$0 sm:$0xff] }
  0xe5   : > { %v1566_v52 = vmul.f32 %v13789_v38, %v1504_v45  ;;  %v1567_v53 = vmul.f32 %v13802_v44, %v1504_v45  ;;  %v12419_v45 = vld [vmem:[%s13564_s30 + $0x138] sm:$0xff]  }
  0xe6   : > { %v1336_v62 = vadd.f32 %v1304_v42, %v1205_v40  ;;  %v1337_v63 = vadd.f32 %v1305_v43, %v1206_v41 }
  0xe7   : > { %12274 = vset.pattern.permute.xlu1 %v13394_v12 }
  0xe8   : > { %v1373_v51 = vpop.permute.xlu1 %1372  ;;  %1126 = vperm.xlu1 %12274, %v13676_v50   ;;  %v591_v30 = vpop.permute.xlu0 %590  ;;  %12285 = vset.pattern.permute.xlu0 %v13395_v17 }
  0xe9   : > { %v1435_v0 = vmul.f32 %v13795_v39, %v1373_v51  ;;  %v1436_v1 = vmul.f32 %v13807_v46, %v1373_v51  ;;  %v651_v41 = vmul.f32 %v13713_v56, %v591_v30  ;;  %1261 = vperm.xlu0 %12285, %v13816_v14  }
  0xeb   : > { %v1467_v4 = vadd.f32 %v1435_v0, %v1336_v62  ;;  %v1468_v7 = vadd.f32 %v1436_v1, %v1337_v63  ;;  %v12423_v0 = vld [vmem:[%s13564_s30 + $0x1dc] sm:$0xff]  }
  0xec   : > { %12275 = vset.pattern.permute.xlu1 %v13395_v17 }
  0xed   : > { %v1728_v15 = vpop.permute.xlu1 %1727  ;;  %v1598_v19 = vadd.f32 %v1566_v52, %v1467_v4  ;;  %v1599_v20 = vadd.f32 %v1567_v53, %v1468_v7  ;;  %1257 = vperm.xlu1 %12275, %v13676_v50   ;;  %v12421_v52 = vld [vmem:[%s13564_s30 + $0x1a4] sm:$0xff]   ;;  %12288 = vset.pattern.permute.xlu0 %v13390_v3  ;;  %v984_v4 = vpop.permute.xlu0 %983  ;;  %v12422_v7 = vld [vmem:[%s13564_s30 + $0x130] sm:$0xff]  }
  0xef   : > { %v1790_v22 = vadd.f32 %v1728_v15, %v1598_v19  ;;  %v1791_v23 = vadd.f32 %v1728_v15, %v1599_v20  ;;  %v12424_v15 = vld [vmem:[%s13564_s30 + $0x19c] sm:$0xff]   ;;  %v1044_v20 = vmul.f32 %v13748_v8, %v984_v4 }
  0xf1   : > { %v1822_v26 = vmax.f32 %v1790_v22, 0.0  ;;  %v1823_v27 = vmax.f32 %v1791_v23, 0.0  ;;  %v460_v28 = vpop.permute.xlu1 %459  ;;  %12277 = vset.pattern.permute.xlu1 %v13396_v18  ;;  %v12426_v22 = vld [vmem:[%s13564_s30 + $0x1d4] sm:$0xff]   ;;  %v12425_v23 = vld [vmem:[%s13564_s30 + $0x128] sm:$0xff]  }
  0xf2   : > { %1519 = vperm.xlu1 %12277, %v13676_v50   ;;  %v520_v40 = vmul.f32 %v460_v28, %v13703_v54 }
  0xf3   : > { %v13828_v29 = vrot.slane %v1823_v27, %v13821_v21  ;;  %v1893_v31 = vrot.slane %v1822_v26, %v13821_v21  ;;  %v1886_v32 = vcombine.high %v1822_v26, %v1822_v26  ;;  %v12427_v27 = vld [vmem:[%s13564_s30 + $0x194] sm:$0xff]  }
  0xf4   : > { %v683_v53 = vadd.f32 %v651_v41, %v520_v40  ;;  %v12428_v40 = vld [vmem:[%s13564_s30 + $0x120] sm:$0xff]   ;;  %v13862_v41 = vpop.permute.xlu0 %1376 }
  0xf5   : > { %v1901_v35 = vcombine.high %v1893_v31, %v1893_v31  ;;  %v1900_v37 = vrot.slane %v1886_v32, %v13821_v21  ;;  %v1910_v42 = vcombine.high %v13828_v29, %v13828_v29  ;;  %v2382_v49 = vpack.c.bf16 %v1893_v31, %v1893_v31 }
  0xf6   : > { %v722_v50 = vpop.permute.xlu1 %721  ;;  %12278 = vset.pattern.permute.xlu1 %v13390_v3 }
  0xf7   : > { %v2383_v43 = vpack.c.bf16 %v1901_v35, %v1901_v35  ;;  %v1902_v47 = vcombine.high %v1900_v37, %v1900_v37  ;;  %1743 = vperm.xlu1 %12278, %v10619_v34   ;;  %v782_v48 = vmul.f32 %v13718_v57, %v722_v50  ;;  %v2387_v62 = vpack.c.bf16 %v1910_v42, %v1910_v42  ;;  %v12429_v34 = vld [vmem:[%s13564_s30 + $0x1cc] sm:$0xff]  }
  0xf8   : > { %v2384_v63 = vpack.c.bf16 %v1900_v37, %v1900_v37  ;;  %v521_v35 = vmul.f32 %v460_v28, %v13708_v55  ;;  %v652_v37 = vmul.f32 %v13728_v59, %v591_v30  ;;  %v783_v42 = vmul.f32 %v13723_v58, %v722_v50  ;;  %v12430_v28 = vld [vmem:[%s13564_s30 + $0x18c] sm:$0xff]   ;;  %v12433_v50 = vld [vmem:[%s13564_s30 + $0x184] sm:$0xff]  }
  0xf9   : > { %4247 = vmatprep.mubr.bf16.mxu0 %v2383_v43  ;;  %v2385_v51 = vpack.c.bf16 %v1902_v47, %v1902_v47  ;;  %v814_v10 = vadd.f32 %v782_v48, %v683_v53  ;;  %v1437_v30 = vmul.f32 %v13795_v39, %v13862_v41 }
  0xfa   : > { %4248 = vmatmul.mubr.bf16.vlgmr.msra.gmra.mxu0 %v2382_v49  ;;  %v684_v47 = vadd.f32 %v652_v37, %v521_v35  ;;  %v12431_v49 = vld [vmem:[%s13564_s30 + $0x118] sm:$0xff]   ;;  %v12440_v35 = vld [vmem:[%s13564_s30 + $0x100] sm:$0xff]  }
  0xfb   : > { %4296 = vmatpush1.bf16.msra.mxu0 %v12419_v45  ;;  %v853_v1 = vpop.permute.xlu1 %852  ;;  %4287 = vmatprep.mubr.bf16.mxu1 %v2385_v51  ;;  %v12432_v45 = vld [vmem:[%s13564_s30 + $0x1c4] sm:$0xff]   ;;  %v10620_v51 = vld [vmem:[%s13583_s11 + $0x5] ss:$0 sm:$0xff] }
  0xfc   : > { %v913_v13 = vmul.f32 %v13733_v60, %v853_v1  ;;  %10677 = vmatprep.mubr.msk.bf16.mxu0 %vm4207_vm0, %v2387_v62  ;;  %4288 = vmatmul.mubr.bf16.vlgmr.msra.gmra.mxu1 %v2384_v63  ;;  %v914_v48 = vmul.f32 %v13738_v61, %v853_v1  ;;  %v12435_v61 = vld [vmem:[%s13564_s30 + $0x1bc] sm:$0xff]  }
  0xfd   : > { %11435 = vmatpush3.bf16.msra.mxu1 %v12421_v52  ;;  %4297 = vmatprep.subr.bf16.mxu0 %v13390_v3  ;;  %v815_v52 = vadd.f32 %v783_v42, %v684_v47 }
  0xfe   : > { %v945_v19 = vadd.f32 %v913_v13, %v814_v10  ;;  %11436 = vmatprep.subr.bf16.mxu1 %v12423_v0  ;;  %12280 = vset.pattern.permute.xlu1 %v13392_v6  ;;  %v1045_v0 = vmul.f32 %v13753_v9, %v984_v4  ;;  %v12436_v13 = vld [vmem:[%s13564_s30 + $0x17c] sm:$0xff]  }
  0xff   : > { %4298 = vmatpush1.bf16.msra.mxu0 %v12422_v7  ;;  %606 = vperm.xlu1 %12280, %v13816_v14   ;;  %v946_v63 = vadd.f32 %v914_v48, %v815_v52  ;;  %v12434_v7 = vld [vmem:[%s13564_s30 + $0x110] sm:$0xff]  }
 0x100   : > { %v1115_v26 = vpop.permute.xlu1 %1114  ;;  %4299 = vmatprep.subr.bf16.mxu0 %v13390_v3  ;;  %v1076_v31 = vadd.f32 %v1044_v20, %v945_v19  ;;  %1747 = vperm.xlu0 %12288, %v10620_v51   ;;  %v12437_v20 = vld [vmem:[%s13564_s30 + $0x108] sm:$0xff]  }
 0x101   : > { %11437 = vmatpush3.bf16.msra.mxu1 %v12424_v15  ;;  %v1175_v32 = vmul.f32 %v13760_v16, %v1115_v26  ;;  %v12438_v15 = vld [vmem:[%s13564_s30 + $0x1b4] sm:$0xff]   ;;  %v1077_v9 = vadd.f32 %v1045_v0, %v946_v63  ;;  %v1176_v4 = vmul.f32 %v13768_v25, %v1115_v26  ;;  %v12441_v25 = vld [vmem:[%s13564_s30 + $0x1ac] sm:$0xff]   ;;  %v12443_v26 = vld [vmem:[%s13564_s30 + $0x168] ss:$0 sps:$4 sm:$0xff]  }
 0x102   : > { %11438 = vmatprep.subr.bf16.mxu1 %v12426_v22  ;;  %v12447_v63 = vld [vmem:[%s13564_s30 + $0x25c] sm:$0xff]  }
 0x103   : > { %4300 = vmatpush1.bf16.msra.mxu0 %v12425_v23  ;;  %12281 = vset.pattern.permute.xlu1 %v13389_v2  ;;  %v1207_v43 = vadd.f32 %v1175_v32, %v1076_v31  ;;  %v13896_v23 = vpop.permute.xlu0 %463  ;;  %v12439_v31 = vld [vmem:[%s13564_s30 + $0x174] sm:$0xff]  }
 0x104   : > { %4301 = vmatprep.subr.bf16.mxu0 %v13390_v3  ;;  %737 = vperm.xlu1 %12281, %v13816_v14   ;;  %v522_v42 = vmul.f32 %v13896_v23, %v13703_v54  ;;  %v4213_v54 = vsel %vm4211_vm1, %v12443_v26, 0  ;;  %v12456_v26 = vld [vmem:[%s13564_s30 + $0x244] sm:$0xff]  }
 0x105   : > { %11439 = vmatpush3.bf16.msra.mxu1 %v12427_v27  ;;  %v1246_v55 = vpop.permute.xlu1 %1245  ;;  %12291 = vset.pattern.permute.xlu0 %v13389_v2 }
 0x106   : > { %v1306_v59 = vmul.f32 %v13778_v33, %v1246_v55  ;;  %11440 = vmatprep.subr.bf16.mxu1 %v12429_v34  ;;  %v1307_v27 = vmul.f32 %v13783_v36, %v1246_v55  ;;  %v1208_v34 = vadd.f32 %v1176_v4, %v1077_v9  ;;  %v12451_v9 = vld [vmem:[%s13564_s30 + $0x214] sm:$0xff]  }
 0x107   : > { %4302 = vmatpush1.bf16.msra.mxu0 %v12428_v40  ;;  %v13920_v48 = vpop.permute.xlu0 %856 }
 0x108   : > { %v1338_v58 = vadd.f32 %v1306_v59, %v1207_v43  ;;  %4303 = vmatprep.subr.bf16.mxu0 %v13390_v3  ;;  %12283 = vset.pattern.permute.xlu1 %v13393_v11  ;;  %v1339_v55 = vadd.f32 %v1307_v27, %v1208_v34  ;;  %v12442_v43 = vld [vmem:[%s13564_s30 + $0x16c] sm:$0xff]   ;;  %v915_v52 = vmul.f32 %v13733_v60, %v13920_v48 }
 0x109   : > { %11441 = vmatpush3.bf16.msra.mxu1 %v12430_v28  ;;  %999 = vperm.xlu1 %12283, %v13816_v14   ;;  %v1438_v28 = vmul.f32 %v13807_v46, %v13862_v41  ;;  %v12452_v27 = vld [vmem:[%s13564_s30 + $0x150] sm:$0xff]  }
 0x10a   : > { %v1469_v53 = vadd.f32 %v1437_v30, %v1338_v58  ;;  %v1508_v62 = vpop.permute.xlu1 %1507  ;;  %11442 = vmatprep.subr.bf16.mxu1 %v12432_v45  ;;  %v12444_v45 = vld [vmem:[%s13564_s30 + $0x264] sm:$0xff]  }
 0x10b   : > { %v1568_v1 = vmul.f32 %v13789_v38, %v1508_v62  ;;  %4304 = vmatpush1.bf16.msra.mxu0 %v12431_v49  ;;  %v1470_v49 = vadd.f32 %v1438_v28, %v1339_v55  ;;  %v1569_v51 = vmul.f32 %v13802_v44, %v1508_v62  ;;  %v12445_v58 = vld [vmem:[%s13564_s30 + $0x224] sm:$0xff]   ;;  %v13950_v4 = vpop.permute.xlu0 %1249  ;;  %v12459_v55 = vld [vmem:[%s13564_s30 + $0x23c] sm:$0xff]  }
 0x10c   : > { %4305 = vmatprep.subr.bf16.mxu0 %v13390_v3  ;;  %v12446_v44 = vld [vmem:[%s13564_s30 + $0x160] sm:$0xff]  }
 0x10d   : > { %11443 = vmatpush3.bf16.msra.mxu1 %v12433_v50  ;;  %v1600_v10 = vadd.f32 %v1568_v1, %v1469_v53  ;;  %12284 = vset.pattern.permute.xlu1 %v13394_v12  ;;  %v1601_v60 = vadd.f32 %v1569_v51, %v1470_v49  ;;  %v12450_v1 = vld [vmem:[%s13564_s30 + $0x254] sm:$0xff]   ;;  %v12458_v28 = vld [vmem:[%s13564_s30 + $0x140] sm:$0xff]   ;;  %v2386_v49 = vpack.c.bf16 %v13828_v29, %v13828_v29 }
 0x10e   : > { %11444 = vmatprep.subr.bf16.mxu1 %v12435_v61  ;;  %1130 = vperm.xlu1 %12284, %v13816_v14   ;;  %v14004_v29 = vld [vmem:[%s16992_s0 + $0x14] sm:$0xf] }
 0x10f   : > { %4306 = vmatpush1.bf16.msra.mxu0 %v12434_v7  ;;  %v13890_v19 = vpop.permute.xlu1 %1731 }
 0x110   : > { %v1792_v22 = vadd.f32 %v13890_v19, %v1600_v10  ;;  %4307 = vmatprep.subr.bf16.mxu0 %v13390_v3 }
 0x111   : > { %11445 = vmatpush3.bf16.msra.mxu1 %v12436_v13 }
 0x112   : > { %v1824_v32 = vmax.f32 %v1792_v22, 0.0  ;;  %11446 = vmatprep.subr.bf16.mxu1 %v12438_v15  ;;  %12286 = vset.pattern.permute.xlu1 %v13397_v24  ;;  %v1793_v15 = vadd.f32 %v13890_v19, %v1601_v60  ;;  %v1308_v19 = vmul.f32 %v13778_v33, %v13950_v4  ;;  %v12457_v33 = vld [vmem:[%s13564_s30 + $0x204] sm:$0xff]   ;;  %v12466_v60 = vld [vmem:[%s13564_s30 + $0x1ec] sm:$0xff]  }
 0x113   : > { %4308 = vmatpush1.bf16.msra.mxu0 %v12437_v20  ;;  %1392 = vperm.xlu1 %12286, %v13816_v14   ;;  %v12453_v20 = vld [vmem:[%s13564_s30 + $0x24c] sm:$0xff]  }
 0x114   : > { %v1911_v37 = vcombine.high %v1824_v32, %v1824_v32  ;;  %v1918_v40 = vrot.slane %v1824_v32, %v13821_v21  ;;  %4309 = vmatprep.subr.bf16.mxu0 %v13390_v3  ;;  %v13907_v36 = vpop.permute.xlu1 %594  ;;  %v1825_v32 = vmax.f32 %v1793_v15, 0.0 }
 0x115   : > { %11447 = vmatpush3.bf16.msra.mxu1 %v12439_v31  ;;  %v653_v59 = vmul.f32 %v13713_v56, %v13907_v36 }
 0x116   : > { %11448 = vmatprep.subr.bf16.mxu1 %v12441_v25  ;;  %v1926_v30 = vcombine.high %v1918_v40, %v1918_v40  ;;  %v13918_v47 = vrot.slane %v1911_v37, %v13821_v21  ;;  %v2388_v53 = vpack.c.bf16 %v1918_v40, %v1918_v40  ;;  %v12454_v25 = vld [vmem:[%s13564_s30 + $0x20c] sm:$0xff]   ;;  %v13968_v40 = vrot.slane %v1825_v32, %v13821_v21 }
 0x117   : > { %4310 = vmatpush1.bf16.msra.mxu0 %v12440_v35  ;;  %12287 = vset.pattern.permute.xlu1 %v13396_v18  ;;  %v685_v41 = vadd.f32 %v653_v59, %v522_v42  ;;  %v12455_v35 = vld [vmem:[%s13564_s30 + $0x148] sm:$0xff]   ;;  %v12460_v59 = vld [vmem:[%s13564_s30 + $0x1fc] sm:$0xff]  }
 0x118   : > { %4315 = vmatprep.subr.bf16.mxu0 %v13390_v3  ;;  %v2389_v46 = vpack.c.bf16 %v1926_v30, %v1926_v30  ;;  %v1927_v56 = vcombine.high %v13918_v47, %v13918_v47  ;;  %1523 = vperm.xlu1 %12287, %v13816_v14   ;;  %v12448_v14 = vld [vmem:[%s13564_s30 + $0x21c] sm:$0xff]   ;;  %v1935_v30 = vcombine.high %v13968_v40, %v13968_v40  ;;  %v12472_v32 = vld [vmem:[%s13564_s30 + $0x308] sm:$0xff]  }
 0x119   : > { %11449 = vmatpush3.bf16.msra.mxu1 %v12442_v43  ;;  %v13929_v50 = vpop.permute.xlu1 %725 }
 0x11a   : > { %4646 = vmatprep.mubr.bf16.mxu1 %v2389_v46  ;;  %11456 = vmatprep.subr.bf16.mxu1 %v12444_v45  ;;  %v2391_v61 = vpack.c.bf16 %v1927_v56, %v1927_v56  ;;  %v784_v0 = vmul.f32 %v13718_v57, %v13929_v50  ;;  %v12449_v57 = vld [vmem:[%s13564_s30 + $0x158] sm:$0xff]   ;;  %v12461_v56 = vld [vmem:[%s13564_s30 + $0x2a4] sm:$0xff]  }
 0x11b   : > { %4316 = vmatpush2.bf16.msra.mxu0 %v4213_v54  ;;  %v13982_v54 = vld [vmem:[%s13578_s22 + $0x6] ss:$0 sm:$0xff] }
 0x11c   : > { %4647 = vmatmul.mubr.bf16.vlgmr.msra.gmra.mxu1 %v2388_v53  ;;  %4317 = vmatprep.subr.bf16.mxu0 %v13390_v3  ;;  %v816_v62 = vadd.f32 %v784_v0, %v685_v41  ;;  %v13989_v41 = vpop.permute.xlu0 %1735  ;;  %v14011_v0 = vld [vmem:[%s16992_s0 + $0x8] sm:$0xf] }
 0x11d   : > { %11457 = vmatpush3.bf16.msra.mxu1 %v12445_v58  ;;  %4686 = vmatprep.mubr.bf16.mxu1 %v2391_v61  ;;  %v2393_v58 = vpack.c.bf16 %v1935_v30, %v1935_v30  ;;  %v12464_v61 = vld [vmem:[%s13564_s30 + $0x29c] sm:$0xff]   ;;  %v12479_v30 = vld [vmem:[%s13564_s30 + $0x274] sm:$0xff]  }
 0x11e   : > { %11458 = vmatprep.subr.bf16.mxu1 %v12447_v63  ;;  %v13941_v7 = vpop.permute.xlu1 %987  ;;  %v947_v10 = vadd.f32 %v915_v52, %v816_v62  ;;  %12289 = vset.pattern.permute.xlu1 %v13390_v3  ;;  %v12463_v52 = vld [vmem:[%s13564_s30 + $0x1f4] sm:$0xff]   ;;  %v654_v63 = vmul.f32 %v14004_v29, %v13907_v36 }
 0x11f   : > { %4318 = vmatpush2.bf16.msra.mxu0 %v12446_v44  ;;  %v1046_v13 = vmul.f32 %v13748_v8, %v13941_v7  ;;  %479 = vperm.xlu1 %12289, %v13982_v54   ;;  %v523_v44 = vmul.f32 %v14011_v0, %v13896_v23  ;;  %v12468_v36 = vld [vmem:[%s13564_s30 + $0x350] sm:$0xff]   ;;  %v14031_v23 = vld [vmem:[%s16992_s0 + $0x20] sm:$0xf] }
 0x120   : > { %4319 = vmatprep.subr.bf16.mxu0 %v13390_v3  ;;  %741 = vperm.xlu0 %12291, %v13982_v54  }
 0x121   : > { %11459 = vmatpush3.bf16.msra.mxu1 %v12448_v14  ;;  %v1078_v22 = vadd.f32 %v1046_v13, %v947_v10  ;;  %v785_v10 = vmul.f32 %v14031_v23, %v13929_v50  ;;  %v12469_v13 = vld [vmem:[%s13564_s30 + $0x310] sm:$0xff]  }
 0x122   : > { %11460 = vmatprep.subr.bf16.mxu1 %v12450_v1  ;;  %v12467_v1 = vld [vmem:[%s13564_s30 + $0x294] sm:$0xff]  }
 0x123   : > { %4320 = vmatpush2.bf16.msra.mxu0 %v12449_v57  ;;  %v13954_v31 = vpop.permute.xlu1 %1118  ;;  %12290 = vset.pattern.permute.xlu1 %v13392_v6  ;;  %v686_v57 = vadd.f32 %v654_v63, %v523_v44  ;;  %v12482_v63 = vld [vmem:[%s13564_s30 + $0x26c] sm:$0xff]  }
 0x124   : > { %4321 = vmatprep.subr.bf16.mxu0 %v13390_v3  ;;  %v1177_v8 = vmul.f32 %v13760_v16, %v13954_v31  ;;  %610 = vperm.xlu1 %12290, %v13982_v54  }
 0x125   : > { %11461 = vmatpush3.bf16.msra.mxu1 %v12451_v9  ;;  %12294 = vset.pattern.permute.xlu0 %v13394_v12  ;;  %v2390_v9 = vpack.c.bf16 %v13918_v47, %v13918_v47 }
 0x126   : > { %11462 = vmatprep.subr.bf16.mxu1 %v12453_v20  ;;  %v1209_v34 = vadd.f32 %v1177_v8, %v1078_v22  ;;  %v12471_v20 = vld [vmem:[%s13564_s30 + $0x348] sm:$0xff]   ;;  %1134 = vperm.xlu0 %12294, %v13982_v54  }
 0x127   : > { %4322 = vmatpush2.bf16.msra.mxu0 %v12452_v27  ;;  %v12470_v22 = vld [vmem:[%s13564_s30 + $0x28c] sm:$0xff]   ;;  %v817_v27 = vadd.f32 %v785_v10, %v686_v57  ;;  %v14131_v10 = vld [vmem:[%s16992_s0 + $0x5c] sm:$0xf] }
 0x128   : > { %4323 = vmatprep.subr.bf16.mxu0 %v13390_v3  ;;  %v13965_v37 = vpop.permute.xlu1 %1380  ;;  %v1340_v16 = vadd.f32 %v1308_v19, %v1209_v34  ;;  %12292 = vset.pattern.permute.xlu1 %v13391_v5  ;;  %v14049_v8 = vld [vmem:[%s16992_s0 + $0x2c] sm:$0xf] }
 0x129   : > { %11463 = vmatpush3.bf16.msra.mxu1 %v12454_v25  ;;  %v1439_v42 = vmul.f32 %v13795_v39, %v13965_v37  ;;  %v12462_v39 = vld [vmem:[%s13564_s30 + $0x234] sm:$0xff]   ;;  %872 = vperm.xlu1 %12292, %v13982_v54   ;;  %v916_v47 = vmul.f32 %v14049_v8, %v13920_v48  ;;  %v12474_v25 = vld [vmem:[%s13564_s30 + $0x340] sm:$0xff]   ;;  %v1440_v57 = vmul.f32 %v14131_v10, %v13965_v37 }
 0x12a   : > { %11464 = vmatprep.subr.bf16.mxu1 %v12456_v26  ;;  %v12473_v26 = vld [vmem:[%s13564_s30 + $0x284] sm:$0xff]   ;;  %v14063_v48 = vld [vmem:[%s16992_s0 + $0x38] sm:$0xf]  ;;  %12297 = vset.pattern.permute.xlu0 %v13396_v18 }
 0x12b   : > { %4324 = vmatpush2.bf16.msra.mxu0 %v12455_v35  ;;  %v1471_v43 = vadd.f32 %v1439_v42, %v1340_v16  ;;  %v1047_v34 = vmul.f32 %v14063_v48, %v13941_v7  ;;  %v948_v35 = vadd.f32 %v916_v47, %v817_v27  ;;  %v12475_v16 = vld [vmem:[%s13564_s30 + $0x300] sm:$0xff]   ;;  %1527 = vperm.xlu0 %12297, %v13982_v54   ;;  %v12477_v42 = vld [vmem:[%s13564_s30 + $0x338] sm:$0xff]  }
 0x12c   : > { %4325 = vmatprep.subr.bf16.mxu0 %v13390_v3  ;;  %v10621_v37 = vld [vmem:[%s13583_s11 + $0x6] ss:$0 sm:$0xff] }
 0x12d   : > { %11465 = vmatpush3.bf16.msra.mxu1 %v12457_v33  ;;  %v13979_v45 = vpop.permute.xlu1 %1511  ;;  %12293 = vset.pattern.permute.xlu1 %v13393_v11  ;;  %v12476_v33 = vld [vmem:[%s13564_s30 + $0x27c] sm:$0xff]   ;;  %v1079_v7 = vadd.f32 %v1047_v34, %v948_v35 }
 0x12e   : > { %11466 = vmatprep.subr.bf16.mxu1 %v12459_v55  ;;  %v1570_v46 = vmul.f32 %v13789_v38, %v13979_v45  ;;  %v12465_v38 = vld [vmem:[%s13564_s30 + $0x22c] sm:$0xff]   ;;  %1003 = vperm.xlu1 %12293, %v13982_v54   ;;  %v12487_v34 = vld [vmem:[%s13564_s30 + $0x2e0] sm:$0xff]  }
 0x12f   : > { %4326 = vmatpush2.bf16.msra.mxu0 %v12458_v28  ;;  %v12478_v28 = vld [vmem:[%s13564_s30 + $0x2f8] sm:$0xff]   ;;  %12299 = vset.pattern.permute.xlu0 %v13392_v6 }
 0x130   : > { %4694 = vmatprep.subr.bf16.mxu0 %v13390_v3  ;;  %v1602_v51 = vadd.f32 %v1570_v46, %v1471_v43  ;;  %v14080_v43 = vld [vmem:[%s16992_s0 + $0x44] sm:$0xf] }
 0x131   : > { %11467 = vmatpush3.bf16.msra.mxu1 %v12460_v59  ;;  %v1178_v59 = vmul.f32 %v14080_v43, %v13954_v31 }
 0x132   : > { %4328 = vmatmul.mubr.bf16.vlgmr.msra.gmra.mxu0 %v2386_v49  ;;  %11468 = vmatprep.subr.bf16.mxu1 %v12462_v39  ;;  %v1794_v53 = vadd.f32 %v13989_v41, %v1602_v51  ;;  %v14053_v19 = vpop.permute.xlu1 %467  ;;  %v14090_v39 = vld [vmem:[%s16992_s0] sm:$0xff]  ;;  %v12480_v49 = vld [vmem:[%s13564_s30 + $0x330] sm:$0xff]   ;;  %v14103_v51 = vpop.permute.xlu0 %729 }
 0x133   : > { %4695 = vmatpush1.bf16.msra.mxu0 %v12461_v56  ;;  %10724 = vmatprep.mubr.msk.bf16.mxu0 %vm4207_vm0, %v2393_v58  ;;  %v524_v46 = vmul.f32 %v14090_v39, %v14053_v19  ;;  %v14097_v56 = vld [vmem:[%s16992_s0 + $0xc] sm:$0xff] }
 0x134   : > { %4696 = vmatprep.subr.bf16.mxu0 %v13390_v3  ;;  %v14015_v62 = vmax.f32 %v1794_v53, 0.0  ;;  %12295 = vset.pattern.permute.xlu1 %v13395_v17  ;;  %v12481_v58 = vld [vmem:[%s13564_s30 + $0x2f0] sm:$0xff]  }
 0x135   : > { %11469 = vmatpush3.bf16.msra.mxu1 %v12463_v52  ;;  %1265 = vperm.xlu1 %12295, %v13982_v54   ;;  %v1210_v52 = vadd.f32 %v1178_v59, %v1079_v7 }
 0x136   : > { %11470 = vmatprep.subr.bf16.mxu1 %v12465_v38  ;;  %v14023_v14 = vrot.slane %v14015_v62, %v13821_v21  ;;  %v14109_v38 = vld [vmem:[%s16992_s0 + $0x50] sm:$0xf] }
 0x137   : > { %4697 = vmatpush1.bf16.msra.mxu0 %v12464_v61  ;;  %v14073_v55 = vpop.permute.xlu1 %598  ;;  %v1309_v53 = vmul.f32 %v14109_v38, %v13950_v4  ;;  %v12483_v4 = vld [vmem:[%s13564_s30 + $0x328] sm:$0xff]  }
 0x138   : > { %4698 = vmatprep.subr.bf16.mxu0 %v13390_v3  ;;  %v1951_v15 = vcombine.high %v14023_v14, %v14023_v14  ;;  %v655_v31 = vmul.f32 %v14097_v56, %v14073_v55 }
 0x139   : > { %11471 = vmatpush3.bf16.msra.mxu1 %v12466_v60  ;;  %12296 = vset.pattern.permute.xlu1 %v13397_v24  ;;  %v14121_v60 = vld [vmem:[%s16992_s0 + $0x18] sm:$0xff] }
 0x13a   : > { %11478 = vmatprep.subr.bf16.mxu1 %v12468_v36  ;;  %v2395_v50 = vpack.c.bf16 %v1951_v15, %v1951_v15  ;;  %v687_v44 = vadd.f32 %v655_v31, %v524_v46  ;;  %v786_v36 = vmul.f32 %v14121_v60, %v14103_v51  ;;  %1396 = vperm.xlu1 %12296, %v13982_v54   ;;  %v12484_v15 = vld [vmem:[%s13564_s30 + $0x2e8] sm:$0xff]  }
 0x13b   : > { %4699 = vmatpush1.bf16.msra.mxu0 %v12467_v1  ;;  %v12485_v1 = vld [vmem:[%s13564_s30 + $0x2d4] ss:$0 sps:$4 sm:$0xff]   ;;  %v1936_v54 = vcombine.high %v14015_v62, %v14015_v62 }
 0x13c   : > { %4687 = vmatmul.mubr.bf16.vlgmr.msra.gmra.mxu1 %v2390_v9  ;;  %4700 = vmatprep.subr.bf16.mxu0 %v13390_v3  ;;  %v14114_v61 = vpop.permute.xlu1 %860  ;;  %v14142_v9 = vld [vmem:[%s16992_s0 + $0x24] sm:$0xff]  ;;  %v4612_v62 = vsel %vm4211_vm1, %v12485_v1, 0 }
 0x13d   : > { %11479 = vmatpush3.bf16.msra.mxu1 %v12469_v13  ;;  %5045 = vmatprep.mubr.bf16.mxu1 %v2395_v50  ;;  %v1341_v13 = vadd.f32 %v1309_v53, %v1210_v52  ;;  %v12486_v50 = vld [vmem:[%s13564_s30 + $0x320] sm:$0xff]   ;;  %v12492_v52 = vld [vmem:[%s13564_s30 + $0x3d0] sm:$0xff]  }
 0x13e   : > { %11480 = vmatprep.subr.bf16.mxu1 %v12471_v20  ;;  %v917_v20 = vmul.f32 %v14142_v9, %v14114_v61  ;;  %12298 = vset.pattern.permute.xlu1 %v13390_v3  ;;  %v12491_v53 = vld [vmem:[%s13564_s30 + $0x2c4] sm:$0xff]  }
 0x13f   : > { %4701 = vmatpush1.bf16.msra.mxu0 %v12470_v22  ;;  %v818_v22 = vadd.f32 %v786_v36, %v687_v44  ;;  %1751 = vperm.xlu1 %12298, %v10621_v37   ;;  %v1472_v47 = vadd.f32 %v1440_v57, %v1341_v13  ;;  %v12493_v44 = vld [vmem:[%s13564_s30 + $0x390] sm:$0xff]   ;;  %v14199_v57 = vld [vmem:[%s16992_s0 + $0x48] sm:$0xff] }
 0x140   : > { %4702 = vmatprep.subr.bf16.mxu0 %v13390_v3  ;;  %v12498_v37 = vld [vmem:[%s13564_s30 + $0x3c0] sm:$0xff]  }
 0x141   : > { %11481 = vmatpush3.bf16.msra.mxu1 %v12472_v32  ;;  %v14149_v27 = vpop.permute.xlu1 %991  ;;  %v14156_v32 = vld [vmem:[%s16992_s0 + $0x68] sm:$0xf]  ;;  %v949_v35 = vadd.f32 %v917_v20, %v818_v22 }
 0x142   : > { %11482 = vmatprep.subr.bf16.mxu1 %v12474_v25  ;;  %v1571_v25 = vmul.f32 %v14156_v32, %v13979_v45  ;;  %v14172_v45 = vpop.permute.xlu0 %1122  ;;  %v12496_v20 = vld [vmem:[%s13564_s30 + $0x388] sm:$0xff]  }
 0x143   : > { %4703 = vmatpush1.bf16.msra.mxu0 %v12473_v26  ;;  %v14161_v26 = vrot.slane %v1936_v54, %v13821_v21 }
 0x144   : > { %4704 = vmatprep.subr.bf16.mxu0 %v13390_v3  ;;  %v1603_v59 = vadd.f32 %v1571_v25, %v1472_v47 }
 0x145   : > { %11483 = vmatpush3.bf16.msra.mxu1 %v12475_v16  ;;  %v14167_v16 = vld [vmem:[%s16992_s0 + $0x30] sm:$0xff]  ;;  %v1952_v46 = vcombine.high %v14161_v26, %v14161_v26 }
 0x146   : > { %11484 = vmatprep.subr.bf16.mxu1 %v12477_v42  ;;  %v12489_v42 = vld [vmem:[%s13564_s30 + $0x318] sm:$0xff]   ;;  %v14176_v7 = vpop.permute.xlu1 %1253  ;;  %v1795_v36 = vadd.f32 %v13989_v41, %v1603_v59  ;;  %v14220_v25 = vpop.permute.xlu0 %1515 }
 0x147   : > { %4705 = vmatpush1.bf16.msra.mxu0 %v12476_v33  ;;  %v1048_v33 = vmul.f32 %v14167_v16, %v14149_v27  ;;  %v2397_v1 = vpack.c.bf16 %v1952_v46, %v1952_v46  ;;  %v1310_v13 = vmul.f32 %v14199_v57, %v14176_v7  ;;  %v12494_v41 = vld [vmem:[%s13564_s30 + $0x2bc] sm:$0xff]   ;;  %v12500_v46 = vld [vmem:[%s13564_s30 + $0x2ac] sm:$0xff]  }
 0x148   : > { %4706 = vmatprep.subr.bf16.mxu0 %v13390_v3  ;;  %v1827_v22 = vmax.f32 %v1795_v36, 0.0  ;;  %v14235_v59 = vld [vmem:[%s16992_s0 + $0x60] sm:$0xff]  ;;  %v2392_v36 = vpack.c.bf16 %v13968_v40, %v13968_v40  ;;  %v12506_v40 = vld [vmem:[%s13564_s30 + $0x408] sm:$0xff]  }
 0x149   : > { %11485 = vmatpush3.bf16.msra.mxu1 %v12478_v28  ;;  %v12488_v28 = vld [vmem:[%s13564_s30 + $0x2cc] sm:$0xff]   ;;  %v1080_v31 = vadd.f32 %v1048_v33, %v949_v35  ;;  %v12499_v35 = vld [vmem:[%s13564_s30 + $0x380] sm:$0xff]  }
 0x14a   : > { %11486 = vmatprep.subr.bf16.mxu1 %v12480_v49  ;;  %v14184_v49 = vld [vmem:[%s16992_s0 + $0x3c] sm:$0xff]  ;;  %v14229_v33 = vrot.slane %v1827_v22, %v13821_v21  ;;  %v12508_v22 = vld [vmem:[%s13564_s30 + $0x368] sm:$0xff]  }
 0x14b   : > { %4707 = vmatpush1.bf16.msra.mxu0 %v12479_v30  ;;  %v12490_v30 = vld [vmem:[%s13564_s30 + $0x2d8] sm:$0xff]   ;;  %v14206_v54 = vpop.permute.xlu1 %1384 }
 0x14c   : > { %4708 = vmatprep.subr.bf16.mxu0 %v13390_v3 }
 0x14d   : > { %11487 = vmatpush3.bf16.msra.mxu1 %v12481_v58  ;;  %v1179_v58 = vmul.f32 %v14184_v49, %v14172_v45 }
 0x14e   : > { %11488 = vmatprep.subr.bf16.mxu1 %v12483_v4  ;;  %v12495_v4 = vld [vmem:[%s13564_s30 + $0x3c8] sm:$0xff]  }
 0x14f   : > { %4709 = vmatpush1.bf16.msra.mxu0 %v12482_v63  ;;  %v2394_v63 = vpack.c.bf16 %v14023_v14, %v14023_v14  ;;  %v14204_v14 = vld [vmem:[%s13578_s22 + $0x7] ss:$0 sm:$0xff] }
 0x150   : > { %4714 = vmatprep.subr.bf16.mxu0 %v13390_v3  ;;  %483 = vperm.xlu1 %12298, %v14204_v14  }
 0x151   : > { %11489 = vmatpush3.bf16.msra.mxu1 %v12484_v15  ;;  %v1211_v15 = vadd.f32 %v1179_v58, %v1080_v31  ;;  %614 = vperm.xlu0 %12299, %v14204_v14   ;;  %v12502_v31 = vld [vmem:[%s13564_s30 + $0x378] sm:$0xff]   ;;  %v1960_v58 = vcombine.high %v14229_v33, %v14229_v33 }
 0x152   : > { %11490 = vmatprep.subr.bf16.mxu1 %v12486_v50 }
 0x153   : > { %4715 = vmatpush2.bf16.msra.mxu0 %v4612_v62  ;;  %v1342_v50 = vadd.f32 %v1310_v13, %v1211_v15  ;;  %v14216_v62 = vld [vmem:[%s16992_s0 + $0x54] sm:$0xff]  ;;  %v12507_v13 = vld [vmem:[%s13564_s30 + $0x3a8] sm:$0xff]  }
 0x154   : > { %4716 = vmatprep.subr.bf16.mxu0 %v13390_v3  ;;  %v1441_v47 = vmul.f32 %v14216_v62, %v14206_v54  ;;  %12300 = vset.pattern.permute.xlu1 %v13389_v2 }
 0x155   : > { %11491 = vmatpush3.bf16.msra.mxu1 %v12487_v34  ;;  %v12497_v34 = vld [vmem:[%s13564_s30 + $0x2b4] sm:$0xff]   ;;  %745 = vperm.xlu1 %12300, %v14204_v14  }
 0x156   : > { %11492 = vmatprep.subr.bf16.mxu1 %v12489_v42  ;;  %v12501_v42 = vld [vmem:[%s13564_s30 + $0x3b8] sm:$0xff]   ;;  %12302 = vset.pattern.permute.xlu0 %v13393_v11 }
 0x157   : > { %4717 = vmatpush2.bf16.msra.mxu0 %v12488_v28  ;;  %v1473_v28 = vadd.f32 %v1441_v47, %v1342_v50  ;;  %1007 = vperm.xlu0 %12302, %v14204_v14   ;;  %v12509_v47 = vld [vmem:[%s13564_s30 + $0x400] sm:$0xff]  }
 0x158   : > { %4718 = vmatprep.subr.bf16.mxu0 %v13390_v3 }
 0x159   : > { %11493 = vmatpush3.bf16.msra.mxu1 %v12490_v30  ;;  %v1572_v30 = vmul.f32 %v14235_v59, %v14220_v25  ;;  %12301 = vset.pattern.permute.xlu1 %v13391_v5 }
 0x15a   : > { %11500 = vmatprep.subr.bf16.mxu1 %v12492_v52  ;;  %v12504_v52 = vld [vmem:[%s13564_s30 + $0x3b0] sm:$0xff]   ;;  %876 = vperm.xlu1 %12301, %v14204_v14  }
 0x15b   : > { %4719 = vmatpush2.bf16.msra.mxu0 %v12491_v53  ;;  %v1604_v53 = vadd.f32 %v1572_v30, %v1473_v28  ;;  %12305 = vset.pattern.permute.xlu0 %v13397_v24  ;;  %v12516_v28 = vld [vmem:[%s13564_s30 + $0x4bc] sm:$0xff]  }
 0x15c   : > { %5046 = vmatmul.mubr.bf16.vlgmr.msra.gmra.mxu1 %v2394_v63  ;;  %4720 = vmatprep.subr.bf16.mxu0 %v13390_v3  ;;  %v14249_v63 = vpop.permute.xlu1 %1739 }
 0x15d   : > { %11501 = vmatpush3.bf16.msra.mxu1 %v12493_v44  ;;  %5085 = vmatprep.mubr.bf16.mxu1 %v2397_v1  ;;  %v12503_v44 = vld [vmem:[%s13564_s30 + $0x410] sm:$0xff]   ;;  %v2399_v1 = vpack.c.bf16 %v1960_v58, %v1960_v58  ;;  %v1796_v15 = vadd.f32 %v14249_v63, %v1604_v53  ;;  %v12518_v58 = vld [vmem:[%s13564_s30 + $0x3e8] sm:$0xff]  }
 0x15e   : > { %11502 = vmatprep.subr.bf16.mxu1 %v12495_v4  ;;  %v12505_v4 = vld [vmem:[%s13564_s30 + $0x370] sm:$0xff]   ;;  %1400 = vperm.xlu0 %12305, %v14204_v14  }
 0x15f   : > { %4721 = vmatpush2.bf16.msra.mxu0 %v12494_v41  ;;  %12303 = vset.pattern.permute.xlu1 %v13394_v12  ;;  %v525_v41 = vmul.f32 %v14011_v0, %v14053_v19  ;;  %v14271_v50 = vmax.f32 %v1796_v15, 0.0  ;;  %v12511_v19 = vld [vmem:[%s13564_s30 + $0x360] sm:$0xff]   ;;  %v12524_v15 = vld [vmem:[%s13564_s30 + $0x3d8] sm:$0xff]  }
 0x160   : > { %4722 = vmatprep.subr.bf16.mxu0 %v13390_v3  ;;  %1138 = vperm.xlu1 %12303, %v14204_v14  }
 0x161   : > { %11503 = vmatpush3.bf16.msra.mxu1 %v12496_v20  ;;  %v656_v20 = vmul.f32 %v14004_v29, %v14073_v55  ;;  %v787_v29 = vmul.f32 %v14031_v23, %v14103_v51  ;;  %v12513_v55 = vld [vmem:[%s13564_s30 + $0x398] sm:$0xff]   ;;  %v918_v23 = vmul.f32 %v14049_v8, %v14114_v61  ;;  %v1049_v61 = vmul.f32 %v14063_v48, %v14149_v27 }
 0x162   : > { %11504 = vmatprep.subr.bf16.mxu1 %v12498_v37  ;;  %v12510_v37 = vld [vmem:[%s13564_s30 + $0x3a0] sm:$0xff]   ;;  %12308 = vset.pattern.permute.xlu0 %v13390_v3  ;;  %v1180_v48 = vmul.f32 %v14080_v43, %v14172_v45  ;;  %v12520_v27 = vld [vmem:[%s13564_s30 + $0x474] sm:$0xff]   ;;  %v1311_v43 = vmul.f32 %v14109_v38, %v14176_v7  ;;  %v1442_v38 = vmul.f32 %v14131_v10, %v14206_v54 }
 0x163   : > { %4723 = vmatpush2.bf16.msra.mxu0 %v12497_v34  ;;  %v688_v0 = vadd.f32 %v656_v20, %v525_v41  ;;  %v14283_v34 = vrot.slane %v14271_v50, %v13821_v21  ;;  %v14321_v41 = vpop.permute.xlu0 %602  ;;  %v12527_v7 = vld [vmem:[%s13564_s30 + $0x440] ss:$0 sps:$4 sm:$0xff]   ;;  %v1573_v10 = vmul.f32 %v14156_v32, %v14220_v25  ;;  %v12532_v32 = vld [vmem:[%s13564_s30 + $0x454] sm:$0xff]   ;;  %v1961_v25 = vcombine.high %v14271_v50, %v14271_v50  ;;  %v12535_v50 = vld [vmem:[%s13564_s30 + $0x44c] sm:$0xff]  }
 0x164   : > { %4724 = vmatprep.subr.bf16.mxu0 %v13390_v3  ;;  %12304 = vset.pattern.permute.xlu1 %v13395_v17  ;;  %v5011_v54 = vsel %vm4211_vm1, %v12527_v7, 0 }
 0x165   : > { %11505 = vmatpush3.bf16.msra.mxu1 %v12499_v35  ;;  %1269 = vperm.xlu1 %12304, %v14204_v14   ;;  %v12512_v35 = vld [vmem:[%s13564_s30 + $0x3f8] sm:$0xff]   ;;  %v819_v51 = vadd.f32 %v787_v29, %v688_v0  ;;  %v1976_v30 = vcombine.high %v14283_v34, %v14283_v34  ;;  %v657_v29 = vmul.f32 %v14097_v56, %v14321_v41 }
 0x166   : > { %11506 = vmatprep.subr.bf16.mxu1 %v12501_v42  ;;  %v12514_v42 = vld [vmem:[%s13564_s30 + $0x358] sm:$0xff]  }
 0x167   : > { %4725 = vmatpush2.bf16.msra.mxu0 %v12500_v46  ;;  %v12515_v46 = vld [vmem:[%s13564_s30 + $0x3f0] sm:$0xff]   ;;  %v950_v8 = vadd.f32 %v918_v23, %v819_v51  ;;  %v2401_v53 = vpack.c.bf16 %v1976_v30, %v1976_v30 }
 0x168   : > { %5093 = vmatprep.subr.bf16.mxu0 %v13390_v3 }
 0x169   : > { %11507 = vmatpush3.bf16.msra.mxu1 %v12502_v31  ;;  %12306 = vset.pattern.permute.xlu1 %v13396_v18  ;;  %v12517_v31 = vld [vmem:[%s13564_s30 + $0x47c] sm:$0xff]  }
 0x16a   : > { %4727 = vmatmul.mubr.bf16.vlgmr.msra.gmra.mxu0 %v2392_v36  ;;  %11508 = vmatprep.subr.bf16.mxu1 %v12504_v52  ;;  %v12519_v52 = vld [vmem:[%s13564_s30 + $0x4b4] sm:$0xff]   ;;  %v1081_v36 = vadd.f32 %v1049_v61, %v950_v8 }
 0x16b   : > { %5094 = vmatpush1.bf16.msra.mxu0 %v12503_v44  ;;  %10771 = vmatprep.mubr.msk.bf16.mxu0 %vm4207_vm0, %v2399_v1  ;;  %v2396_v44 = vpack.c.bf16 %v14161_v26, %v14161_v26  ;;  %v14312_v26 = vpop.permute.xlu1 %471  ;;  %v12521_v1 = vld [vmem:[%s13564_s30 + $0x3e0] sm:$0xff]   ;;  %v12533_v61 = vld [vmem:[%s13564_s30 + $0x430] sm:$0xff]  }
 0x16c   : > { %5095 = vmatprep.subr.bf16.mxu0 %v13390_v3  ;;  %1531 = vperm.xlu1 %12306, %v14204_v14   ;;  %v10622_v14 = vld [vmem:[%s13583_s11 + $0x7] ss:$0 sm:$0xff]  ;;  %v1212_v45 = vadd.f32 %v1180_v48, %v1081_v36  ;;  %v526_v0 = vmul.f32 %v14090_v39, %v14312_v26 }
 0x16d   : > { %11509 = vmatpush3.bf16.msra.mxu1 %v12505_v4  ;;  %v12522_v4 = vld [vmem:[%s13564_s30 + $0x4ac] sm:$0xff]  }
 0x16e   : > { %11510 = vmatprep.subr.bf16.mxu1 %v12507_v13  ;;  %v12523_v13 = vld [vmem:[%s13564_s30 + $0x46c] sm:$0xff]   ;;  %v1343_v20 = vadd.f32 %v1311_v43, %v1212_v45  ;;  %v689_v56 = vadd.f32 %v657_v29, %v526_v0  ;;  %v12539_v43 = vld [vmem:[%s13564_s30 + $0x420] sm:$0xff]   ;;  %v2400_v45 = vpack.c.bf16 %v14283_v34, %v14283_v34  ;;  %v12544_v34 = vld [vmem:[%s13564_s30 + $0x4f4] sm:$0xff]  }
 0x16f   : > { %5096 = vmatpush1.bf16.msra.mxu0 %v12506_v40  ;;  %v12525_v40 = vld [vmem:[%s13564_s30 + $0x4a4] sm:$0xff]   ;;  %v12546_v0 = vld [vmem:[%s13564_s30 + $0x52c] sm:$0xff]  }
 0x170   : > { %5097 = vmatprep.subr.bf16.mxu0 %v13390_v3  ;;  %12307 = vset.pattern.permute.xlu1 %v13390_v3 }
 0x171   : > { %11511 = vmatpush3.bf16.msra.mxu1 %v12508_v22  ;;  %1755 = vperm.xlu1 %12307, %v10622_v14   ;;  %v12526_v22 = vld [vmem:[%s13564_s30 + $0x464] sm:$0xff]  }
 0x172   : > { %11512 = vmatprep.subr.bf16.mxu1 %v12510_v37  ;;  %v14329_v37 = vpop.permute.xlu1 %733  ;;  %v12538_v14 = vld [vmem:[%s13564_s30 + $0x444] sm:$0xff]  }
 0x173   : > { %5098 = vmatpush1.bf16.msra.mxu0 %v12509_v47  ;;  %v12528_v47 = vld [vmem:[%s13564_s30 + $0x49c] sm:$0xff]   ;;  %v788_v39 = vmul.f32 %v14121_v60, %v14329_v37 }
 0x174   : > { %5099 = vmatprep.subr.bf16.mxu0 %v13390_v3 }
 0x175   : > { %11513 = vmatpush3.bf16.msra.mxu1 %v12511_v19  ;;  %12309 = vset.pattern.permute.xlu1 %v13392_v6  ;;  %v1474_v19 = vadd.f32 %v1442_v38, %v1343_v20  ;;  %v820_v30 = vadd.f32 %v788_v39, %v689_v56  ;;  %v12543_v20 = vld [vmem:[%s13564_s30 + $0x534] sm:$0xff]   ;;  %v12549_v39 = vld [vmem:[%s13564_s30 + $0x524] sm:$0xff]  }
 0x176   : > { %11514 = vmatprep.subr.bf16.mxu1 %v12513_v55  ;;  %v12529_v55 = vld [vmem:[%s13564_s30 + $0x45c] sm:$0xff]   ;;  %v14344_v23 = vpop.permute.xlu1 %864  ;;  %v12548_v56 = vld [vmem:[%s13564_s30 + $0x574] sm:$0xff]  }
 0x177   : > { %5100 = vmatpush1.bf16.msra.mxu0 %v12512_v35  ;;  %v12531_v35 = vld [vmem:[%s13564_s30 + $0x494] sm:$0xff]   ;;  %v1605_v51 = vadd.f32 %v1573_v10, %v1474_v19  ;;  %v919_v60 = vmul.f32 %v14142_v9, %v14344_v23  ;;  %v12545_v19 = vld [vmem:[%s13564_s30 + $0x57c] sm:$0xff]  }
 0x178   : > { %5101 = vmatprep.subr.bf16.mxu0 %v13390_v3  ;;  %v12542_v38 = vld [vmem:[%s13564_s30 + $0x418] sm:$0xff]  }
 0x179   : > { %11515 = vmatpush3.bf16.msra.mxu1 %v12514_v42  ;;  %v12530_v42 = vld [vmem:[%s13564_s30 + $0x438] sm:$0xff]   ;;  %v1797_v8 = vadd.f32 %v14249_v63, %v1605_v51  ;;  %v951_v9 = vadd.f32 %v919_v60, %v820_v30  ;;  %v12551_v60 = vld [vmem:[%s13564_s30 + $0x56c] sm:$0xff]  }
 0x17a   : > { %11522 = vmatprep.subr.bf16.mxu1 %v12516_v28  ;;  %v12534_v28 = vld [vmem:[%s13564_s30 + $0x48c] sm:$0xff]  }
 0x17b   : > { %5102 = vmatpush1.bf16.msra.mxu0 %v12515_v46  ;;  %v14354_v46 = vpop.permute.xlu0 %995  ;;  %v1829_v63 = vmax.f32 %v1797_v8, 0.0  ;;  %v14432_v8 = vld [vmem:[%s13578_s22 + $0x8] ss:$0 sm:$0xff] }
 0x17c   : > { %5086 = vmatmul.mubr.bf16.vlgmr.msra.gmra.mxu1 %v2396_v44  ;;  %5103 = vmatprep.subr.bf16.mxu0 %v13390_v3  ;;  %v12536_v44 = vld [vmem:[%s13564_s30 + $0x428] sm:$0xff]  }
 0x17d   : > { %11523 = vmatpush3.bf16.msra.mxu1 %v12517_v31  ;;  %5444 = vmatprep.mubr.bf16.mxu1 %v2401_v53  ;;  %v14359_v31 = vpop.permute.xlu1 %1126  ;;  %v12537_v53 = vld [vmem:[%s13564_s30 + $0x484] sm:$0xff]  }
 0x17e   : > { %11524 = vmatprep.subr.bf16.mxu1 %v12519_v52  ;;  %v1050_v52 = vmul.f32 %v14167_v16, %v14354_v46  ;;  %v1181_v48 = vmul.f32 %v14184_v49, %v14359_v31  ;;  %v12540_v16 = vld [vmem:[%s13564_s30 + $0x53c] sm:$0xff]   ;;  %618 = vperm.xlu1 %12309, %v14432_v8  }
 0x17f   : > { %5104 = vmatpush1.bf16.msra.mxu0 %v12518_v58  ;;  %v14363_v58 = vrot.slane %v1961_v25, %v13821_v21  ;;  %v12541_v49 = vld [vmem:[%s13564_s30 + $0x4fc] sm:$0xff]   ;;  %487 = vperm.xlu0 %12308, %v14432_v8  }
 0x180   : > { %5105 = vmatprep.subr.bf16.mxu0 %v13390_v3 }
 0x181   : > { %11525 = vmatpush3.bf16.msra.mxu1 %v12520_v27  ;;  %v1977_v36 = vcombine.high %v14363_v58, %v14363_v58  ;;  %v1082_v27 = vadd.f32 %v1050_v52, %v951_v9  ;;  %v12555_v52 = vld [vmem:[%s13564_s30 + $0x514] sm:$0xff]  }
 0x182   : > { %11526 = vmatprep.subr.bf16.mxu1 %v12522_v4  ;;  %v14376_v4 = vpop.permute.xlu1 %1257  ;;  %12310 = vset.pattern.permute.xlu1 %v13389_v2 }
 0x183   : > { %5106 = vmatpush1.bf16.msra.mxu0 %v12521_v1  ;;  %v14379_v1 = vrot.slane %v1829_v63, %v13821_v21  ;;  %v12556_v63 = vld [vmem:[%s13564_s30 + $0x4d4] sm:$0xff]   ;;  %749 = vperm.xlu1 %12310, %v14432_v8  }
 0x184   : > { %5107 = vmatprep.subr.bf16.mxu0 %v13390_v3  ;;  %12311 = vset.pattern.permute.xlu0 %v13391_v5 }
 0x185   : > { %11527 = vmatpush3.bf16.msra.mxu1 %v12523_v13  ;;  %v2403_v13 = vpack.c.bf16 %v1977_v36, %v1977_v36  ;;  %v1985_v7 = vcombine.high %v14379_v1, %v14379_v1  ;;  %880 = vperm.xlu0 %12311, %v14432_v8  }
 0x186   : > { %11528 = vmatprep.subr.bf16.mxu1 %v12525_v40  ;;  %v1312_v40 = vmul.f32 %v14199_v57, %v14376_v4  ;;  %v14399_v29 = vpop.permute.xlu1 %1519 }
 0x187   : > { %5108 = vmatpush1.bf16.msra.mxu0 %v12524_v15  ;;  %v1213_v15 = vadd.f32 %v1181_v48, %v1082_v27  ;;  %v2405_v10 = vpack.c.bf16 %v1985_v7, %v1985_v7  ;;  %v12558_v48 = vld [vmem:[%s13564_s30 + $0x50c] sm:$0xff]   ;;  %v12557_v27 = vld [vmem:[%s13564_s30 + $0x55c] sm:$0xff]   ;;  %12312 = vset.pattern.permute.xlu1 %v13393_v11 }
 0x188   : > { %5113 = vmatprep.subr.bf16.mxu0 %v13390_v3  ;;  %1011 = vperm.xlu1 %12312, %v14432_v8  }
 0x189   : > { %11529 = vmatpush3.bf16.msra.mxu1 %v12526_v22  ;;  %v14389_v22 = vpop.permute.xlu0 %1388  ;;  %12314 = vset.pattern.permute.xlu0 %v13395_v17 }
 0x18a   : > { %11530 = vmatprep.subr.bf16.mxu1 %v12528_v47  ;;  %v1344_v47 = vadd.f32 %v1312_v40, %v1213_v15  ;;  %v1443_v57 = vmul.f32 %v14216_v62, %v14389_v22  ;;  %v1574_v62 = vmul.f32 %v14235_v59, %v14399_v29  ;;  %v14416_v59 = vld [vmem:[%s16992_s0 + $0x8] sm:$0xf]  ;;  %v14428_v30 = vpop.permute.xlu1 %1743  ;;  %v12560_v15 = vld [vmem:[%s13564_s30 + $0x554] sm:$0xff]   ;;  %1273 = vperm.xlu0 %12314, %v14432_v8  }
 0x18b   : > { %5114 = vmatpush2.bf16.msra.mxu0 %v5011_v54  ;;  %v2398_v54 = vpack.c.bf16 %v14229_v33, %v14229_v33  ;;  %v12550_v33 = vld [vmem:[%s13564_s30 + $0x4e4] sm:$0xff]  }
 0x18c   : > { %5115 = vmatprep.subr.bf16.mxu0 %v13390_v3  ;;  %v12562_v40 = vld [vmem:[%s13564_s30 + $0x4c4] sm:$0xff]   ;;  %12313 = vset.pattern.permute.xlu1 %v13394_v12 }
 0x18d   : > { %11531 = vmatpush3.bf16.msra.mxu1 %v12529_v55  ;;  %v12547_v55 = vld [vmem:[%s13564_s30 + $0x4ec] sm:$0xff]   ;;  %1142 = vperm.xlu1 %12313, %v14432_v8  }
 0x18e   : > { %11532 = vmatprep.subr.bf16.mxu1 %v12531_v35  ;;  %v1475_v35 = vadd.f32 %v1443_v57, %v1344_v47  ;;  %v12563_v47 = vld [vmem:[%s13564_s30 + $0x54c] sm:$0xff]   ;;  %12317 = vset.pattern.permute.xlu0 %v13390_v3 }
 0x18f   : > { %5116 = vmatpush2.bf16.msra.mxu0 %v12530_v42  ;;  %v527_v42 = vmul.f32 %v14416_v59, %v14312_v26  ;;  %v12553_v26 = vld [vmem:[%s13564_s30 + $0x4dc] sm:$0xff]   ;;  %v12565_v57 = vld [vmem:[%s13564_s30 + $0x5e8] sm:$0xff]  }
 0x190   : > { %5117 = vmatprep.subr.bf16.mxu0 %v13390_v3  ;;  %v1606_v51 = vadd.f32 %v1574_v62, %v1475_v35  ;;  %v2402_v35 = vpack.c.bf16 %v14363_v58, %v14363_v58  ;;  %v12567_v62 = vld [vmem:[%s13564_s30 + $0x620] sm:$0xff]   ;;  %v14522_v58 = vld [vmem:[%s16992_s0 + $0x5c] sm:$0xf] }
 0x191   : > { %11533 = vmatpush3.bf16.msra.mxu1 %v12532_v32  ;;  %v14423_v32 = vld [vmem:[%s16992_s0 + $0x14] sm:$0xf]  ;;  %12315 = vset.pattern.permute.xlu1 %v13397_v24 }
 0x192   : > { %11534 = vmatprep.subr.bf16.mxu1 %v12534_v28  ;;  %v658_v25 = vmul.f32 %v14423_v32, %v14321_v41  ;;  %v12552_v28 = vld [vmem:[%s13564_s30 + $0x51c] sm:$0xff]   ;;  %1404 = vperm.xlu1 %12315, %v14432_v8  }
 0x193   : > { %5118 = vmatpush2.bf16.msra.mxu0 %v12533_v61  ;;  %v1798_v61 = vadd.f32 %v14428_v30, %v1606_v51  ;;  %v14442_v41 = vld [vmem:[%s16992_s0 + $0x20] sm:$0xf] }
 0x194   : > { %5119 = vmatprep.subr.bf16.mxu0 %v13390_v3  ;;  %v690_v9 = vadd.f32 %v658_v25, %v527_v42  ;;  %v12568_v42 = vld [vmem:[%s13564_s30 + $0x5e0] sm:$0xff]  }
 0x195   : > { %11535 = vmatpush3.bf16.msra.mxu1 %v12535_v50  ;;  %v789_v50 = vmul.f32 %v14442_v41, %v14329_v37  ;;  %v14457_v37 = vld [vmem:[%s16992_s0 + $0x2c] sm:$0xf] }
 0x196   : > { %11536 = vmatprep.subr.bf16.mxu1 %v12537_v53  ;;  %v12554_v53 = vld [vmem:[%s13564_s30 + $0x564] sm:$0xff]   ;;  %v920_v36 = vmul.f32 %v14457_v37, %v14344_v23  ;;  %12316 = vset.pattern.permute.xlu1 %v13396_v18 }
 0x197   : > { %5120 = vmatpush2.bf16.msra.mxu0 %v12536_v44  ;;  %v14451_v44 = vmax.f32 %v1798_v61, 0.0  ;;  %v12570_v61 = vld [vmem:[%s13564_s30 + $0x618] sm:$0xff]   ;;  %1535 = vperm.xlu1 %12316, %v14432_v8  }
 0x198   : > { %5121 = vmatprep.subr.bf16.mxu0 %v13390_v3  ;;  %v14570_v8 = vld [vmem:[%s16992_s0 + $0x18] sm:$0xff] }
 0x199   : > { %11537 = vmatpush3.bf16.msra.mxu1 %v12538_v14  ;;  %v821_v14 = vadd.f32 %v789_v50, %v690_v9 }
 0x19a   : > { %11544 = vmatprep.subr.bf16.mxu1 %v12540_v16  ;;  %v12559_v16 = vld [vmem:[%s13564_s30 + $0x4cc] sm:$0xff]  }
 0x19b   : > { %5122 = vmatpush2.bf16.msra.mxu0 %v12539_v43  ;;  %v14469_v43 = vrot.slane %v14451_v44, %v13821_v21  ;;  %v952_v23 = vadd.f32 %v920_v36, %v821_v14  ;;  %12318 = vset.pattern.permute.xlu1 %v13390_v3 }
 0x19c   : > { %5445 = vmatmul.mubr.bf16.vlgmr.msra.gmra.mxu1 %v2400_v45  ;;  %5123 = vmatprep.subr.bf16.mxu0 %v13390_v3  ;;  %v14475_v45 = vld [vmem:[%s16992_s0 + $0x38] sm:$0xf] }
 0x19d   : > { %11545 = vmatpush3.bf16.msra.mxu1 %v12541_v49  ;;  %5484 = vmatprep.mubr.bf16.mxu1 %v2403_v13  ;;  %v1051_v49 = vmul.f32 %v14475_v45, %v14354_v46  ;;  %v12561_v13 = vld [vmem:[%s13564_s30 + $0x504] sm:$0xff]   ;;  %v2001_v46 = vcombine.high %v14469_v43, %v14469_v43 }
 0x19e   : > { %11546 = vmatprep.subr.bf16.mxu1 %v12543_v20  ;;  %v14491_v20 = vld [vmem:[%s16992_s0 + $0x44] sm:$0xf] }
 0x19f   : > { %5124 = vmatpush2.bf16.msra.mxu0 %v12542_v38  ;;  %v1182_v38 = vmul.f32 %v14491_v20, %v14359_v31  ;;  %v1083_v7 = vadd.f32 %v1051_v49, %v952_v23  ;;  %v12572_v49 = vld [vmem:[%s13564_s30 + $0x5a4] sm:$0xff]  }
 0x1a0   : > { %5492 = vmatprep.subr.bf16.mxu0 %v13390_v3 }
 0x1a1   : > { %11547 = vmatpush3.bf16.msra.mxu1 %v12544_v34  ;;  %v12564_v34 = vld [vmem:[%s13564_s30 + $0x628] sm:$0xff]   ;;  %v1214_v31 = vadd.f32 %v1182_v38, %v1083_v7  ;;  %v12574_v38 = vld [vmem:[%s13564_s30 + $0x5d0] sm:$0xff]   ;;  %v10623_v7 = vld [vmem:[%s13583_s11 + $0x8] ss:$0 sm:$0xff] }
 0x1a2   : > { %5126 = vmatmul.mubr.bf16.vlgmr.msra.gmra.mxu0 %v2398_v54  ;;  %11548 = vmatprep.subr.bf16.mxu1 %v12546_v0  ;;  %v12566_v0 = vld [vmem:[%s13564_s30 + $0x544] sm:$0xff]  }
 0x1a3   : > { %5493 = vmatpush1.bf16.msra.mxu0 %v12545_v19  ;;  %10818 = vmatprep.mubr.msk.bf16.mxu0 %vm4207_vm0, %v2405_v10  ;;  %v2407_v19 = vpack.c.bf16 %v2001_v46, %v2001_v46  ;;  %v14506_v10 = vld [vmem:[%s16992_s0 + $0x50] sm:$0xf] }
 0x1a4   : > { %5494 = vmatprep.subr.bf16.mxu0 %v13390_v3  ;;  %v1313_v54 = vmul.f32 %v14506_v10, %v14376_v4  ;;  %v14517_v4 = vpop.permute.xlu1 %606  ;;  %1759 = vperm.xlu0 %12317, %v10623_v7   ;;  %v14632_v7 = vld [vmem:[%s13578_s22 + $0x9] ss:$0 sm:$0xff] }
 0x1a5   : > { %11549 = vmatpush3.bf16.msra.mxu1 %v12547_v55  ;;  %491 = vperm.xlu1 %12318, %v14632_v7  }
 0x1a6   : > { %11550 = vmatprep.subr.bf16.mxu1 %v12549_v39  ;;  %v12569_v39 = vld [vmem:[%s13564_s30 + $0x5ac] ss:$0 sps:$4 sm:$0xff]   ;;  %v1345_v25 = vadd.f32 %v1313_v54, %v1214_v31 }
 0x1a7   : > { %5495 = vmatpush1.bf16.msra.mxu0 %v12548_v56  ;;  %v5410_v9 = vsel %vm4211_vm1, %v12569_v39, 0  ;;  %v12577_v54 = vld [vmem:[%s13564_s30 + $0x5c8] sm:$0xff]   ;;  %v12578_v39 = vld [vmem:[%s13564_s30 + $0x594] sm:$0xff]  }
 0x1a8   : > { %5496 = vmatprep.subr.bf16.mxu0 %v13390_v3  ;;  %12320 = vset.pattern.permute.xlu0 %v13389_v2 }
 0x1a9   : > { %11551 = vmatpush3.bf16.msra.mxu1 %v12550_v33  ;;  %753 = vperm.xlu0 %12320, %v14632_v7  }
 0x1aa   : > { %11552 = vmatprep.subr.bf16.mxu1 %v12552_v28  ;;  %v1444_v28 = vmul.f32 %v14522_v58, %v14389_v22  ;;  %v12571_v22 = vld [vmem:[%s13564_s30 + $0x5d8] sm:$0xff]   ;;  %12319 = vset.pattern.permute.xlu1 %v13392_v6 }
 0x1ab   : > { %5497 = vmatpush1.bf16.msra.mxu0 %v12551_v60  ;;  %622 = vperm.xlu1 %12319, %v14632_v7  }
 0x1ac   : > { %5498 = vmatprep.subr.bf16.mxu0 %v13390_v3  ;;  %v1476_v36 = vadd.f32 %v1444_v28, %v1345_v25  ;;  %v12582_v25 = vld [vmem:[%s13564_s30 + $0x5f8] sm:$0xff]  }
 0x1ad   : > { %11553 = vmatpush3.bf16.msra.mxu1 %v12553_v26  ;;  %12323 = vset.pattern.permute.xlu0 %v13394_v12 }
 0x1ae   : > { %11554 = vmatprep.subr.bf16.mxu1 %v12555_v52  ;;  %v14529_v52 = vpop.permute.xlu0 %475  ;;  %1146 = vperm.xlu0 %12323, %v14632_v7  }
 0x1af   : > { %5499 = vmatpush1.bf16.msra.mxu0 %v12554_v53  ;;  %12321 = vset.pattern.permute.xlu1 %v13391_v5 }
 0x1b0   : > { %5500 = vmatprep.subr.bf16.mxu0 %v13390_v3  ;;  %884 = vperm.xlu1 %12321, %v14632_v7  }
 0x1b1   : > { %11555 = vmatpush3.bf16.msra.mxu1 %v12556_v63 }
 0x1b2   : > { %11556 = vmatprep.subr.bf16.mxu1 %v12558_v48  ;;  %v14576_v31 = vpop.permute.xlu0 %868  ;;  %12326 = vset.pattern.permute.xlu0 %v13396_v18 }
 0x1b3   : > { %5501 = vmatpush1.bf16.msra.mxu0 %v12557_v27  ;;  %v12573_v27 = vld [vmem:[%s13564_s30 + $0x610] sm:$0xff]   ;;  %1539 = vperm.xlu0 %12326, %v14632_v7  }
 0x1b4   : > { %5502 = vmatprep.subr.bf16.mxu0 %v13390_v3  ;;  %12322 = vset.pattern.permute.xlu1 %v13393_v11 }
 0x1b5   : > { %11557 = vmatpush3.bf16.msra.mxu1 %v12559_v16  ;;  %v14540_v16 = vld [vmem:[%s16992_s0 + $0x68] sm:$0xf]  ;;  %1015 = vperm.xlu1 %12322, %v14632_v7  }
 0x1b6   : > { %11558 = vmatprep.subr.bf16.mxu1 %v12561_v13  ;;  %v1575_v23 = vmul.f32 %v14540_v16, %v14399_v29  ;;  %v14548_v13 = vld [vmem:[%s16992_s0 + $0xc] sm:$0xff]  ;;  %v14561_v29 = vpop.permute.xlu1 %737 }
 0x1b7   : > { %5503 = vmatpush1.bf16.msra.mxu0 %v12560_v15  ;;  %v659_v15 = vmul.f32 %v14548_v13, %v14517_v4  ;;  %12328 = vset.pattern.permute.xlu0 %v13392_v6 }
 0x1b8   : > { %5504 = vmatprep.subr.bf16.mxu0 %v13390_v3 }
 0x1b9   : > { %11559 = vmatpush3.bf16.msra.mxu1 %v12562_v40  ;;  %v14555_v40 = vld [vmem:[%s16992_s0] sm:$0xff]  ;;  %12324 = vset.pattern.permute.xlu1 %v13395_v17 }
 0x1ba   : > { %v11406_v55 = vpop.f32.mrf.mxu0  ;;  %11566 = vmatprep.subr.bf16.mxu1 %v12564_v34  ;;  %v528_v46 = vmul.f32 %v14555_v40, %v14529_v52  ;;  %v12576_v34 = vld [vmem:[%s13564_s30 + $0x608] sm:$0xff]   ;;  %1277 = vperm.xlu1 %12324, %v14632_v7  }
 0x1bb   : > { %5505 = vmatpush1.bf16.msra.mxu0 %v12563_v47  ;;  %v1607_v47 = vadd.f32 %v1575_v23, %v1476_v36  ;;  %v12584_v36 = vld [vmem:[%s13564_s30 + $0x584] sm:$0xff]  }
 0x1bc   : > { %5485 = vmatmul.mubr.bf16.vlgmr.msra.gmra.mxu1 %v2402_v35  ;;  %v11407_v56 = vpop.f32.mrf.mxu0  ;;  %v11428_v33 = vpop.f32.mrf.mxu1  ;;  %5506 = vmatprep.subr.bf16.mxu0 %v13390_v3 }
 0x1bd   : > { %v11408_v51 = vadd.f32 %v11407_v56, %v11406_v55  ;;  %11567 = vmatpush3.bf16.msra.mxu1 %v12565_v57  ;;  %5843 = vmatprep.mubr.bf16.mxu1 %v2407_v19  ;;  %v12575_v57 = vld [vmem:[%s13564_s30 + $0x59c] sm:$0xff]   ;;  %v691_v19 = vadd.f32 %v659_v15, %v528_v46  ;;  %v14580_v35 = vpop.permute.xlu1 %999  ;;  %v14626_v15 = vpop.permute.xlu0 %1261  ;;  %v12586_v46 = vld [vmem:[%s13564_s30 + $0x5b0] sm:$0xff]  }
 0x1be   : > { %v11409_v60 = vpop.f32.mrf.mxu0  ;;  %v11429_v26 = vpop.f32.mrf.mxu1  ;;  %11568 = vmatprep.subr.bf16.mxu1 %v12567_v62  ;;  %v12579_v55 = vld [vmem:[%s13564_s30 + $0x600] sm:$0xff]   ;;  %v1799_v62 = vadd.f32 %v14428_v30, %v1607_v47  ;;  %v12588_v47 = vld [vmem:[%s13564_s30 + $0x668] sm:$0xff]   ;;  %12325 = vset.pattern.permute.xlu1 %v13397_v24 }
 0x1bf   : > { %v11430_v50 = vadd.f32 %v11429_v26, %v11428_v33  ;;  %5507 = vmatpush1.bf16.msra.mxu0 %v12566_v0  ;;  %v790_v0 = vmul.f32 %v14570_v8, %v14561_v29  ;;  %v14588_v33 = vld [vmem:[%s16992_s0 + $0x24] sm:$0xff]  ;;  %v12581_v60 = vld [vmem:[%s13564_s30 + $0x58c] sm:$0xff]   ;;  %1408 = vperm.xlu1 %12325, %v14632_v7  }
 0x1c0   : > { %v11410_v53 = vpop.f32.mrf.mxu0  ;;  %v11431_v63 = vpop.f32.mrf.mxu1  ;;  %5512 = vmatprep.subr.bf16.mxu0 %v13390_v3  ;;  %v12580_v30 = vld [vmem:[%s13564_s30 + $0x5c0] sm:$0xff]   ;;  %v1831_v28 = vmax.f32 %v1799_v62, 0.0  ;;  %v14601_v26 = vld [vmem:[%s16992_s0 + $0x30] sm:$0xff] }
 0x1c1   : > { %11569 = vmatpush3.bf16.msra.mxu1 %v12568_v42  ;;  %v14533_v14 = vadd.f32 %v11430_v50, %v11408_v51  ;;  %v822_v56 = vadd.f32 %v790_v0, %v691_v19  ;;  %v921_v51 = vmul.f32 %v14588_v33, %v14576_v31  ;;  %v1986_v42 = vcombine.high %v14451_v44, %v14451_v44  ;;  %v12583_v44 = vld [vmem:[%s13564_s30 + $0x5b8] sm:$0xff]   ;;  %v12585_v53 = vld [vmem:[%s13564_s30 + $0x5f0] sm:$0xff]   ;;  %v14643_v19 = vld [vmem:[%s16992_s0 + $0x48] sm:$0xff] }
 0x1c2   : > { %v11432_v48 = vpop.f32.mrf.mxu1  ;;  %11570 = vmatprep.subr.bf16.mxu1 %v12570_v61  ;;  %v1052_v61 = vmul.f32 %v14601_v26, %v14580_v35  ;;  %v12590_v62 = vld [vmem:[%s13564_s30 + $0x6a0] sm:$0xff]  }
 0x1c3   : > { %5513 = vmatpush2.bf16.msra.mxu0 %v5410_v9  ;;  %v953_v50 = vadd.f32 %v921_v51, %v822_v56  ;;  %v14607_v9 = vpop.permute.xlu1 %1130  ;;  %v14611_v63 = vrot.slane %v1986_v42, %v13821_v21  ;;  %v12589_v56 = vld [vmem:[%s13564_s30 + $0x6e8] sm:$0xff]   ;;  %v2406_v51 = vpack.c.bf16 %v14469_v43, %v14469_v43  ;;  %v12593_v43 = vld [vmem:[%s13564_s30 + $0x698] sm:$0xff]   ;;  %12327 = vset.pattern.permute.xlu1 %v13390_v3 }
 0x1c4   : > { %5514 = vmatprep.subr.bf16.mxu0 %v13390_v3 }
 0x1c5   : > { %11571 = vmatpush3.bf16.msra.mxu1 %v12571_v22  ;;  %v14614_v22 = vrot.slane %v1831_v28, %v13821_v21  ;;  %v1084_v48 = vadd.f32 %v1052_v61, %v953_v50  ;;  %v12592_v50 = vld [vmem:[%s13564_s30 + $0x6e0] sm:$0xff]  }
 0x1c6   : > { %11572 = vmatprep.subr.bf16.mxu1 %v12573_v27  ;;  %v14620_v27 = vld [vmem:[%s16992_s0 + $0x3c] sm:$0xff] }
 0x1c7   : > { %5515 = vmatpush2.bf16.msra.mxu0 %v12572_v49  ;;  %v1183_v23 = vmul.f32 %v14620_v27, %v14607_v9  ;;  %v12587_v49 = vld [vmem:[%s13564_s30 + $0x6a8] sm:$0xff]  }
 0x1c8   : > { %5516 = vmatprep.subr.bf16.mxu0 %v13390_v3 }
 0x1c9   : > { %11573 = vmatpush3.bf16.msra.mxu1 %v12574_v38  ;;  %v2002_v38 = vcombine.high %v14611_v63, %v14611_v63  ;;  %v1215_v0 = vadd.f32 %v1183_v23, %v1084_v48  ;;  %v14676_v48 = vld [vmem:[%s16992_s0 + $0x60] sm:$0xff] }
 0x1ca   : > { %11574 = vmatprep.subr.bf16.mxu1 %v12576_v34  ;;  %v14634_v34 = vpop.permute.xlu1 %1392 }
 0x1cb   : > { %5517 = vmatpush2.bf16.msra.mxu0 %v12575_v57  ;;  %v2010_v57 = vcombine.high %v14614_v22, %v14614_v22 }
 0x1cc   : > { %5518 = vmatprep.subr.bf16.mxu0 %v13390_v3 }
 0x1cd   : > { %11575 = vmatpush3.bf16.msra.mxu1 %v12577_v54  ;;  %v1314_v54 = vmul.f32 %v14643_v19, %v14626_v15  ;;  %v2411_v42 = vpack.c.bf16 %v2010_v57, %v2010_v57 }
 0x1ce   : > { %11576 = vmatprep.subr.bf16.mxu1 %v12579_v55  ;;  %v2404_v55 = vpack.c.bf16 %v14379_v1, %v14379_v1  ;;  %v14659_v1 = vld [vmem:[%s16992_s0 + $0x54] sm:$0xff]  ;;  %v14664_v61 = vpop.permute.xlu1 %1523 }
 0x1cf   : > { %5519 = vmatpush2.bf16.msra.mxu0 %v12578_v39  ;;  %v2409_v39 = vpack.c.bf16 %v2002_v38, %v2002_v38  ;;  %v1346_v28 = vadd.f32 %v1314_v54, %v1215_v0  ;;  %v1576_v23 = vmul.f32 %v14676_v48, %v14664_v61  ;;  %v12596_v38 = vld [vmem:[%s13564_s30 + $0x690] sm:$0xff]  }
 0x1d0   : > { %5520 = vmatprep.subr.bf16.mxu0 %v13390_v3  ;;  %v12597_v0 = vld [vmem:[%s13564_s30 + $0x650] sm:$0xff]  }
 0x1d1   : > { %11577 = vmatpush3.bf16.msra.mxu1 %v12580_v30  ;;  %v12591_v30 = vld [vmem:[%s13564_s30 + $0x660] sm:$0xff]  }
 0x1d2   : > { %11578 = vmatprep.subr.bf16.mxu1 %v12582_v25  ;;  %v1445_v25 = vmul.f32 %v14659_v1, %v14634_v34 }
 0x1d3   : > { %5521 = vmatpush2.bf16.msra.mxu0 %v12581_v60 }
 0x1d4   : > { %5522 = vmatprep.subr.bf16.mxu0 %v13390_v3 }
 0x1d5   : > { %11579 = vmatpush3.bf16.msra.mxu1 %v12583_v44 }
 0x1d6   : > { %11580 = vmatprep.subr.bf16.mxu1 %v12585_v53 }
 0x1d7   : > { %5523 = vmatpush2.bf16.msra.mxu0 %v12584_v36  ;;  %v12594_v36 = vld [vmem:[%s13564_s30 + $0x658] sm:$0xff]  }
 0x1d8   : > { %11588 = vmatprep.subr.bf16.mxu0 %v12587_v49  ;;  %v1477_v49 = vadd.f32 %v1445_v25, %v1346_v28  ;;  %v12603_v25 = vld [vmem:[%s13564_s30 + $0x640] sm:$0xff]  }
 0x1d9   : > { %11581 = vmatpush3.bf16.msra.mxu1 %v12586_v46 }
 0x1da   : > { %5525 = vmatmul.mubr.bf16.vlgmr.msra.gmra.mxu0 %v2404_v55  ;;  %5891 = vmatprep.subr.bf16.mxu1 %v13390_v3  ;;  %v1608_v54 = vadd.f32 %v1576_v23, %v1477_v49  ;;  %v12599_v55 = vld [vmem:[%s13564_s30 + $0x688] sm:$0xff]   ;;  %v12607_v23 = vld [vmem:[%s13564_s30 + $0x6b8] sm:$0xff]  }
 0x1db   : > { %11589 = vmatpush3.bf16.msra.mxu0 %v12588_v47  ;;  %5883 = vmatprep.mubr.bf16.mxu0 %v2409_v39  ;;  %v12595_v47 = vld [vmem:[%s13564_s30 + $0x6d8] sm:$0xff]   ;;  %v529_v39 = vmul.f32 %v14416_v59, %v14529_v52  ;;  %v12602_v59 = vld [vmem:[%s13564_s30 + $0x680] sm:$0xff]   ;;  %v12601_v52 = vld [vmem:[%s13564_s30 + $0x6c8] sm:$0xff]  }
 0x1dc   : > { %v11450_v60 = vpop.f32.mrf.mxu1  ;;  %5844 = vmatmul.mubr.bf16.vlgmr.msra.gmra.mxu1 %v2406_v51  ;;  %11590 = vmatprep.subr.bf16.mxu0 %v12590_v62  ;;  %v660_v62 = vmul.f32 %v14423_v32, %v14517_v4  ;;  %v12598_v51 = vld [vmem:[%s13564_s30 + $0x6d0] sm:$0xff]   ;;  %v791_v32 = vmul.f32 %v14442_v41, %v14561_v29  ;;  %v12605_v41 = vld [vmem:[%s13564_s30 + $0x678] sm:$0xff]  }
 0x1dd   : > { %5892 = vmatpush1.bf16.msra.mxu1 %v12589_v56  ;;  %10865 = vmatprep.mubr.msk.bf16.mxu1 %vm4207_vm0, %v2411_v42  ;;  %v14693_v56 = vpop.permute.xlu0 %1747  ;;  %v12600_v42 = vld [vmem:[%s13564_s30 + $0x648] sm:$0xff]  }
 0x1de   : > { %v11451_v44 = vpop.f32.mrf.mxu1  ;;  %5893 = vmatprep.subr.bf16.mxu1 %v13390_v3  ;;  %v692_v4 = vadd.f32 %v660_v62, %v529_v39  ;;  %v14743_v62 = vpop.permute.xlu1 %479 }
 0x1df   : > { %v14670_v53 = vadd.f32 %v11451_v44, %v11450_v60  ;;  %11591 = vmatpush3.bf16.msra.mxu0 %v12591_v30  ;;  %v1800_v30 = vadd.f32 %v14693_v56, %v1608_v54  ;;  %v922_v60 = vmul.f32 %v14457_v37, %v14576_v31  ;;  %v1053_v37 = vmul.f32 %v14475_v45, %v14580_v35  ;;  %v12608_v31 = vld [vmem:[%s13564_s30 + $0x670] sm:$0xff]  }
 0x1e0   : > { %v11453_v46 = vpop.f32.mrf.mxu1  ;;  %11592 = vmatprep.subr.bf16.mxu0 %v12593_v43  ;;  %v823_v29 = vadd.f32 %v791_v32, %v692_v4  ;;  %v12604_v43 = vld [vmem:[%s13564_s30 + $0x6c0] sm:$0xff]   ;;  %v12611_v45 = vld [vmem:[%s13564_s30 + $0x794] sm:$0xff]   ;;  %v1184_v54 = vmul.f32 %v14491_v20, %v14607_v9  ;;  %v2408_v20 = vpack.c.bf16 %v14611_v63, %v14611_v63  ;;  %v1315_v9 = vmul.f32 %v14506_v10, %v14626_v15  ;;  %v14755_v32 = vld [vmem:[%s13578_s22 + $0xa] ss:$0 sm:$0xff] }
 0x1e1   : > { %5894 = vmatpush1.bf16.msra.mxu1 %v12592_v50  ;;  %v14710_v28 = vmax.f32 %v1800_v30, 0.0  ;;  %v12606_v50 = vld [vmem:[%s13564_s30 + $0x638] sm:$0xff]   ;;  %v12609_v46 = vld [vmem:[%s13564_s30 + $0x630] sm:$0xff]   ;;  %626 = vperm.xlu0 %12328, %v14755_v32   ;;  %v1446_v10 = vmul.f32 %v14522_v58, %v14634_v34  ;;  %v14774_v34 = vpop.permute.xlu0 %741 }
 0x1e2   : > { %v11454_v57 = vpop.f32.mrf.mxu1  ;;  %5895 = vmatprep.subr.bf16.mxu1 %v13390_v3  ;;  %v12615_v63 = vld [vmem:[%s13564_s30 + $0x74c] sm:$0xff]  }
 0x1e3   : > { %11593 = vmatpush3.bf16.msra.mxu0 %v12594_v36  ;;  %v14723_v44 = vrot.slane %v14710_v28, %v13821_v21  ;;  %v954_v36 = vadd.f32 %v922_v60, %v823_v29  ;;  %v12616_v29 = vld [vmem:[%s13564_s30 + $0x710] sm:$0xff]   ;;  %v530_v60 = vmul.f32 %v14555_v40, %v14743_v62 }
 0x1e4   : > { %11594 = vmatprep.subr.bf16.mxu0 %v12596_v38 }
 0x1e5   : > { %5896 = vmatpush1.bf16.msra.mxu1 %v12595_v47  ;;  %v12610_v47 = vld [vmem:[%s13564_s30 + $0x6b0] sm:$0xff]   ;;  %v2026_v35 = vcombine.high %v14723_v44, %v14723_v44  ;;  %12331 = vset.pattern.permute.xlu0 %v13393_v11 }
 0x1e6   : > { %5897 = vmatprep.subr.bf16.mxu1 %v13390_v3  ;;  %1019 = vperm.xlu0 %12331, %v14755_v32  }
 0x1e7   : > { %11595 = vmatpush3.bf16.msra.mxu0 %v12597_v0  ;;  %v1085_v0 = vadd.f32 %v1053_v37, %v954_v36  ;;  %v2413_v30 = vpack.c.bf16 %v2026_v35, %v2026_v35  ;;  %v12618_v37 = vld [vmem:[%s13564_s30 + $0x744] sm:$0xff]   ;;  %v12620_v36 = vld [vmem:[%s13564_s30 + $0x77c] sm:$0xff]  }
 0x1e8   : > { %11596 = vmatprep.subr.bf16.mxu0 %v12599_v55  ;;  %v12613_v55 = vld [vmem:[%s13564_s30 + $0x718] ss:$0 sps:$4 sm:$0xff]  }
 0x1e9   : > { %5898 = vmatpush1.bf16.msra.mxu1 %v12598_v51  ;;  %v12612_v51 = vld [vmem:[%s13564_s30 + $0x754] sm:$0xff]   ;;  %v1216_v7 = vadd.f32 %v1184_v54, %v1085_v0  ;;  %v5809_v4 = vsel %vm4211_vm1, %v12613_v55, 0  ;;  %v2011_v55 = vcombine.high %v14710_v28, %v14710_v28  ;;  %v12627_v28 = vld [vmem:[%s13564_s30 + $0x72c] sm:$0xff]  }
 0x1ea   : > { %5899 = vmatprep.subr.bf16.mxu1 %v13390_v3  ;;  %12334 = vset.pattern.permute.xlu0 %v13397_v24 }
 0x1eb   : > { %11597 = vmatpush3.bf16.msra.mxu0 %v12600_v42  ;;  %v12614_v42 = vld [vmem:[%s13564_s30 + $0x78c] sm:$0xff]   ;;  %1412 = vperm.xlu0 %12334, %v14755_v32  }
 0x1ec   : > { %11598 = vmatprep.subr.bf16.mxu0 %v12602_v59 }
 0x1ed   : > { %5900 = vmatpush1.bf16.msra.mxu1 %v12601_v52  ;;  %v14760_v52 = vpop.permute.xlu1 %610 }
 0x1ee   : > { %5901 = vmatprep.subr.bf16.mxu1 %v13390_v3 }
 0x1ef   : > { %11599 = vmatpush3.bf16.msra.mxu0 %v12603_v25  ;;  %v1347_v25 = vadd.f32 %v1315_v9, %v1216_v7  ;;  %12337 = vset.pattern.permute.xlu0 %v13390_v3  ;;  %v14815_v7 = vpop.permute.xlu0 %1134 }
 0x1f0   : > { %11600 = vmatprep.subr.bf16.mxu0 %v12605_v41  ;;  %v12617_v41 = vld [vmem:[%s13564_s30 + $0x784] sm:$0xff]  }
 0x1f1   : > { %5902 = vmatpush1.bf16.msra.mxu1 %v12604_v43  ;;  %v661_v43 = vmul.f32 %v14548_v13, %v14760_v52  ;;  %v1478_v13 = vadd.f32 %v1446_v10, %v1347_v25  ;;  %v1185_v10 = vmul.f32 %v14620_v27, %v14815_v7  ;;  %v12632_v27 = vld [vmem:[%s13564_s30 + $0x7d4] sm:$0xff]  }
 0x1f2   : > { %v4329_v49 = vpop.f32.mrf.mxu0  ;;  %5903 = vmatprep.subr.bf16.mxu1 %v13390_v3 }
 0x1f3   : > { %v14733_v38 = vadd.f32 %v4329_v49, %v14533_v14  ;;  %11601 = vmatpush3.bf16.msra.mxu0 %v12606_v50  ;;  %v10624_v14 = vld [vmem:[%s13583_s11 + $0x9] ss:$0 sm:$0xff]  ;;  %v12619_v49 = vld [vmem:[%s13564_s30 + $0x708] sm:$0xff]  }
 0x1f4   : > { %v4331_v57 = vpop.f32.mrf.mxu0  ;;  %11602 = vmatprep.subr.bf16.mxu0 %v12608_v31  ;;  %1763 = vperm.xlu1 %12327, %v10624_v14   ;;  %v1577_v31 = vmul.f32 %v14540_v16, %v14664_v61  ;;  %v792_v16 = vmul.f32 %v14570_v8, %v14774_v34  ;;  %v12624_v14 = vld [vmem:[%s13564_s30 + $0x734] sm:$0xff]  }
 0x1f5   : > { %5904 = vmatpush1.bf16.msra.mxu1 %v12607_v23  ;;  %v14781_v23 = vpop.permute.xlu1 %872  ;;  %v12622_v57 = vld [vmem:[%s13564_s30 + $0x700] sm:$0xff]  }
 0x1f6   : > { %v4332_v39 = vpop.f32.mrf.mxu0  ;;  %5905 = vmatprep.subr.bf16.mxu1 %v13390_v3  ;;  %v1609_v35 = vadd.f32 %v1577_v31, %v1478_v13  ;;  %v923_v8 = vmul.f32 %v14588_v33, %v14781_v23  ;;  %v12626_v33 = vld [vmem:[%s13564_s30 + $0x76c] sm:$0xff]  }
 0x1f7   : > { %11603 = vmatpush3.bf16.msra.mxu0 %v12609_v46 }
 0x1f8   : > { %v4333_v59 = vpop.f32.mrf.mxu0  ;;  %11610 = vmatprep.subr.bf16.mxu0 %v12611_v45  ;;  %495 = vperm.xlu1 %12327, %v14755_v32   ;;  %v12621_v45 = vld [vmem:[%s13564_s30 + $0x73c] sm:$0xff]   ;;  %v1801_v39 = vadd.f32 %v14693_v56, %v1609_v35  ;;  %v12628_v56 = vld [vmem:[%s13564_s30 + $0x6f0] sm:$0xff]  }
 0x1f9   : > { %5906 = vmatpush1.bf16.msra.mxu1 %v12610_v47  ;;  %v693_v47 = vadd.f32 %v661_v43, %v530_v60  ;;  %v14801_v54 = vpop.permute.xlu1 %1003  ;;  %v14819_v59 = vrot.slane %v2011_v55, %v13821_v21  ;;  %v12641_v35 = vld [vmem:[%s13564_s30 + $0x7fc] sm:$0xff]   ;;  %v14874_v55 = vld [vmem:[%s16992_s0 + $0x8] sm:$0xf] }
 0x1fa   : > { %5884 = vmatmul.mubr.bf16.vlgmr.msra.gmra.mxu0 %v2408_v20  ;;  %5911 = vmatprep.subr.bf16.mxu1 %v13390_v3  ;;  %v12629_v20 = vld [vmem:[%s13564_s30 + $0x764] sm:$0xff]  }
 0x1fb   : > { %11611 = vmatpush3.bf16.msra.mxu0 %v12612_v51  ;;  %6242 = vmatprep.mubr.bf16.mxu0 %v2413_v30  ;;  %v824_v0 = vadd.f32 %v792_v16, %v693_v47  ;;  %v12625_v51 = vld [vmem:[%s13564_s30 + $0x6f8] sm:$0xff]   ;;  %v1054_v30 = vmul.f32 %v14601_v26, %v14801_v54  ;;  %v1833_v26 = vmax.f32 %v1801_v39, 0.0  ;;  %v2027_v25 = vcombine.high %v14819_v59, %v14819_v59  ;;  %v12638_v47 = vld [vmem:[%s13564_s30 + $0x804] sm:$0xff]   ;;  %v14855_v16 = vpop.permute.xlu0 %1527 }
 0x1fc   : > { %v11472_v15 = vpop.f32.mrf.mxu1  ;;  %11612 = vmatprep.subr.bf16.mxu0 %v12614_v42  ;;  %12329 = vset.pattern.permute.xlu1 %v13389_v2  ;;  %v12643_v39 = vld [vmem:[%s13564_s30 + $0x844] sm:$0xff]  }
 0x1fd   : > { %5912 = vmatpush2.bf16.msra.mxu1 %v5809_v4  ;;  %757 = vperm.xlu1 %12329, %v14755_v32   ;;  %v955_v42 = vadd.f32 %v923_v8, %v824_v0  ;;  %v14824_v9 = vpop.permute.xlu1 %1265  ;;  %v12630_v4 = vld [vmem:[%s13564_s30 + $0x724] sm:$0xff]   ;;  %v2415_v31 = vpack.c.bf16 %v2027_v25, %v2027_v25  ;;  %v1578_v8 = vmul.f32 %v14676_v48, %v14855_v16  ;;  %v12647_v25 = vld [vmem:[%s13564_s30 + $0x7ec] sm:$0xff]  }
 0x1fe   : > { %v11473_v58 = vpop.f32.mrf.mxu1  ;;  %5913 = vmatprep.subr.bf16.mxu1 %v13390_v3  ;;  %v1316_v60 = vmul.f32 %v14643_v19, %v14824_v9  ;;  %v12636_v19 = vld [vmem:[%s13564_s30 + $0x7cc] sm:$0xff]   ;;  %v10625_v0 = vld [vmem:[%s13583_s11 + $0xa] ss:$0 sm:$0xff]  ;;  %v531_v48 = vmul.f32 %v14874_v55, %v14743_v62 }
 0x1ff   : > { %v11474_v50 = vadd.f32 %v11473_v58, %v11472_v15  ;;  %11613 = vmatpush3.bf16.msra.mxu0 %v12615_v63  ;;  %v1086_v63 = vadd.f32 %v1054_v30, %v955_v42  ;;  %v12631_v15 = vld [vmem:[%s13564_s30 + $0x814] sm:$0xff]   ;;  %v2410_v58 = vpack.c.bf16 %v14614_v22, %v14614_v22 }
 0x200   : > { %v11475_v40 = vpop.f32.mrf.mxu1  ;;  %11614 = vmatprep.subr.bf16.mxu0 %v12617_v41  ;;  %v12633_v41 = vld [vmem:[%s13564_s30 + $0x75c] sm:$0xff]   ;;  %v12637_v22 = vld [vmem:[%s13564_s30 + $0x854] sm:$0xff]  }
 0x201   : > { %5914 = vmatpush2.bf16.msra.mxu1 %v12616_v29  ;;  %v14786_v46 = vadd.f32 %v11474_v50, %v14670_v53  ;;  %v12623_v53 = vld [vmem:[%s13564_s30 + $0x774] sm:$0xff]   ;;  %12330 = vset.pattern.permute.xlu1 %v13391_v5  ;;  %v14837_v29 = vrot.slane %v1833_v26, %v13821_v21  ;;  %v1217_v43 = vadd.f32 %v1185_v10, %v1086_v63  ;;  %v12635_v50 = vld [vmem:[%s13564_s30 + $0x80c] sm:$0xff]   ;;  %v12634_v40 = vld [vmem:[%s13564_s30 + $0x71c] sm:$0xff]  }
 0x202   : > { %v11476_v61 = vpop.f32.mrf.mxu1  ;;  %5915 = vmatprep.subr.bf16.mxu1 %v13390_v3  ;;  %888 = vperm.xlu1 %12330, %v14755_v32   ;;  %v12644_v30 = vld [vmem:[%s13564_s30 + $0x7f4] sm:$0xff]   ;;  %v14897_v26 = vld [vmem:[%s16992_s0 + $0x20] sm:$0xf] }
 0x203   : > { %11615 = vmatpush3.bf16.msra.mxu0 %v12618_v37  ;;  %v14845_v37 = vpop.permute.xlu1 %1396  ;;  %v2035_v13 = vcombine.high %v14837_v29, %v14837_v29  ;;  %v12639_v61 = vld [vmem:[%s13564_s30 + $0x7c4] sm:$0xff]   ;;  %v12646_v63 = vld [vmem:[%s13564_s30 + $0x83c] sm:$0xff]  }
 0x204   : > { %11616 = vmatprep.subr.bf16.mxu0 %v12620_v36  ;;  %v1348_v36 = vadd.f32 %v1316_v60, %v1217_v43  ;;  %v12649_v43 = vld [vmem:[%s13564_s30 + $0x834] sm:$0xff]  }
 0x205   : > { %5916 = vmatpush2.bf16.msra.mxu1 %v12619_v49  ;;  %v1447_v49 = vmul.f32 %v14659_v1, %v14845_v37  ;;  %v12640_v1 = vld [vmem:[%s13564_s30 + $0x84c] sm:$0xff]  }
 0x206   : > { %5917 = vmatprep.subr.bf16.mxu1 %v13390_v3  ;;  %12332 = vset.pattern.permute.xlu1 %v13394_v12 }
 0x207   : > { %11617 = vmatpush3.bf16.msra.mxu0 %v12621_v45  ;;  %1150 = vperm.xlu1 %12332, %v14755_v32   ;;  %v2412_v45 = vpack.c.bf16 %v14723_v44, %v14723_v44  ;;  %v14888_v62 = vpop.permute.xlu1 %1751 }
 0x208   : > { %11618 = vmatprep.subr.bf16.mxu0 %v12623_v53  ;;  %v2417_v53 = vpack.c.bf16 %v2035_v13, %v2035_v13  ;;  %v14923_v13 = vld [vmem:[%s16992_s0 + $0x38] sm:$0xf] }
 0x209   : > { %5918 = vmatpush2.bf16.msra.mxu1 %v12622_v57  ;;  %v1479_v57 = vadd.f32 %v1447_v49, %v1348_v36  ;;  %v12653_v49 = vld [vmem:[%s13564_s30 + $0x7dc] sm:$0xff]  }
 0x20a   : > { %5919 = vmatprep.subr.bf16.mxu1 %v13390_v3 }
 0x20b   : > { %11619 = vmatpush3.bf16.msra.mxu0 %v12624_v14  ;;  %12333 = vset.pattern.permute.xlu1 %v13395_v17  ;;  %v14881_v14 = vld [vmem:[%s16992_s0 + $0x14] sm:$0xf] }
 0x20c   : > { %11620 = vmatprep.subr.bf16.mxu0 %v12626_v33  ;;  %1281 = vperm.xlu1 %12333, %v14755_v32   ;;  %v662_v33 = vmul.f32 %v14881_v14, %v14760_v52 }
 0x20d   : > { %5920 = vmatpush2.bf16.msra.mxu1 %v12625_v51  ;;  %v1610_v51 = vadd.f32 %v1578_v8, %v1479_v57 }
 0x20e   : > { %5921 = vmatprep.subr.bf16.mxu1 %v13390_v3 }
 0x20f   : > { %11621 = vmatpush3.bf16.msra.mxu0 %v12627_v28  ;;  %v1802_v10 = vadd.f32 %v14888_v62, %v1610_v51 }
 0x210   : > { %11622 = vmatprep.subr.bf16.mxu0 %v12629_v20  ;;  %12335 = vset.pattern.permute.xlu1 %v13396_v18  ;;  %v694_v20 = vadd.f32 %v662_v33, %v531_v48  ;;  %v12657_v48 = vld [vmem:[%s13564_s30 + $0x8c0] sm:$0xff]  }
 0x211   : > { %5922 = vmatpush2.bf16.msra.mxu1 %v12628_v56  ;;  %1543 = vperm.xlu1 %12335, %v14755_v32   ;;  %v12642_v32 = vld [vmem:[%s13564_s30 + $0x7bc] sm:$0xff]   ;;  %v12645_v56 = vld [vmem:[%s13564_s30 + $0x7b4] sm:$0xff]  }
 0x212   : > { %11632 = vmatprep.subr.bf16.mxu1 %v12631_v15  ;;  %v12658_v33 = vld [vmem:[%s13564_s30 + $0x81c] sm:$0xff]  }
 0x213   : > { %11623 = vmatpush3.bf16.msra.mxu0 %v12630_v4  ;;  %v793_v4 = vmul.f32 %v14897_v26, %v14774_v34  ;;  %v14910_v34 = vld [vmem:[%s16992_s0 + $0x2c] sm:$0xf] }
 0x214   : > { %5924 = vmatmul.mubr.bf16.vlgmr.msra.gmra.mxu1 %v2410_v58  ;;  %11624 = vmatprep.subr.bf16.mxu0 %v12633_v41  ;;  %v12648_v41 = vld [vmem:[%s13564_s30 + $0x7ac] sm:$0xff]   ;;  %v14915_v58 = vmax.f32 %v1802_v10, 0.0 }
 0x215   : > { %11633 = vmatpush3.bf16.msra.mxu1 %v12632_v27  ;;  %6282 = vmatprep.mubr.bf16.mxu1 %v2415_v31  ;;  %v924_v27 = vmul.f32 %v14910_v34, %v14781_v23  ;;  %v825_v60 = vadd.f32 %v793_v4, %v694_v20  ;;  %v12651_v31 = vld [vmem:[%s13564_s30 + $0x7a4] sm:$0xff]   ;;  %v1055_v23 = vmul.f32 %v14923_v13, %v14801_v54  ;;  %v14967_v20 = vpop.permute.xlu1 %483  ;;  %v12660_v4 = vld [vmem:[%s13564_s30 + $0x8b8] sm:$0xff]   ;;  %v12662_v10 = vld [vmem:[%s13564_s30 + $0x8f0] sm:$0xff]  }
 0x216   : > { %11634 = vmatprep.subr.bf16.mxu1 %v12635_v50  ;;  %12336 = vset.pattern.permute.xlu1 %v13390_v3  ;;  %v12650_v50 = vld [vmem:[%s13564_s30 + $0x7e4] sm:$0xff]  }
 0x217   : > { %11625 = vmatpush3.bf16.msra.mxu0 %v12634_v40  ;;  %1767 = vperm.xlu1 %12336, %v10625_v0   ;;  %v956_v40 = vadd.f32 %v924_v27, %v825_v60  ;;  %v14986_v60 = vld [vmem:[%s16992_s0 + $0x68] sm:$0xf] }
 0x218   : > { %6290 = vmatprep.subr.bf16.mxu0 %v13390_v3 }
 0x219   : > { %11635 = vmatpush3.bf16.msra.mxu1 %v12636_v19  ;;  %v12652_v19 = vld [vmem:[%s13564_s30 + $0x82c] sm:$0xff]   ;;  %v1087_v54 = vadd.f32 %v1055_v23, %v956_v40  ;;  %v14997_v40 = vld [vmem:[%s16992_s0] sm:$0xff] }
 0x21a   : > { %6243 = vmatmul.mubr.bf16.vlgmr.msra.gmra.mxu0 %v2412_v45  ;;  %11636 = vmatprep.subr.bf16.mxu1 %v12638_v47  ;;  %v532_v23 = vmul.f32 %v14997_v40, %v14967_v20 }
 0x21b   : > { %6291 = vmatpush1.bf16.msra.mxu0 %v12637_v22  ;;  %10912 = vmatprep.mubr.msk.bf16.mxu0 %vm4207_vm0, %v2417_v53  ;;  %v14930_v22 = vrot.slane %v14915_v58, %v13821_v21  ;;  %v10322_v53 = vsel %vm10321_vm2, %v14733_v38, 0.0  ;;  %v12656_v38 = vld [vmem:[%s13564_s30 + $0x900] sm:$0xff]  }
 0x21c   : > { %6292 = vmatprep.subr.bf16.mxu0 %v13390_v3  ;;  %v11494_v44 = vpop.f32.mrf.mxu1  ;;  %12338 = vset.pattern.permute.xlu1 %v13392_v6 }
 0x21d   : > { %11637 = vmatpush3.bf16.msra.mxu1 %v12639_v61  ;;  %v12654_v61 = vld [vmem:[%s13564_s30 + $0x79c] sm:$0xff]   ;;  %v2051_v57 = vcombine.high %v14930_v22, %v14930_v22 }
 0x21e   : > { %11638 = vmatprep.subr.bf16.mxu1 %v12641_v35  ;;  %v11495_v42 = vpop.f32.mrf.mxu1  ;;  %v14942_v35 = vld [vmem:[%s16992_s0 + $0x44] sm:$0xf] }
 0x21f   : > { %6293 = vmatpush1.bf16.msra.mxu0 %v12640_v1  ;;  %v14890_v28 = vadd.f32 %v11495_v42, %v11494_v44  ;;  %v2419_v42 = vpack.c.bf16 %v2051_v57, %v2051_v57 }
 0x220   : > { %6294 = vmatprep.subr.bf16.mxu0 %v13390_v3  ;;  %v11497_v52 = vpop.f32.mrf.mxu1 }
 0x221   : > { %11639 = vmatpush3.bf16.msra.mxu1 %v12642_v32  ;;  %v12655_v32 = vld [vmem:[%s13564_s30 + $0x824] sm:$0xff]  }
 0x222   : > { %11640 = vmatprep.subr.bf16.mxu1 %v12644_v30  ;;  %v11498_v15 = vpop.f32.mrf.mxu1  ;;  %v2414_v30 = vpack.c.bf16 %v14819_v59, %v14819_v59  ;;  %v12661_v52 = vld [vmem:[%s13564_s30 + $0x884] ss:$0 sps:$4 sm:$0xff]  }
 0x223   : > { %6295 = vmatpush1.bf16.msra.mxu0 %v12643_v39  ;;  %v6208_v15 = vsel %vm4211_vm1, %v12661_v52, 0 }
 0x224   : > { %6296 = vmatprep.subr.bf16.mxu0 %v13390_v3 }
 0x225   : > { %11641 = vmatpush3.bf16.msra.mxu1 %v12645_v56  ;;  %v12659_v56 = vld [vmem:[%s13564_s30 + $0x8f8] sm:$0xff]  }
 0x226   : > { %11642 = vmatprep.subr.bf16.mxu1 %v12647_v25  ;;  %v14980_v25 = vpop.permute.xlu0 %614 }
 0x227   : > { %6297 = vmatpush1.bf16.msra.mxu0 %v12646_v63 }
 0x228   : > { %6298 = vmatprep.subr.bf16.mxu0 %v13390_v3 }
 0x229   : > { %11643 = vmatpush3.bf16.msra.mxu1 %v12648_v41  ;;  %v12663_v41 = vld [vmem:[%s13564_s30 + $0x8b0] sm:$0xff]  }
 0x22a   : > { %v4728_v36 = vpop.f32.mrf.mxu0  ;;  %11644 = vmatprep.subr.bf16.mxu1 %v12650_v50  ;;  %v14991_v50 = vpop.permute.xlu1 %745 }
 0x22b   : > { %v4729_v47 = vadd.f32 %v4728_v36, %v14786_v46  ;;  %6299 = vmatpush1.bf16.msra.mxu0 %v12649_v43  ;;  %v1186_v46 = vmul.f32 %v14942_v35, %v14815_v7  ;;  %v14958_v7 = vld [vmem:[%s16992_s0 + $0x50] sm:$0xf] }
 0x22c   : > { %v4730_v45 = vpop.f32.mrf.mxu0  ;;  %6300 = vmatprep.subr.bf16.mxu0 %v13390_v3  ;;  %v1317_v39 = vmul.f32 %v14958_v7, %v14824_v9  ;;  %v14973_v9 = vld [vmem:[%s16992_s0 + $0x5c] sm:$0xf]  ;;  %v12665_v43 = vld [vmem:[%s13564_s30 + $0x8e8] sm:$0xff]  }
 0x22d   : > { %v10323_v1 = vsel %vm10321_vm2, %v4729_v47, 0.0  ;;  %11645 = vmatpush3.bf16.msra.mxu1 %v12651_v31  ;;  %v1218_v51 = vadd.f32 %v1186_v46, %v1087_v54  ;;  %v1448_v59 = vmul.f32 %v14973_v9, %v14845_v37  ;;  %v1579_v37 = vmul.f32 %v14986_v60, %v14855_v16  ;;  %v12664_v31 = vld [vmem:[%s13564_s30 + $0x87c] sm:$0xff]   ;;  %v15004_v16 = vld [vmem:[%s16992_s0 + $0xc] sm:$0xff] }
 0x22e   : > { %v14948_v8 = vadd.f32 %v10323_v1, %v10322_v53  ;;  %v4731_v0 = vpop.f32.mrf.mxu0  ;;  %11646 = vmatprep.subr.bf16.mxu1 %v12653_v49  ;;  %v12666_v49 = vld [vmem:[%s13564_s30 + $0x8a8] sm:$0xff]   ;;  %v12668_v45 = vld [vmem:[%s13564_s30 + $0x8e0] sm:$0xff]   ;;  %v12667_v53 = vld [vmem:[%s13564_s30 + $0x874] sm:$0xff]  }
 0x22f   : > { %6301 = vmatpush1.bf16.msra.mxu0 %v12652_v19  ;;  %v1349_v63 = vadd.f32 %v1317_v39, %v1218_v51  ;;  %v663_v19 = vmul.f32 %v15004_v16, %v14980_v25  ;;  %v15015_v1 = vld [vmem:[%s16992_s0 + $0x18] sm:$0xff]  ;;  %v12670_v51 = vld [vmem:[%s13564_s30 + $0x86c] sm:$0xff]  }
 0x230   : > { %v4732_v44 = vpop.f32.mrf.mxu0  ;;  %6302 = vmatprep.subr.bf16.mxu0 %v13390_v3  ;;  %v794_v46 = vmul.f32 %v15015_v1, %v14991_v50  ;;  %v12671_v39 = vld [vmem:[%s13564_s30 + $0x8d8] sm:$0xff]  }
 0x231   : > { %11647 = vmatpush3.bf16.msra.mxu1 %v12654_v61  ;;  %v1480_v27 = vadd.f32 %v1448_v59, %v1349_v63  ;;  %v695_v57 = vadd.f32 %v663_v19, %v532_v23  ;;  %v12673_v59 = vld [vmem:[%s13564_s30 + $0x864] sm:$0xff]   ;;  %v12676_v23 = vld [vmem:[%s13564_s30 + $0x85c] sm:$0xff]  }
 0x232   : > { %11654 = vmatprep.subr.bf16.mxu1 %v12656_v38  ;;  %v15020_v38 = vpop.permute.xlu1 %876 }
 0x233   : > { %6303 = vmatpush1.bf16.msra.mxu0 %v12655_v32  ;;  %v1611_v47 = vadd.f32 %v1579_v37, %v1480_v27  ;;  %v12669_v32 = vld [vmem:[%s13564_s30 + $0x8a0] sm:$0xff]   ;;  %v12675_v37 = vld [vmem:[%s13564_s30 + $0x890] sm:$0xff]  }
 0x234   : > { %6283 = vmatmul.mubr.bf16.vlgmr.msra.gmra.mxu1 %v2414_v30  ;;  %6304 = vmatprep.subr.bf16.mxu0 %v13390_v3  ;;  %v826_v30 = vadd.f32 %v794_v46, %v695_v57  ;;  %v12680_v46 = vld [vmem:[%s13564_s30 + $0x940] sm:$0xff]  }
 0x235   : > { %11655 = vmatpush3.bf16.msra.mxu1 %v12657_v48  ;;  %6641 = vmatprep.mubr.bf16.mxu1 %v2419_v42  ;;  %v1803_v44 = vadd.f32 %v14888_v62, %v1611_v47  ;;  %v2036_v42 = vcombine.high %v14915_v58, %v14915_v58  ;;  %v12674_v58 = vld [vmem:[%s13564_s30 + $0x8d0] sm:$0xff]  }
 0x236   : > { %11656 = vmatprep.subr.bf16.mxu1 %v12659_v56  ;;  %v15034_v56 = vld [vmem:[%s16992_s0 + $0x24] sm:$0xff]  ;;  %v15043_v63 = vpop.permute.xlu1 %1138 }
 0x237   : > { %6305 = vmatpush1.bf16.msra.mxu0 %v12658_v33  ;;  %v925_v62 = vmul.f32 %v15034_v56, %v15020_v38  ;;  %v1835_v52 = vmax.f32 %v1803_v44, 0.0 }
 0x238   : > { %6310 = vmatprep.subr.bf16.mxu0 %v13390_v3 }
 0x239   : > { %11657 = vmatpush3.bf16.msra.mxu1 %v12660_v4  ;;  %v12672_v4 = vld [vmem:[%s13564_s30 + $0x898] sm:$0xff]  }
 0x23a   : > { %11658 = vmatprep.subr.bf16.mxu1 %v12662_v10  ;;  %v15047_v10 = vrot.slane %v2036_v42, %v13821_v21 }
 0x23b   : > { %6311 = vmatpush2.bf16.msra.mxu0 %v6208_v15  ;;  %v957_v15 = vadd.f32 %v925_v62, %v826_v30  ;;  %v12681_v30 = vld [vmem:[%s13564_s30 + $0x9c0] sm:$0xff]  }
 0x23c   : > { %v11516_v36 = vpop.f32.mrf.mxu1  ;;  %6312 = vmatprep.subr.bf16.mxu0 %v13390_v3  ;;  %v2052_v19 = vcombine.high %v15047_v10, %v15047_v10 }
 0x23d   : > { %11659 = vmatpush3.bf16.msra.mxu1 %v12663_v41  ;;  %v15052_v41 = vld [vmem:[%s16992_s0 + $0x30] sm:$0xff] }
 0x23e   : > { %v11517_v61 = vpop.f32.mrf.mxu1  ;;  %11660 = vmatprep.subr.bf16.mxu1 %v12665_v43  ;;  %v15059_v43 = vrot.slane %v1835_v52, %v13821_v21  ;;  %v2421_v57 = vpack.c.bf16 %v2052_v19, %v2052_v19  ;;  %v12683_v52 = vld [vmem:[%s13564_s30 + $0x938] sm:$0xff]  }
 0x23f   : > { %v11518_v54 = vadd.f32 %v11517_v61, %v11516_v36  ;;  %6313 = vmatpush2.bf16.msra.mxu0 %v12664_v31  ;;  %v12677_v31 = vld [vmem:[%s13564_s30 + $0x8c8] sm:$0xff]   ;;  %v15068_v36 = vld [vmem:[%s16992_s0 + $0x3c] sm:$0xff] }
 0x240   : > { %v11519_v0 = vpop.f32.mrf.mxu1  ;;  %6314 = vmatprep.subr.bf16.mxu0 %v13390_v3  ;;  %v12679_v61 = vld [vmem:[%s13564_s30 + $0x980] sm:$0xff]  }
 0x241   : > { %11661 = vmatpush3.bf16.msra.mxu1 %v12666_v49  ;;  %v15025_v48 = vadd.f32 %v11518_v54, %v14890_v28  ;;  %v15039_v28 = vpop.permute.xlu0 %1007  ;;  %v1187_v49 = vmul.f32 %v15068_v36, %v15043_v63  ;;  %v12678_v54 = vld [vmem:[%s13564_s30 + $0x888] sm:$0xff]  }
 0x242   : > { %v11520_v33 = vpop.f32.mrf.mxu1  ;;  %11662 = vmatprep.subr.bf16.mxu1 %v12668_v45  ;;  %v1056_v27 = vmul.f32 %v15052_v41, %v15039_v28  ;;  %v15074_v45 = vpop.permute.xlu1 %1269 }
 0x243   : > { %6315 = vmatpush2.bf16.msra.mxu0 %v12667_v53  ;;  %v2060_v53 = vcombine.high %v15059_v43, %v15059_v43  ;;  %v2416_v33 = vpack.c.bf16 %v14837_v29, %v14837_v29 }
 0x244   : > { %6316 = vmatprep.subr.bf16.mxu0 %v13390_v3  ;;  %v1088_v47 = vadd.f32 %v1056_v27, %v957_v15  ;;  %v12684_v27 = vld [vmem:[%s13564_s30 + $0x9b8] sm:$0xff]  }
 0x245   : > { %11663 = vmatpush3.bf16.msra.mxu1 %v12669_v32  ;;  %v15083_v32 = vld [vmem:[%s16992_s0 + $0x48] sm:$0xff]  ;;  %v15092_v42 = vpop.permute.xlu0 %1400  ;;  %v2423_v62 = vpack.c.bf16 %v2060_v53, %v2060_v53 }
 0x246   : > { %11664 = vmatprep.subr.bf16.mxu1 %v12671_v39  ;;  %v1219_v0 = vadd.f32 %v1187_v49, %v1088_v47  ;;  %v1318_v44 = vmul.f32 %v15083_v32, %v15074_v45  ;;  %v2418_v39 = vpack.c.bf16 %v14930_v22, %v14930_v22  ;;  %v15100_v22 = vld [vmem:[%s16992_s0 + $0x54] sm:$0xff]  ;;  %v15108_v15 = vpop.permute.xlu1 %1531  ;;  %v12688_v49 = vld [vmem:[%s13564_s30 + $0x968] sm:$0xff]  }
 0x247   : > { %6317 = vmatpush2.bf16.msra.mxu0 %v12670_v51  ;;  %v12682_v51 = vld [vmem:[%s13564_s30 + $0x978] sm:$0xff]   ;;  %v12687_v47 = vld [vmem:[%s13564_s30 + $0x9b0] sm:$0xff]  }
 0x248   : > { %6318 = vmatprep.subr.bf16.mxu0 %v13390_v3  ;;  %v1350_v29 = vadd.f32 %v1318_v44, %v1219_v0  ;;  %v533_v0 = vmul.f32 %v14874_v55, %v14967_v20  ;;  %v12690_v44 = vld [vmem:[%s13564_s30 + $0x9a8] sm:$0xff]   ;;  %v12694_v20 = vld [vmem:[%s13564_s30 + $0x958] sm:$0xff]  }
 0x249   : > { %11665 = vmatpush3.bf16.msra.mxu1 %v12672_v4  ;;  %v1449_v4 = vmul.f32 %v15100_v22, %v15092_v42 }
 0x24a   : > { %11666 = vmatprep.subr.bf16.mxu1 %v12674_v58  ;;  %v15105_v58 = vld [vmem:[%s13578_s22 + $0xb] ss:$0 sm:$0xff] }
 0x24b   : > { %6319 = vmatpush2.bf16.msra.mxu0 %v12673_v59  ;;  %v12685_v59 = vld [vmem:[%s13564_s30 + $0x970] sm:$0xff]   ;;  %630 = vperm.xlu1 %12338, %v15105_v58  }
 0x24c   : > { %6320 = vmatprep.subr.bf16.mxu0 %v13390_v3  ;;  %499 = vperm.xlu0 %12337, %v15105_v58  }
 0x24d   : > { %11667 = vmatpush3.bf16.msra.mxu1 %v12675_v37  ;;  %v12686_v37 = vld [vmem:[%s13564_s30 + $0x930] sm:$0xff]  }
 0x24e   : > { %11668 = vmatprep.subr.bf16.mxu1 %v12677_v31  ;;  %v1481_v31 = vadd.f32 %v1449_v4, %v1350_v29 }
 0x24f   : > { %6321 = vmatpush2.bf16.msra.mxu0 %v12676_v23  ;;  %v15118_v23 = vld [vmem:[%s16992_s0 + $0x60] sm:$0xff]  ;;  %12339 = vset.pattern.permute.xlu1 %v13389_v2 }
 0x250   : > { %11676 = vmatprep.subr.bf16.mxu0 %v12679_v61  ;;  %v1580_v19 = vmul.f32 %v15118_v23, %v15108_v15  ;;  %v12689_v61 = vld [vmem:[%s13564_s30 + $0x928] sm:$0xff]   ;;  %761 = vperm.xlu1 %12339, %v15105_v58  }
 0x251   : > { %11669 = vmatpush3.bf16.msra.mxu1 %v12678_v54  ;;  %12340 = vset.pattern.permute.xlu0 %v13391_v5 }
 0x252   : > { %6323 = vmatmul.mubr.bf16.vlgmr.msra.gmra.mxu0 %v2416_v33  ;;  %6689 = vmatprep.subr.bf16.mxu1 %v13390_v3  ;;  %v1612_v54 = vadd.f32 %v1580_v19, %v1481_v31  ;;  %v664_v33 = vmul.f32 %v14881_v14, %v14980_v25  ;;  %v795_v14 = vmul.f32 %v14897_v26, %v14991_v50  ;;  %v12697_v50 = vld [vmem:[%s13564_s30 + $0x950] sm:$0xff]  }
 0x253   : > { %11677 = vmatpush3.bf16.msra.mxu0 %v12680_v46  ;;  %6681 = vmatprep.mubr.bf16.mxu0 %v2421_v57  ;;  %v12691_v46 = vld [vmem:[%s13564_s30 + $0x960] sm:$0xff]   ;;  %v15130_v57 = vpop.permute.xlu1 %1755 }
 0x254   : > { %6642 = vmatmul.mubr.bf16.vlgmr.msra.gmra.mxu1 %v2418_v39  ;;  %11678 = vmatprep.subr.bf16.mxu0 %v12682_v51  ;;  %v696_v25 = vadd.f32 %v664_v33, %v533_v0  ;;  %v12699_v0 = vld [vmem:[%s13564_s30 + $0x990] sm:$0xff]   ;;  %v12702_v33 = vld [vmem:[%s13564_s30 + $0x988] sm:$0xff]  }
 0x255   : > { %6690 = vmatpush1.bf16.msra.mxu1 %v12681_v30  ;;  %10959 = vmatprep.mubr.msk.bf16.mxu1 %vm4207_vm0, %v2423_v62  ;;  %v12692_v30 = vld [vmem:[%s13564_s30 + $0x920] sm:$0xff]   ;;  %v1804_v62 = vadd.f32 %v15130_v57, %v1612_v54  ;;  %v12698_v54 = vld [vmem:[%s13564_s30 + $0x910] sm:$0xff]  }
 0x256   : > { %6691 = vmatprep.subr.bf16.mxu1 %v13390_v3  ;;  %892 = vperm.xlu0 %12340, %v15105_v58   ;;  %v827_v31 = vadd.f32 %v795_v14, %v696_v25  ;;  %v10626_v14 = vld [vmem:[%s13583_s11 + $0xb] ss:$0 sm:$0xff]  ;;  %v2420_v25 = vpack.c.bf16 %v15047_v10, %v15047_v10 }
 0x257   : > { %11679 = vmatpush3.bf16.msra.mxu0 %v12683_v52  ;;  %12341 = vset.pattern.permute.xlu1 %v13393_v11  ;;  %v12693_v52 = vld [vmem:[%s13564_s30 + $0x9a0] sm:$0xff]  }
 0x258   : > { %11680 = vmatprep.subr.bf16.mxu0 %v12685_v59  ;;  %1023 = vperm.xlu1 %12341, %v15105_v58   ;;  %v12707_v10 = vld [vmem:[%s13564_s30 + $0xa24] sm:$0xff]  }
 0x259   : > { %6692 = vmatpush1.bf16.msra.mxu1 %v12684_v27  ;;  %v12695_v27 = vld [vmem:[%s13564_s30 + $0x918] sm:$0xff]  }
 0x25a   : > { %6693 = vmatprep.subr.bf16.mxu1 %v13390_v3  ;;  %12343 = vset.pattern.permute.xlu0 %v13395_v17 }
 0x25b   : > { %11681 = vmatpush3.bf16.msra.mxu0 %v12686_v37  ;;  %1285 = vperm.xlu0 %12343, %v15105_v58   ;;  %v15155_v37 = vmax.f32 %v1804_v62, 0.0  ;;  %v12705_v62 = vld [vmem:[%s13564_s30 + $0x9f0] ss:$0 sps:$4 sm:$0xff]  }
 0x25c   : > { %11682 = vmatprep.subr.bf16.mxu0 %v12688_v49  ;;  %v11538_v53 = vpop.f32.mrf.mxu1  ;;  %12342 = vset.pattern.permute.xlu1 %v13394_v12  ;;  %v926_v49 = vmul.f32 %v14910_v34, %v15020_v38 }
 0x25d   : > { %6694 = vmatpush1.bf16.msra.mxu1 %v12687_v47  ;;  %1154 = vperm.xlu1 %12342, %v15105_v58   ;;  %v15172_v34 = vrot.slane %v15155_v37, %v13821_v21 }
 0x25e   : > { %6695 = vmatprep.subr.bf16.mxu1 %v13390_v3  ;;  %v11539_v39 = vpop.f32.mrf.mxu1 }
 0x25f   : > { %11683 = vmatpush3.bf16.msra.mxu0 %v12689_v61  ;;  %v15140_v51 = vadd.f32 %v11539_v39, %v11538_v53  ;;  %12346 = vset.pattern.permute.xlu0 %v13390_v3  ;;  %v12700_v53 = vld [vmem:[%s13564_s30 + $0x948] sm:$0xff]   ;;  %v2076_v39 = vcombine.high %v15172_v34, %v15172_v34 }
 0x260   : > { %11684 = vmatprep.subr.bf16.mxu0 %v12691_v46  ;;  %v11541_v55 = vpop.f32.mrf.mxu1  ;;  %v958_v46 = vadd.f32 %v926_v49, %v827_v31  ;;  %1771 = vperm.xlu0 %12346, %v10626_v14   ;;  %v12712_v31 = vld [vmem:[%s13564_s30 + $0xa54] sm:$0xff]   ;;  %v12711_v49 = vld [vmem:[%s13564_s30 + $0x9e0] sm:$0xff]  }
 0x261   : > { %6696 = vmatpush1.bf16.msra.mxu1 %v12690_v44  ;;  %12344 = vset.pattern.permute.xlu1 %v13397_v24  ;;  %v12701_v44 = vld [vmem:[%s13564_s30 + $0x908] sm:$0xff]  }
 0x262   : > { %v5127_v29 = vpop.f32.mrf.mxu0  ;;  %6697 = vmatprep.subr.bf16.mxu1 %v13390_v3  ;;  %v11542_v4 = vpop.f32.mrf.mxu1  ;;  %1416 = vperm.xlu1 %12344, %v15105_v58   ;;  %v12704_v55 = vld [vmem:[%s13564_s30 + $0xa2c] sm:$0xff]   ;;  %v12719_v14 = vld [vmem:[%s13564_s30 + $0xa04] sm:$0xff]  }
 0x263   : > { %v5128_v59 = vadd.f32 %v5127_v29, %v15025_v48  ;;  %11685 = vmatpush3.bf16.msra.mxu0 %v12692_v30  ;;  %v12696_v48 = vld [vmem:[%s13564_s30 + $0x998] sm:$0xff]   ;;  %v12703_v30 = vld [vmem:[%s13564_s30 + $0xa6c] sm:$0xff]   ;;  %v1319_v29 = vmul.f32 %v14958_v7, %v15074_v45  ;;  %v6607_v4 = vsel %vm4211_vm1, %v12705_v62, 0 }
 0x264   : > { %v5129_v26 = vpop.f32.mrf.mxu0  ;;  %11686 = vmatprep.subr.bf16.mxu0 %v12694_v20  ;;  %v2425_v20 = vpack.c.bf16 %v2076_v39, %v2076_v39  ;;  %v12708_v45 = vld [vmem:[%s13564_s30 + $0x9e8] sm:$0xff]   ;;  %12349 = vset.pattern.permute.xlu0 %v13389_v2 }
 0x265   : > { %v10325_v19 = vsel %vm10321_vm2, %v5128_v59, 0.0  ;;  %6698 = vmatpush1.bf16.msra.mxu1 %v12693_v52  ;;  %v1450_v59 = vmul.f32 %v14973_v9, %v15092_v42  ;;  %v12710_v42 = vld [vmem:[%s13564_s30 + $0xa1c] sm:$0xff]   ;;  %v12716_v39 = vld [vmem:[%s13564_s30 + $0xa0c] sm:$0xff]  }
 0x266   : > { %v15165_v47 = vadd.f32 %v10325_v19, %v14948_v8  ;;  %v5130_v61 = vpop.f32.mrf.mxu0  ;;  %6699 = vmatprep.subr.bf16.mxu1 %v13390_v3  ;;  %v1057_v8 = vmul.f32 %v14923_v13, %v15039_v28  ;;  %v1188_v13 = vmul.f32 %v14942_v35, %v15043_v63  ;;  %12345 = vset.pattern.permute.xlu1 %v13396_v18  ;;  %v12706_v35 = vld [vmem:[%s13564_s30 + $0xa64] sm:$0xff]   ;;  %v15197_v63 = vpop.permute.xlu1 %618 }
 0x267   : > { %11687 = vmatpush3.bf16.msra.mxu0 %v12695_v27  ;;  %1547 = vperm.xlu1 %12345, %v15105_v58   ;;  %v15203_v58 = vpop.permute.xlu0 %487  ;;  %v12709_v27 = vld [vmem:[%s13564_s30 + $0xa5c] sm:$0xff]   ;;  %v665_v26 = vmul.f32 %v15004_v16, %v15197_v63  ;;  %v1581_v16 = vmul.f32 %v14986_v60, %v15108_v15 }
 0x268   : > { %v5131_v38 = vpop.f32.mrf.mxu0  ;;  %11688 = vmatprep.subr.bf16.mxu0 %v12697_v50  ;;  %v1089_v28 = vadd.f32 %v1057_v8, %v958_v46  ;;  %v534_v50 = vmul.f32 %v14997_v40, %v15203_v58  ;;  %v12714_v15 = vld [vmem:[%s13564_s30 + $0x9d8] sm:$0xff]  }
 0x269   : > { %6700 = vmatpush1.bf16.msra.mxu1 %v12696_v48 }
 0x26a   : > { %6701 = vmatprep.subr.bf16.mxu1 %v13390_v3  ;;  %v1220_v52 = vadd.f32 %v1188_v13, %v1089_v28  ;;  %v15217_v9 = vpop.permute.xlu1 %749  ;;  %v697_v48 = vadd.f32 %v665_v26, %v534_v50  ;;  %v12718_v13 = vld [vmem:[%s13564_s30 + $0xa44] sm:$0xff]  }
 0x26b   : > { %11689 = vmatpush3.bf16.msra.mxu0 %v12698_v54  ;;  %12347 = vset.pattern.permute.xlu1 %v13390_v3  ;;  %v796_v40 = vmul.f32 %v15015_v1, %v15217_v9  ;;  %v15227_v61 = vpop.permute.xlu0 %880  ;;  %v12713_v54 = vld [vmem:[%s13564_s30 + $0xa14] sm:$0xff]  }
 0x26c   : > { %11690 = vmatprep.subr.bf16.mxu0 %v12700_v53  ;;  %v1351_v7 = vadd.f32 %v1319_v29, %v1220_v52  ;;  %v12715_v53 = vld [vmem:[%s13564_s30 + $0xa4c] sm:$0xff]   ;;  %v927_v1 = vmul.f32 %v15034_v56, %v15227_v61 }
 0x26d   : > { %6702 = vmatpush1.bf16.msra.mxu1 %v12699_v0  ;;  %v828_v8 = vadd.f32 %v796_v40, %v697_v48  ;;  %v12717_v56 = vld [vmem:[%s13564_s30 + $0x9d0] sm:$0xff]   ;;  %v12728_v40 = vld [vmem:[%s13564_s30 + $0xaa4] sm:$0xff]  }
 0x26e   : > { %6703 = vmatprep.subr.bf16.mxu1 %v13390_v3  ;;  %v1482_v19 = vadd.f32 %v1450_v59, %v1351_v7  ;;  %v15231_v46 = vpop.permute.xlu1 %1011  ;;  %v12725_v7 = vld [vmem:[%s13564_s30 + $0xa34] sm:$0xff]  }
 0x26f   : > { %11691 = vmatpush3.bf16.msra.mxu0 %v12701_v44  ;;  %v2061_v44 = vcombine.high %v15155_v37, %v15155_v37  ;;  %v959_v37 = vadd.f32 %v927_v1, %v828_v8  ;;  %v15262_v59 = vpop.permute.xlu0 %1273  ;;  %v12731_v8 = vld [vmem:[%s13564_s30 + $0xa9c] sm:$0xff]  }
 0x270   : > { %11698 = vmatprep.subr.bf16.mxu0 %v12703_v30  ;;  %v1613_v60 = vadd.f32 %v1581_v16, %v1482_v19  ;;  %v12727_v19 = vld [vmem:[%s13564_s30 + $0xae4] sm:$0xff]  }
 0x271   : > { %6704 = vmatpush1.bf16.msra.mxu1 %v12702_v33 }
 0x272   : > { %6682 = vmatmul.mubr.bf16.vlgmr.msra.gmra.mxu0 %v2420_v25  ;;  %6709 = vmatprep.subr.bf16.mxu1 %v13390_v3  ;;  %v1805_v28 = vadd.f32 %v15130_v57, %v1613_v60  ;;  %v15250_v25 = vpop.permute.xlu1 %1142  ;;  %v12720_v57 = vld [vmem:[%s13564_s30 + $0x9c8] sm:$0xff]   ;;  %v2424_v60 = vpack.c.bf16 %v15172_v34, %v15172_v34  ;;  %v12734_v34 = vld [vmem:[%s13564_s30 + $0xa94] sm:$0xff]  }
 0x273   : > { %11699 = vmatpush3.bf16.msra.mxu0 %v12704_v55  ;;  %7040 = vmatprep.mubr.bf16.mxu0 %v2425_v20  ;;  %v1058_v55 = vmul.f32 %v15052_v41, %v15231_v46  ;;  %v12722_v41 = vld [vmem:[%s13564_s30 + $0x9fc] sm:$0xff]  }
 0x274   : > { %11700 = vmatprep.subr.bf16.mxu0 %v12706_v35  ;;  %v15254_v35 = vrot.slane %v2061_v44, %v13821_v21  ;;  %v1837_v52 = vmax.f32 %v1805_v28, 0.0  ;;  %v12732_v44 = vld [vmem:[%s13564_s30 + $0xb24] sm:$0xff]   ;;  %v12736_v28 = vld [vmem:[%s13564_s30 + $0xacc] sm:$0xff]  }
 0x275   : > { %6710 = vmatpush2.bf16.msra.mxu1 %v6607_v4  ;;  %v1090_v29 = vadd.f32 %v1058_v55, %v959_v37  ;;  %v1189_v4 = vmul.f32 %v15068_v36, %v15250_v25  ;;  %v12724_v36 = vld [vmem:[%s13564_s30 + $0xaac] sm:$0xff]   ;;  %v15317_v55 = vld [vmem:[%s13578_s22 + $0xc] ss:$0 sm:$0xff]  ;;  %v12735_v37 = vld [vmem:[%s13564_s30 + $0xb1c] sm:$0xff]  }
 0x276   : > { %6711 = vmatprep.subr.bf16.mxu1 %v13390_v3  ;;  %v15270_v26 = vrot.slane %v1837_v52, %v13821_v21  ;;  %503 = vperm.xlu1 %12347, %v15317_v55   ;;  %v12739_v52 = vld [vmem:[%s13564_s30 + $0xac4] sm:$0xff]  }
 0x277   : > { %11701 = vmatpush3.bf16.msra.mxu0 %v12707_v10  ;;  %v12723_v10 = vld [vmem:[%s13564_s30 + $0xaec] sm:$0xff]   ;;  %v1221_v50 = vadd.f32 %v1189_v4, %v1090_v29  ;;  %765 = vperm.xlu0 %12349, %v15317_v55   ;;  %v12738_v29 = vld [vmem:[%s13564_s30 + $0xb14] sm:$0xff]   ;;  %v12740_v4 = vld [vmem:[%s13564_s30 + $0xa84] sm:$0xff]  }
 0x278   : > { %11702 = vmatprep.subr.bf16.mxu0 %v12709_v27  ;;  %v2077_v27 = vcombine.high %v15254_v35, %v15254_v35  ;;  %v2085_v48 = vcombine.high %v15270_v26, %v15270_v26 }
 0x279   : > { %6712 = vmatpush2.bf16.msra.mxu1 %v12708_v45  ;;  %v15267_v45 = vpop.permute.xlu1 %1404 }
 0x27a   : > { %6713 = vmatprep.subr.bf16.mxu1 %v13390_v3  ;;  %v2427_v16 = vpack.c.bf16 %v2077_v27, %v2077_v27  ;;  %12348 = vset.pattern.permute.xlu1 %v13392_v6 }
 0x27b   : > { %11703 = vmatpush3.bf16.msra.mxu0 %v12710_v42  ;;  %v1320_v42 = vmul.f32 %v15083_v32, %v15262_v59  ;;  %v1451_v32 = vmul.f32 %v15100_v22, %v15267_v45  ;;  %634 = vperm.xlu1 %12348, %v15317_v55  }
 0x27c   : > { %v11560_v38 = vpop.f32.mrf.mxu1  ;;  %11704 = vmatprep.subr.bf16.mxu0 %v12712_v31  ;;  %v2422_v31 = vpack.c.bf16 %v15059_v43, %v15059_v43  ;;  %12352 = vset.pattern.permute.xlu0 %v13394_v12 }
 0x27d   : > { %6714 = vmatpush2.bf16.msra.mxu1 %v12711_v49  ;;  %v12726_v49 = vld [vmem:[%s13564_s30 + $0x9f4] sm:$0xff]   ;;  %v1352_v43 = vadd.f32 %v1320_v42, %v1221_v50  ;;  %1158 = vperm.xlu0 %12352, %v15317_v55  }
 0x27e   : > { %v11561_v0 = vpop.f32.mrf.mxu1  ;;  %6715 = vmatprep.subr.bf16.mxu1 %v13390_v3 }
 0x27f   : > { %v11562_v33 = vadd.f32 %v11561_v0, %v11560_v38  ;;  %11705 = vmatpush3.bf16.msra.mxu0 %v12713_v54  ;;  %v12730_v54 = vld [vmem:[%s13564_s30 + $0xadc] sm:$0xff]   ;;  %v15285_v38 = vpop.permute.xlu1 %1535  ;;  %v1483_v1 = vadd.f32 %v1451_v32, %v1352_v43  ;;  %v12733_v0 = vld [vmem:[%s13564_s30 + $0xad4] sm:$0xff]   ;;  %12350 = vset.pattern.permute.xlu1 %v13391_v5 }
 0x280   : > { %v11563_v30 = vpop.f32.mrf.mxu1  ;;  %11706 = vmatprep.subr.bf16.mxu0 %v12715_v53  ;;  %v12729_v53 = vld [vmem:[%s13564_s30 + $0xb2c] sm:$0xff]   ;;  %v1582_v22 = vmul.f32 %v15118_v23, %v15285_v38  ;;  %v15364_v32 = vld [vmem:[%s16992_s0 + $0x38] sm:$0xf]  ;;  %896 = vperm.xlu1 %12350, %v15317_v55  }
 0x281   : > { %6716 = vmatpush2.bf16.msra.mxu1 %v12714_v15  ;;  %v15244_v62 = vadd.f32 %v11562_v33, %v15140_v51  ;;  %v12721_v51 = vld [vmem:[%s13564_s30 + $0xa3c] sm:$0xff]   ;;  %v2429_v15 = vpack.c.bf16 %v2085_v48, %v2085_v48  ;;  %v15302_v23 = vld [vmem:[%s16992_s0 + $0x14] sm:$0xf]  ;;  %v1059_v43 = vmul.f32 %v15364_v32, %v15231_v46  ;;  %12355 = vset.pattern.permute.xlu0 %v13396_v18 }
 0x282   : > { %v11564_v20 = vpop.f32.mrf.mxu1  ;;  %6717 = vmatprep.subr.bf16.mxu1 %v13390_v3  ;;  %v666_v33 = vmul.f32 %v15302_v23, %v15197_v63  ;;  %v12737_v63 = vld [vmem:[%s13564_s30 + $0xa8c] sm:$0xff]   ;;  %1551 = vperm.xlu0 %12355, %v15317_v55   ;;  %v12746_v46 = vld [vmem:[%s13564_s30 + $0xa74] sm:$0xff]  }
 0x283   : > { %11707 = vmatpush3.bf16.msra.mxu0 %v12716_v39  ;;  %v15309_v39 = vld [vmem:[%s16992_s0 + $0x8] sm:$0xf] }
 0x284   : > { %11708 = vmatprep.subr.bf16.mxu0 %v12718_v13  ;;  %v535_v30 = vmul.f32 %v15309_v39, %v15203_v58  ;;  %v1614_v13 = vadd.f32 %v1582_v22, %v1483_v1  ;;  %v15327_v58 = vld [vmem:[%s16992_s0 + $0x20] sm:$0xf]  ;;  %v15382_v1 = vld [vmem:[%s16992_s0 + $0x44] sm:$0xf]  ;;  %12351 = vset.pattern.permute.xlu1 %v13393_v11 }
 0x285   : > { %6718 = vmatpush2.bf16.msra.mxu1 %v12717_v56  ;;  %v15314_v56 = vpop.permute.xlu0 %1759  ;;  %v797_v20 = vmul.f32 %v15327_v58, %v15217_v9  ;;  %1027 = vperm.xlu1 %12351, %v15317_v55  }
 0x286   : > { %6719 = vmatprep.subr.bf16.mxu1 %v13390_v3  ;;  %12357 = vset.pattern.permute.xlu0 %v13392_v6 }
 0x287   : > { %11709 = vmatpush3.bf16.msra.mxu0 %v12719_v14  ;;  %v698_v14 = vadd.f32 %v666_v33, %v535_v30  ;;  %v12747_v33 = vld [vmem:[%s13564_s30 + $0xafc] sm:$0xff]  }
 0x288   : > { %11710 = vmatprep.subr.bf16.mxu0 %v12721_v51  ;;  %v12749_v30 = vld [vmem:[%s13564_s30 + $0xb98] sm:$0xff]  }
 0x289   : > { %6720 = vmatpush2.bf16.msra.mxu1 %v12720_v57  ;;  %v1806_v57 = vadd.f32 %v15314_v56, %v1614_v13  ;;  %12353 = vset.pattern.permute.xlu1 %v13395_v17 }
 0x28a   : > { %11720 = vmatprep.subr.bf16.mxu1 %v12723_v10  ;;  %1289 = vperm.xlu1 %12353, %v15317_v55  }
 0x28b   : > { %11711 = vmatpush3.bf16.msra.mxu0 %v12722_v41  ;;  %v15347_v50 = vmax.f32 %v1806_v57, 0.0  ;;  %v15406_v57 = vpop.permute.xlu1 %491 }
 0x28c   : > { %6722 = vmatmul.mubr.bf16.vlgmr.msra.gmra.mxu1 %v2422_v31  ;;  %11712 = vmatprep.subr.bf16.mxu0 %v12725_v7  ;;  %v829_v7 = vadd.f32 %v797_v20, %v698_v14  ;;  %v2426_v20 = vpack.c.bf16 %v15254_v35, %v15254_v35  ;;  %v12751_v14 = vld [vmem:[%s13564_s30 + $0xbd0] sm:$0xff]   ;;  %v15416_v35 = vld [vmem:[%s16992_s0 + $0x5c] sm:$0xf] }
 0x28d   : > { %11721 = vmatpush3.bf16.msra.mxu1 %v12724_v36  ;;  %7080 = vmatprep.mubr.bf16.mxu1 %v2427_v16  ;;  %v12742_v16 = vld [vmem:[%s13564_s30 + $0xabc] sm:$0xff]  }
 0x28e   : > { %11722 = vmatprep.subr.bf16.mxu1 %v12727_v19  ;;  %12354 = vset.pattern.permute.xlu1 %v13397_v24 }
 0x28f   : > { %11713 = vmatpush3.bf16.msra.mxu0 %v12726_v49  ;;  %1420 = vperm.xlu1 %12354, %v15317_v55   ;;  %v15440_v55 = vld [vmem:[%s16992_s0] sm:$0xff] }
 0x290   : > { %7088 = vmatprep.subr.bf16.mxu0 %v13390_v3 }
 0x291   : > { %11723 = vmatpush3.bf16.msra.mxu1 %v12728_v40  ;;  %v12741_v40 = vld [vmem:[%s13564_s30 + $0xb0c] sm:$0xff]  }
 0x292   : > { %7041 = vmatmul.mubr.bf16.vlgmr.msra.gmra.mxu0 %v2424_v60  ;;  %11724 = vmatprep.subr.bf16.mxu1 %v12730_v54 }
 0x293   : > { %7089 = vmatpush1.bf16.msra.mxu0 %v12729_v53  ;;  %11006 = vmatprep.mubr.msk.bf16.mxu0 %vm4207_vm0, %v2429_v15  ;;  %v15370_v53 = vrot.slane %v15347_v50, %v13821_v21  ;;  %v12745_v15 = vld [vmem:[%s13564_s30 + $0xab4] sm:$0xff]  }
 0x294   : > { %7090 = vmatprep.subr.bf16.mxu0 %v13390_v3  ;;  %12356 = vset.pattern.permute.xlu1 %v13390_v3 }
 0x295   : > { %11725 = vmatpush3.bf16.msra.mxu1 %v12731_v8  ;;  %v12744_v8 = vld [vmem:[%s13564_s30 + $0xb04] sm:$0xff]  }
 0x296   : > { %11726 = vmatprep.subr.bf16.mxu1 %v12733_v0  ;;  %v1190_v0 = vmul.f32 %v15382_v1, %v15250_v25  ;;  %v12750_v25 = vld [vmem:[%s13564_s30 + $0xaf4] sm:$0xff]  }
 0x297   : > { %7091 = vmatpush1.bf16.msra.mxu0 %v12732_v44  ;;  %v2101_v44 = vcombine.high %v15370_v53, %v15370_v53 }
 0x298   : > { %7092 = vmatprep.subr.bf16.mxu0 %v13390_v3 }
 0x299   : > { %11727 = vmatpush3.bf16.msra.mxu1 %v12734_v34  ;;  %v12748_v34 = vld [vmem:[%s13564_s30 + $0xbd8] sm:$0xff]  }
 0x29a   : > { %v5526_v51 = vpop.f32.mrf.mxu0  ;;  %11728 = vmatprep.subr.bf16.mxu1 %v12736_v28  ;;  %v15399_v28 = vld [vmem:[%s16992_s0 + $0x50] sm:$0xf] }
 0x29b   : > { %v5527_v41 = vadd.f32 %v5526_v51, %v15244_v62  ;;  %7093 = vmatpush1.bf16.msra.mxu0 %v12735_v37  ;;  %v15343_v62 = vld [vmem:[%s16992_s0 + $0x2c] sm:$0xf]  ;;  %v1321_v37 = vmul.f32 %v15399_v28, %v15262_v59  ;;  %v12753_v51 = vld [vmem:[%s13564_s30 + $0xb5c] ss:$0 sps:$4 sm:$0xff]   ;;  %v12752_v59 = vld [vmem:[%s13564_s30 + $0xb90] sm:$0xff]  }
 0x29c   : > { %v5528_v10 = vpop.f32.mrf.mxu0  ;;  %v11582_v27 = vpop.f32.mrf.mxu1  ;;  %7094 = vmatprep.subr.bf16.mxu0 %v13390_v3  ;;  %v928_v36 = vmul.f32 %v15343_v62, %v15227_v61 }
 0x29d   : > { %v10327_v9 = vsel %vm10321_vm2, %v5527_v41, 0.0  ;;  %11729 = vmatpush3.bf16.msra.mxu1 %v12737_v63  ;;  %v2431_v63 = vpack.c.bf16 %v2101_v44, %v2101_v44  ;;  %v15424_v10 = vpop.permute.xlu1 %622 }
 0x29e   : > { %v15351_v42 = vadd.f32 %v10327_v9, %v15165_v47  ;;  %v5529_v31 = vpop.f32.mrf.mxu0  ;;  %v11583_v19 = vpop.f32.mrf.mxu1  ;;  %11730 = vmatprep.subr.bf16.mxu1 %v12739_v52  ;;  %v12743_v47 = vld [vmem:[%s13564_s30 + $0xa7c] sm:$0xff]   ;;  %v960_v54 = vadd.f32 %v928_v36, %v829_v7  ;;  %v1452_v52 = vmul.f32 %v15416_v35, %v15267_v45  ;;  %v15431_v45 = vld [vmem:[%s16992_s0 + $0x68] sm:$0xf] }
 0x29f   : > { %v15355_v49 = vadd.f32 %v11583_v19, %v11582_v27  ;;  %7095 = vmatpush1.bf16.msra.mxu0 %v12738_v29  ;;  %v12754_v29 = vld [vmem:[%s13564_s30 + $0xbc8] sm:$0xff]   ;;  %v1583_v9 = vmul.f32 %v15431_v45, %v15285_v38  ;;  %v12757_v36 = vld [vmem:[%s13564_s30 + $0xbc0] sm:$0xff]   ;;  %v12756_v31 = vld [vmem:[%s13564_s30 + $0xb54] sm:$0xff]   ;;  %v536_v19 = vmul.f32 %v15440_v55, %v15406_v57 }
 0x2a0   : > { %v5530_v61 = vpop.f32.mrf.mxu0  ;;  %v11585_v48 = vpop.f32.mrf.mxu1  ;;  %7096 = vmatprep.subr.bf16.mxu0 %v13390_v3  ;;  %v1091_v22 = vadd.f32 %v1059_v43, %v960_v54  ;;  %v12755_v27 = vld [vmem:[%s13564_s30 + $0xb88] sm:$0xff]   ;;  %v12760_v43 = vld [vmem:[%s13564_s30 + $0xbb8] sm:$0xff]  }
 0x2a1   : > { %11731 = vmatpush3.bf16.msra.mxu1 %v12740_v4  ;;  %v7006_v4 = vsel %vm4211_vm1, %v12753_v51, 0  ;;  %v15447_v38 = vld [vmem:[%s16992_s0 + $0xc] sm:$0xff]  ;;  %v12758_v61 = vld [vmem:[%s13564_s30 + $0xb80] sm:$0xff]   ;;  %v15458_v54 = vpop.permute.xlu1 %884 }
 0x2a2   : > { %v11586_v60 = vpop.f32.mrf.mxu1  ;;  %11732 = vmatprep.subr.bf16.mxu1 %v12742_v16  ;;  %v1222_v13 = vadd.f32 %v1190_v0, %v1091_v22  ;;  %v667_v16 = vmul.f32 %v15447_v38, %v15424_v10  ;;  %v12761_v22 = vld [vmem:[%s13564_s30 + $0xb78] sm:$0xff]  }
 0x2a3   : > { %7097 = vmatpush1.bf16.msra.mxu0 %v12741_v40  ;;  %v15452_v40 = vpop.permute.xlu0 %753  ;;  %v12759_v60 = vld [vmem:[%s13564_s30 + $0xb4c] sm:$0xff]  }
 0x2a4   : > { %7098 = vmatprep.subr.bf16.mxu0 %v13390_v3  ;;  %v1353_v41 = vadd.f32 %v1321_v37, %v1222_v13 }
 0x2a5   : > { %11733 = vmatpush3.bf16.msra.mxu1 %v12743_v47  ;;  %v10627_v47 = vld [vmem:[%s13583_s11 + $0xc] ss:$0 sm:$0xff] }
 0x2a6   : > { %11734 = vmatprep.subr.bf16.mxu1 %v12745_v15  ;;  %v1484_v7 = vadd.f32 %v1452_v52, %v1353_v41  ;;  %1775 = vperm.xlu1 %12356, %v10627_v47   ;;  %v699_v15 = vadd.f32 %v667_v16, %v536_v19  ;;  %v12765_v41 = vld [vmem:[%s13564_s30 + $0xb3c] sm:$0xff]   ;;  %v15510_v16 = vld [vmem:[%s13578_s22 + $0xd] ss:$0 sm:$0xff] }
 0x2a7   : > { %7099 = vmatpush1.bf16.msra.mxu0 %v12744_v8  ;;  %v15464_v8 = vld [vmem:[%s16992_s0 + $0x18] sm:$0xff]  ;;  %v12769_v19 = vld [vmem:[%s13564_s30 + $0xba0] sm:$0xff]   ;;  %638 = vperm.xlu0 %12357, %v15510_v16  }
 0x2a8   : > { %7100 = vmatprep.subr.bf16.mxu0 %v13390_v3  ;;  %v1615_v48 = vadd.f32 %v1583_v9, %v1484_v7 }
 0x2a9   : > { %11735 = vmatpush3.bf16.msra.mxu1 %v12746_v46  ;;  %v798_v46 = vmul.f32 %v15464_v8, %v15452_v40 }
 0x2aa   : > { %11742 = vmatprep.subr.bf16.mxu1 %v12748_v34  ;;  %v1807_v0 = vadd.f32 %v15314_v56, %v1615_v48  ;;  %v12763_v34 = vld [vmem:[%s13564_s30 + $0xbb0] sm:$0xff]   ;;  %507 = vperm.xlu1 %12356, %v15510_v16  }
 0x2ab   : > { %7101 = vmatpush1.bf16.msra.mxu0 %v12747_v33  ;;  %v12762_v33 = vld [vmem:[%s13564_s30 + $0xb44] sm:$0xff]   ;;  %v830_v37 = vadd.f32 %v798_v46, %v699_v15  ;;  %v12768_v48 = vld [vmem:[%s13564_s30 + $0xb34] sm:$0xff]   ;;  %12360 = vset.pattern.permute.xlu0 %v13393_v11 }
 0x2ac   : > { %7081 = vmatmul.mubr.bf16.vlgmr.msra.gmra.mxu1 %v2426_v20  ;;  %7102 = vmatprep.subr.bf16.mxu0 %v13390_v3  ;;  %v12771_v46 = vld [vmem:[%s13564_s30 + $0xc58] sm:$0xff]  }
 0x2ad   : > { %11743 = vmatpush3.bf16.msra.mxu1 %v12749_v30  ;;  %7439 = vmatprep.mubr.bf16.mxu1 %v2431_v63  ;;  %v2086_v30 = vcombine.high %v15347_v50, %v15347_v50  ;;  %v15483_v63 = vpop.permute.xlu1 %1015  ;;  %v1839_v50 = vmax.f32 %v1807_v0, 0.0  ;;  %v12770_v0 = vld [vmem:[%s13564_s30 + $0xb60] sm:$0xff]  }
 0x2ae   : > { %11744 = vmatprep.subr.bf16.mxu1 %v12751_v14  ;;  %v12764_v14 = vld [vmem:[%s13564_s30 + $0xb70] sm:$0xff]   ;;  %12358 = vset.pattern.permute.xlu1 %v13389_v2 }
 0x2af   : > { %7103 = vmatpush1.bf16.msra.mxu0 %v12750_v25  ;;  %v15478_v25 = vld [vmem:[%s16992_s0 + $0x24] sm:$0xff]  ;;  %v15488_v52 = vrot.slane %v2086_v30, %v13821_v21  ;;  %769 = vperm.xlu1 %12358, %v15510_v16  }
 0x2b0   : > { %7108 = vmatprep.subr.bf16.mxu0 %v13390_v3  ;;  %v929_v13 = vmul.f32 %v15478_v25, %v15458_v54  ;;  %1031 = vperm.xlu0 %12360, %v15510_v16  }
 0x2b1   : > { %11745 = vmatpush3.bf16.msra.mxu1 %v12752_v59  ;;  %v12766_v59 = vld [vmem:[%s13564_s30 + $0xba8] sm:$0xff]   ;;  %v2102_v47 = vcombine.high %v15488_v52, %v15488_v52 }
 0x2b2   : > { %11746 = vmatprep.subr.bf16.mxu1 %v12754_v29 }
 0x2b3   : > { %7109 = vmatpush2.bf16.msra.mxu0 %v7006_v4  ;;  %v961_v4 = vadd.f32 %v929_v13, %v830_v37  ;;  %v2430_v37 = vpack.c.bf16 %v15370_v53, %v15370_v53  ;;  %v12775_v53 = vld [vmem:[%s13564_s30 + $0xc10] sm:$0xff]   ;;  %12359 = vset.pattern.permute.xlu1 %v13391_v5 }
 0x2b4   : > { %7110 = vmatprep.subr.bf16.mxu0 %v13390_v3  ;;  %900 = vperm.xlu1 %12359, %v15510_v16  }
 0x2b5   : > { %11747 = vmatpush3.bf16.msra.mxu1 %v12755_v27  ;;  %v15497_v27 = vld [vmem:[%s16992_s0 + $0x30] sm:$0xff]  ;;  %12363 = vset.pattern.permute.xlu0 %v13397_v24 }
 0x2b6   : > { %11748 = vmatprep.subr.bf16.mxu1 %v12757_v36  ;;  %v1060_v9 = vmul.f32 %v15497_v27, %v15483_v63  ;;  %v12767_v36 = vld [vmem:[%s13564_s30 + $0xb68] sm:$0xff]   ;;  %1424 = vperm.xlu0 %12363, %v15510_v16  }
 0x2b7   : > { %7111 = vmatpush2.bf16.msra.mxu0 %v12756_v31  ;;  %v15503_v31 = vpop.permute.xlu0 %1146 }
 0x2b8   : > { %7112 = vmatprep.subr.bf16.mxu0 %v13390_v3  ;;  %12361 = vset.pattern.permute.xlu1 %v13394_v12 }
 0x2b9   : > { %11749 = vmatpush3.bf16.msra.mxu1 %v12758_v61  ;;  %v15512_v61 = vpop.permute.xlu1 %1277  ;;  %1162 = vperm.xlu1 %12361, %v15510_v16  }
 0x2ba   : > { %v11604_v44 = vpop.f32.mrf.mxu0  ;;  %11750 = vmatprep.subr.bf16.mxu1 %v12760_v43  ;;  %v1092_v43 = vadd.f32 %v1060_v9, %v961_v4  ;;  %v12777_v4 = vld [vmem:[%s13564_s30 + $0xc48] sm:$0xff]   ;;  %12366 = vset.pattern.permute.xlu0 %v13390_v3 }
 0x2bb   : > { %7113 = vmatpush2.bf16.msra.mxu0 %v12759_v60  ;;  %v15521_v60 = vld [vmem:[%s16992_s0 + $0x3c] sm:$0xff]  ;;  %v15561_v9 = vpop.permute.xlu0 %1539 }
 0x2bc   : > { %v11605_v56 = vpop.f32.mrf.mxu0  ;;  %7114 = vmatprep.subr.bf16.mxu0 %v13390_v3  ;;  %v1191_v15 = vmul.f32 %v15521_v60, %v15503_v31 }
 0x2bd   : > { %v11606_v20 = vadd.f32 %v11605_v56, %v11604_v44  ;;  %11751 = vmatpush3.bf16.msra.mxu1 %v12761_v22  ;;  %v12772_v44 = vld [vmem:[%s13564_s30 + $0xc18] sm:$0xff]   ;;  %v2428_v56 = vpack.c.bf16 %v15270_v26, %v15270_v26  ;;  %12362 = vset.pattern.permute.xlu1 %v13395_v17 }
 0x2be   : > { %v11607_v51 = vpop.f32.mrf.mxu0  ;;  %11752 = vmatprep.subr.bf16.mxu1 %v12763_v34  ;;  %v2433_v34 = vpack.c.bf16 %v2102_v47, %v2102_v47  ;;  %v1223_v13 = vadd.f32 %v1191_v15, %v1092_v43  ;;  %v12780_v43 = vld [vmem:[%s13564_s30 + $0xc40] sm:$0xff]   ;;  %v12779_v15 = vld [vmem:[%s13564_s30 + $0xc88] sm:$0xff]   ;;  %1293 = vperm.xlu1 %12362, %v15510_v16  }
 0x2bf   : > { %7115 = vmatpush2.bf16.msra.mxu0 %v12762_v33  ;;  %v15492_v29 = vadd.f32 %v11606_v20, %v15355_v49  ;;  %v15506_v49 = vrot.slane %v1839_v50, %v13821_v21  ;;  %v15536_v33 = vld [vmem:[%s16992_s0 + $0x48] sm:$0xff]  ;;  %v12774_v20 = vld [vmem:[%s13564_s30 + $0xc50] sm:$0xff]   ;;  %v12773_v51 = vld [vmem:[%s13564_s30 + $0xc98] sm:$0xff]  }
 0x2c0   : > { %v11608_v7 = vpop.f32.mrf.mxu0  ;;  %7116 = vmatprep.subr.bf16.mxu0 %v13390_v3  ;;  %v1322_v30 = vmul.f32 %v15536_v33, %v15512_v61 }
 0x2c1   : > { %11753 = vmatpush3.bf16.msra.mxu1 %v12764_v14  ;;  %v2110_v22 = vcombine.high %v15506_v49, %v15506_v49  ;;  %v15546_v14 = vpop.permute.xlu1 %1408  ;;  %v12776_v7 = vld [vmem:[%s13564_s30 + $0xc90] sm:$0xff]  }
 0x2c2   : > { %11754 = vmatprep.subr.bf16.mxu1 %v12766_v59  ;;  %v1354_v26 = vadd.f32 %v1322_v30, %v1223_v13  ;;  %v15556_v59 = vld [vmem:[%s16992_s0 + $0x54] sm:$0xff]  ;;  %v537_v13 = vmul.f32 %v15309_v39, %v15406_v57  ;;  %12364 = vset.pattern.permute.xlu1 %v13396_v18 }
 0x2c3   : > { %7117 = vmatpush2.bf16.msra.mxu0 %v12765_v41  ;;  %v2435_v50 = vpack.c.bf16 %v2110_v22, %v2110_v22  ;;  %v1453_v41 = vmul.f32 %v15556_v59, %v15546_v14  ;;  %v12786_v57 = vld [vmem:[%s13564_s30 + $0xc30] sm:$0xff]   ;;  %1555 = vperm.xlu1 %12364, %v15510_v16   ;;  %v12793_v16 = vld [vmem:[%s13564_s30 + $0xbe0] sm:$0xff]  }
 0x2c4   : > { %7118 = vmatprep.subr.bf16.mxu0 %v13390_v3 }
 0x2c5   : > { %11755 = vmatpush3.bf16.msra.mxu1 %v12767_v36  ;;  %v12778_v36 = vld [vmem:[%s13564_s30 + $0xc08] sm:$0xff]  }
 0x2c6   : > { %11756 = vmatprep.subr.bf16.mxu1 %v12769_v19  ;;  %v1485_v19 = vadd.f32 %v1453_v41, %v1354_v26  ;;  %v799_v26 = vmul.f32 %v15327_v58, %v15452_v40  ;;  %v930_v58 = vmul.f32 %v15343_v62, %v15458_v54  ;;  %v12788_v40 = vld [vmem:[%s13564_s30 + $0xc70] sm:$0xff]   ;;  %v10628_v54 = vld [vmem:[%s13583_s11 + $0xd] ss:$0 sm:$0xff] }
 0x2c7   : > { %7119 = vmatpush2.bf16.msra.mxu0 %v12768_v48  ;;  %v15571_v48 = vld [vmem:[%s16992_s0 + $0x60] sm:$0xff]  ;;  %12365 = vset.pattern.permute.xlu1 %v13390_v3 }
 0x2c8   : > { %11764 = vmatprep.subr.bf16.mxu0 %v12771_v46  ;;  %v1584_v47 = vmul.f32 %v15571_v48, %v15561_v9  ;;  %v12781_v46 = vld [vmem:[%s13564_s30 + $0xc00] sm:$0xff]   ;;  %1779 = vperm.xlu1 %12365, %v10628_v54  }
 0x2c9   : > { %11757 = vmatpush3.bf16.msra.mxu1 %v12770_v0 }
 0x2ca   : > { %7121 = vmatmul.mubr.bf16.vlgmr.msra.gmra.mxu0 %v2428_v56  ;;  %7487 = vmatprep.subr.bf16.mxu1 %v13390_v3  ;;  %v1616_v22 = vadd.f32 %v1584_v47, %v1485_v19  ;;  %v668_v56 = vmul.f32 %v15302_v23, %v15424_v10  ;;  %v12785_v10 = vld [vmem:[%s13564_s30 + $0xc78] sm:$0xff]   ;;  %v12789_v19 = vld [vmem:[%s13564_s30 + $0xc28] sm:$0xff]  }
 0x2cb   : > { %11765 = vmatpush3.bf16.msra.mxu0 %v12772_v44  ;;  %7479 = vmatprep.mubr.bf16.mxu0 %v2433_v34  ;;  %v12783_v44 = vld [vmem:[%s13564_s30 + $0xc38] sm:$0xff]   ;;  %v15584_v34 = vpop.permute.xlu1 %1763 }
 0x2cc   : > { %7440 = vmatmul.mubr.bf16.vlgmr.msra.gmra.mxu1 %v2430_v37  ;;  %11766 = vmatprep.subr.bf16.mxu0 %v12774_v20  ;;  %v12782_v37 = vld [vmem:[%s13564_s30 + $0xc80] sm:$0xff]   ;;  %v700_v23 = vadd.f32 %v668_v56, %v537_v13  ;;  %v12791_v13 = vld [vmem:[%s13564_s30 + $0xc68] sm:$0xff]  }
 0x2cd   : > { %7488 = vmatpush1.bf16.msra.mxu1 %v12773_v51  ;;  %11053 = vmatprep.mubr.msk.bf16.mxu1 %vm4207_vm0, %v2435_v50  ;;  %v12784_v51 = vld [vmem:[%s13564_s30 + $0xbf8] sm:$0xff]  }
 0x2ce   : > { %7489 = vmatprep.subr.bf16.mxu1 %v13390_v3  ;;  %12367 = vset.pattern.permute.xlu1 %v13392_v6 }
 0x2cf   : > { %11767 = vmatpush3.bf16.msra.mxu0 %v12775_v53 }
 0x2d0   : > { %11768 = vmatprep.subr.bf16.mxu0 %v12777_v4 }
 0x2d1   : > { %7490 = vmatpush1.bf16.msra.mxu1 %v12776_v7 }
 0x2d2   : > { %7491 = vmatprep.subr.bf16.mxu1 %v13390_v3 }
 0x2d3   : > { %11769 = vmatpush3.bf16.msra.mxu0 %v12778_v36 }
 0x2d4   : > { %v5925_v0 = vpop.f32.mrf.mxu1  ;;  %11770 = vmatprep.subr.bf16.mxu0 %v12780_v43  ;;  %v831_v43 = vadd.f32 %v799_v26, %v700_v23  ;;  %v15646_v23 = vpop.permute.xlu1 %495  ;;  %v12799_v26 = vld [vmem:[%s13564_s30 + $0xcfc] sm:$0xff]  }
 0x2d5   : > { %v5926_v30 = vadd.f32 %v5925_v0, %v15492_v29  ;;  %7492 = vmatpush1.bf16.msra.mxu1 %v12779_v15  ;;  %v1808_v29 = vadd.f32 %v15584_v34, %v1616_v22  ;;  %v12792_v22 = vld [vmem:[%s13564_s30 + $0xc20] sm:$0xff]  }
 0x2d6   : > { %v5927_v20 = vpop.f32.mrf.mxu1  ;;  %7493 = vmatprep.subr.bf16.mxu1 %v13390_v3 }
 0x2d7   : > { %v10329_v50 = vsel %vm10321_vm2, %v5926_v30, 0.0  ;;  %11771 = vmatpush3.bf16.msra.mxu0 %v12781_v46  ;;  %v15609_v7 = vmax.f32 %v1808_v29, 0.0  ;;  %v12790_v46 = vld [vmem:[%s13564_s30 + $0xbe8] sm:$0xff]   ;;  %v1061_v30 = vmul.f32 %v15364_v32, %v15483_v63  ;;  %v1192_v32 = vmul.f32 %v15382_v1, %v15503_v31 }
 0x2d8   : > { %v15599_v53 = vadd.f32 %v10329_v50, %v15351_v42  ;;  %v5928_v39 = vpop.f32.mrf.mxu1  ;;  %11772 = vmatprep.subr.bf16.mxu0 %v12783_v44  ;;  %v12787_v42 = vld [vmem:[%s13564_s30 + $0xbf0] sm:$0xff]   ;;  %v962_v44 = vadd.f32 %v930_v58, %v831_v43  ;;  %v12795_v20 = vld [vmem:[%s13564_s30 + $0xd44] sm:$0xff]   ;;  %v1323_v1 = vmul.f32 %v15399_v28, %v15512_v61  ;;  %v1454_v28 = vmul.f32 %v15416_v35, %v15546_v14  ;;  %v12803_v43 = vld [vmem:[%s13564_s30 + $0xcb8] sm:$0xff]  }
 0x2d9   : > { %7494 = vmatpush1.bf16.msra.mxu1 %v12782_v37  ;;  %v15624_v0 = vrot.slane %v15609_v7, %v13821_v21  ;;  %v12794_v37 = vld [vmem:[%s13564_s30 + $0xc60] sm:$0xff]   ;;  %v12797_v63 = vld [vmem:[%s13564_s30 + $0xcc8] ss:$0 sps:$4 sm:$0xff]   ;;  %v2432_v39 = vpack.c.bf16 %v15488_v52, %v15488_v52  ;;  %v12801_v52 = vld [vmem:[%s13564_s30 + $0xd34] sm:$0xff]   ;;  %v1585_v14 = vmul.f32 %v15431_v45, %v15561_v9 }
 0x2da   : > { %v5929_v41 = vpop.f32.mrf.mxu1  ;;  %v11626_v4 = vpop.f32.mrf.mxu0  ;;  %7495 = vmatprep.subr.bf16.mxu1 %v13390_v3  ;;  %v1093_v50 = vadd.f32 %v1061_v30, %v962_v44  ;;  %v12800_v61 = vld [vmem:[%s13564_s30 + $0xcc0] sm:$0xff]   ;;  %v12806_v45 = vld [vmem:[%s13564_s30 + $0xcb0] sm:$0xff]   ;;  %v2111_v44 = vcombine.high %v15609_v7, %v15609_v7 }
 0x2db   : > { %11773 = vmatpush3.bf16.msra.mxu0 %v12784_v51  ;;  %v2126_v56 = vcombine.high %v15624_v0, %v15624_v0  ;;  %v12796_v51 = vld [vmem:[%s13564_s30 + $0xd04] sm:$0xff]   ;;  %v15654_v41 = vpop.permute.xlu0 %626 }
 0x2dc   : > { %v11627_v36 = vpop.f32.mrf.mxu0  ;;  %11774 = vmatprep.subr.bf16.mxu0 %v12786_v57  ;;  %v12798_v57 = vld [vmem:[%s13564_s30 + $0xd3c] sm:$0xff]   ;;  %v1224_v31 = vadd.f32 %v1192_v32, %v1093_v50  ;;  %v669_v58 = vmul.f32 %v15447_v38, %v15654_v41  ;;  %v12807_v38 = vld [vmem:[%s13564_s30 + $0xd24] sm:$0xff]  }
 0x2dd   : > { %v15612_v47 = vadd.f32 %v11627_v36, %v11626_v4  ;;  %7496 = vmatpush1.bf16.msra.mxu1 %v12785_v10  ;;  %v2437_v29 = vpack.c.bf16 %v2126_v56, %v2126_v56  ;;  %v7405_v10 = vsel %vm4211_vm1, %v12797_v63, 0  ;;  %v12802_v36 = vld [vmem:[%s13564_s30 + $0xcf4] sm:$0xff]   ;;  %v12810_v56 = vld [vmem:[%s13564_s30 + $0xd1c] sm:$0xff]   ;;  %v12809_v32 = vld [vmem:[%s13564_s30 + $0xca8] sm:$0xff]  }
 0x2de   : > { %v11629_v15 = vpop.f32.mrf.mxu0  ;;  %7497 = vmatprep.subr.bf16.mxu1 %v13390_v3  ;;  %v1355_v4 = vadd.f32 %v1323_v1, %v1224_v31  ;;  %v12812_v1 = vld [vmem:[%s13564_s30 + $0xca0] sm:$0xff]  }
 0x2df   : > { %11775 = vmatpush3.bf16.msra.mxu0 %v12787_v42  ;;  %v15660_v42 = vpop.permute.xlu1 %757  ;;  %v12805_v15 = vld [vmem:[%s13564_s30 + $0xcec] sm:$0xff]   ;;  %v12815_v31 = vld [vmem:[%s13564_s30 + $0xdc4] sm:$0xff]  }
 0x2e0   : > { %v11630_v62 = vpop.f32.mrf.mxu0  ;;  %11776 = vmatprep.subr.bf16.mxu0 %v12789_v19  ;;  %v538_v19 = vmul.f32 %v15440_v55, %v15646_v23  ;;  %v1486_v35 = vadd.f32 %v1454_v28, %v1355_v4  ;;  %v800_v55 = vmul.f32 %v15464_v8, %v15660_v42  ;;  %v12808_v8 = vld [vmem:[%s13564_s30 + $0xce4] sm:$0xff]   ;;  %v12817_v4 = vld [vmem:[%s13564_s30 + $0xd0c] sm:$0xff]  }
 0x2e1   : > { %7498 = vmatpush1.bf16.msra.mxu1 %v12788_v40  ;;  %v12804_v40 = vld [vmem:[%s13564_s30 + $0xd2c] sm:$0xff]  }
 0x2e2   : > { %7499 = vmatprep.subr.bf16.mxu1 %v13390_v3  ;;  %v1617_v54 = vadd.f32 %v1585_v14, %v1486_v35 }
 0x2e3   : > { %11777 = vmatpush3.bf16.msra.mxu0 %v12790_v46  ;;  %v701_v46 = vadd.f32 %v669_v58, %v538_v19  ;;  %v15676_v62 = vpop.permute.xlu1 %888  ;;  %v2434_v19 = vpack.c.bf16 %v15506_v49, %v15506_v49  ;;  %v12820_v49 = vld [vmem:[%s13564_s30 + $0xd7c] sm:$0xff]  }
 0x2e4   : > { %11778 = vmatprep.subr.bf16.mxu0 %v12792_v22  ;;  %v1809_v50 = vadd.f32 %v15584_v34, %v1617_v54 }
 0x2e5   : > { %7500 = vmatpush1.bf16.msra.mxu1 %v12791_v13  ;;  %v832_v13 = vadd.f32 %v800_v55, %v701_v46  ;;  %v12822_v55 = vld [vmem:[%s13564_s30 + $0xdb4] sm:$0xff]  }
 0x2e6   : > { %7501 = vmatprep.subr.bf16.mxu1 %v13390_v3 }
 0x2e7   : > { %11779 = vmatpush3.bf16.msra.mxu0 %v12793_v16  ;;  %v931_v16 = vmul.f32 %v15478_v25, %v15676_v62  ;;  %v15694_v25 = vpop.permute.xlu1 %1150 }
 0x2e8   : > { %11786 = vmatprep.subr.bf16.mxu0 %v12795_v20  ;;  %v15686_v20 = vpop.permute.xlu0 %1019 }
 0x2e9   : > { %7502 = vmatpush1.bf16.msra.mxu1 %v12794_v37  ;;  %v963_v34 = vadd.f32 %v931_v16, %v832_v13  ;;  %v15749_v13 = vld [vmem:[%s16992_s0 + $0x8] sm:$0xf] }
 0x2ea   : > { %7480 = vmatmul.mubr.bf16.vlgmr.msra.gmra.mxu0 %v2432_v39  ;;  %7507 = vmatprep.subr.bf16.mxu1 %v13390_v3  ;;  %v1062_v39 = vmul.f32 %v15497_v27, %v15686_v20  ;;  %v539_v16 = vmul.f32 %v15749_v13, %v15646_v23  ;;  %v15766_v23 = vld [vmem:[%s13578_s22 + $0xe] ss:$0 sm:$0xff] }
 0x2eb   : > { %11787 = vmatpush3.bf16.msra.mxu0 %v12796_v51  ;;  %7838 = vmatprep.mubr.bf16.mxu0 %v2437_v29  ;;  %v15697_v51 = vrot.slane %v2111_v44, %v13821_v21  ;;  %v12811_v29 = vld [vmem:[%s13564_s30 + $0xcdc] sm:$0xff]   ;;  %v15712_v28 = vpop.permute.xlu1 %1281  ;;  %v12825_v44 = vld [vmem:[%s13564_s30 + $0xdac] sm:$0xff]  }
 0x2ec   : > { %11788 = vmatprep.subr.bf16.mxu0 %v12798_v57  ;;  %v12813_v57 = vld [vmem:[%s13564_s30 + $0xd14] sm:$0xff]   ;;  %v1094_v27 = vadd.f32 %v1062_v39, %v963_v34  ;;  %v1324_v14 = vmul.f32 %v15536_v33, %v15712_v28  ;;  %642 = vperm.xlu1 %12367, %v15766_v23  }
 0x2ed   : > { %7508 = vmatpush2.bf16.msra.mxu1 %v7405_v10  ;;  %v12814_v10 = vld [vmem:[%s13564_s30 + $0xcd4] sm:$0xff]   ;;  %511 = vperm.xlu0 %12366, %v15766_v23  }
 0x2ee   : > { %7509 = vmatprep.subr.bf16.mxu1 %v13390_v3 }
 0x2ef   : > { %11789 = vmatpush3.bf16.msra.mxu0 %v12799_v26  ;;  %v1193_v26 = vmul.f32 %v15521_v60, %v15694_v25  ;;  %v12819_v60 = vld [vmem:[%s13564_s30 + $0xdbc] sm:$0xff]   ;;  %v15736_v54 = vpop.permute.xlu1 %1543 }
 0x2f0   : > { %11790 = vmatprep.subr.bf16.mxu0 %v12801_v52  ;;  %v2127_v52 = vcombine.high %v15697_v51, %v15697_v51  ;;  %12368 = vset.pattern.permute.xlu1 %v13389_v2 }
 0x2f1   : > { %7510 = vmatpush2.bf16.msra.mxu1 %v12800_v61  ;;  %v1225_v35 = vadd.f32 %v1193_v26, %v1094_v27  ;;  %773 = vperm.xlu1 %12368, %v15766_v23  }
 0x2f2   : > { %7511 = vmatprep.subr.bf16.mxu1 %v13390_v3  ;;  %v2439_v58 = vpack.c.bf16 %v2127_v52, %v2127_v52  ;;  %12369 = vset.pattern.permute.xlu0 %v13391_v5 }
 0x2f3   : > { %11791 = vmatpush3.bf16.msra.mxu0 %v12802_v36  ;;  %v12816_v36 = vld [vmem:[%s13564_s30 + $0xd84] sm:$0xff]   ;;  %v1356_v46 = vadd.f32 %v1324_v14, %v1225_v35  ;;  %904 = vperm.xlu0 %12369, %v15766_v23  }
 0x2f4   : > { %v11648_v22 = vpop.f32.mrf.mxu1  ;;  %11792 = vmatprep.subr.bf16.mxu0 %v12804_v40  ;;  %v12818_v40 = vld [vmem:[%s13564_s30 + $0xccc] sm:$0xff]  }
 0x2f5   : > { %7512 = vmatpush2.bf16.msra.mxu1 %v12803_v43  ;;  %v15724_v43 = vpop.permute.xlu0 %1412  ;;  %12370 = vset.pattern.permute.xlu1 %v13393_v11 }
 0x2f6   : > { %v11649_v9 = vpop.f32.mrf.mxu1  ;;  %7513 = vmatprep.subr.bf16.mxu1 %v13390_v3  ;;  %v1455_v33 = vmul.f32 %v15556_v59, %v15724_v43  ;;  %1035 = vperm.xlu1 %12370, %v15766_v23  }
 0x2f7   : > { %v11650_v30 = vadd.f32 %v11649_v9, %v11648_v22  ;;  %11793 = vmatpush3.bf16.msra.mxu0 %v12805_v15  ;;  %v12821_v22 = vld [vmem:[%s13564_s30 + $0xe04] sm:$0xff]   ;;  %v12823_v9 = vld [vmem:[%s13564_s30 + $0xd74] sm:$0xff]   ;;  %12372 = vset.pattern.permute.xlu0 %v13395_v17 }
 0x2f8   : > { %v11651_v37 = vpop.f32.mrf.mxu1  ;;  %11794 = vmatprep.subr.bf16.mxu0 %v12807_v38  ;;  %v2436_v38 = vpack.c.bf16 %v15624_v0, %v15624_v0  ;;  %v1487_v59 = vadd.f32 %v1455_v33, %v1356_v46  ;;  %v1586_v0 = vmul.f32 %v15571_v48, %v15736_v54  ;;  %v15810_v46 = vld [vmem:[%s16992_s0 + $0x38] sm:$0xf]  ;;  %1297 = vperm.xlu0 %12372, %v15766_v23  }
 0x2f9   : > { %7514 = vmatpush2.bf16.msra.mxu1 %v12806_v45  ;;  %v15691_v7 = vadd.f32 %v11650_v30, %v15612_v47  ;;  %v1841_v47 = vmax.f32 %v1809_v50, 0.0  ;;  %v12824_v30 = vld [vmem:[%s13564_s30 + $0xdfc] sm:$0xff]   ;;  %v15756_v37 = vld [vmem:[%s16992_s0 + $0x14] sm:$0xf] }
 0x2fa   : > { %v11652_v63 = vpop.f32.mrf.mxu1  ;;  %7515 = vmatprep.subr.bf16.mxu1 %v13390_v3  ;;  %v670_v48 = vmul.f32 %v15756_v37, %v15654_v41  ;;  %v1618_v50 = vadd.f32 %v1586_v0, %v1487_v59  ;;  %v15773_v41 = vld [vmem:[%s16992_s0 + $0x20] sm:$0xf]  ;;  %12371 = vset.pattern.permute.xlu1 %v13394_v12 }
 0x2fb   : > { %11795 = vmatpush3.bf16.msra.mxu0 %v12808_v8  ;;  %v15715_v61 = vrot.slane %v1841_v47, %v13821_v21  ;;  %v12826_v8 = vld [vmem:[%s13564_s30 + $0xd6c] sm:$0xff]   ;;  %v15762_v63 = vpop.permute.xlu1 %1767  ;;  %v801_v34 = vmul.f32 %v15773_v41, %v15660_v42  ;;  %v12831_v47 = vld [vmem:[%s13564_s30 + $0xd9c] sm:$0xff]   ;;  %1166 = vperm.xlu1 %12371, %v15766_v23  }
 0x2fc   : > { %11796 = vmatprep.subr.bf16.mxu0 %v12810_v56  ;;  %v12828_v56 = vld [vmem:[%s13564_s30 + $0xda4] sm:$0xff]   ;;  %v702_v39 = vadd.f32 %v670_v48, %v539_v16  ;;  %v12832_v42 = vld [vmem:[%s13564_s30 + $0xd5c] sm:$0xff]   ;;  %v12841_v48 = vld [vmem:[%s13564_s30 + $0xe70] sm:$0xff]   ;;  %12375 = vset.pattern.permute.xlu0 %v13390_v3 }
 0x2fd   : > { %7516 = vmatpush2.bf16.msra.mxu1 %v12809_v32  ;;  %v2135_v15 = vcombine.high %v15715_v61, %v15715_v61  ;;  %v12827_v32 = vld [vmem:[%s13564_s30 + $0xdf4] sm:$0xff]  }
 0x2fe   : > { %7517 = vmatprep.subr.bf16.mxu1 %v13390_v3 }
 0x2ff   : > { %11797 = vmatpush3.bf16.msra.mxu0 %v12811_v29  ;;  %v2441_v45 = vpack.c.bf16 %v2135_v15, %v2135_v15  ;;  %v12829_v29 = vld [vmem:[%s13564_s30 + $0xd64] sm:$0xff]   ;;  %12373 = vset.pattern.permute.xlu1 %v13397_v24 }
 0x300   : > { %11798 = vmatprep.subr.bf16.mxu0 %v12813_v57  ;;  %v12833_v15 = vld [vmem:[%s13564_s30 + $0xde4] sm:$0xff]   ;;  %1428 = vperm.xlu1 %12373, %v15766_v23  }
 0x301   : > { %7518 = vmatpush2.bf16.msra.mxu1 %v12812_v1  ;;  %v1810_v1 = vadd.f32 %v15762_v63, %v1618_v50 }
 0x302   : > { %11808 = vmatprep.subr.bf16.mxu1 %v12815_v31 }
 0x303   : > { %11799 = vmatpush3.bf16.msra.mxu0 %v12814_v10  ;;  %v12830_v10 = vld [vmem:[%s13564_s30 + $0xdec] sm:$0xff]   ;;  %v15798_v35 = vmax.f32 %v1810_v1, 0.0 }
 0x304   : > { %7520 = vmatmul.mubr.bf16.vlgmr.msra.gmra.mxu1 %v2434_v19  ;;  %11800 = vmatprep.subr.bf16.mxu0 %v12817_v4  ;;  %v833_v4 = vadd.f32 %v801_v34, %v702_v39  ;;  %v12842_v39 = vld [vmem:[%s13564_s30 + $0xdcc] sm:$0xff]  }
 0x305   : > { %11809 = vmatpush3.bf16.msra.mxu1 %v12816_v36  ;;  %7878 = vmatprep.mubr.bf16.mxu1 %v2439_v58  ;;  %v15789_v36 = vld [vmem:[%s16992_s0 + $0x2c] sm:$0xf] }
 0x306   : > { %11810 = vmatprep.subr.bf16.mxu1 %v12819_v60  ;;  %12374 = vset.pattern.permute.xlu1 %v13396_v18 }
 0x307   : > { %11801 = vmatpush3.bf16.msra.mxu0 %v12818_v40  ;;  %v12834_v40 = vld [vmem:[%s13564_s30 + $0xd94] sm:$0xff]   ;;  %1559 = vperm.xlu1 %12374, %v15766_v23  }
 0x308   : > { %7886 = vmatprep.subr.bf16.mxu0 %v13390_v3 }
 0x309   : > { %11811 = vmatpush3.bf16.msra.mxu1 %v12820_v49  ;;  %v12835_v49 = vld [vmem:[%s13564_s30 + $0xd54] sm:$0xff]  }
 0x30a   : > { %7839 = vmatmul.mubr.bf16.vlgmr.msra.gmra.mxu0 %v2436_v38  ;;  %11812 = vmatprep.subr.bf16.mxu1 %v12822_v55  ;;  %v12837_v38 = vld [vmem:[%s13564_s30 + $0xd8c] sm:$0xff]  }
 0x30b   : > { %7887 = vmatpush1.bf16.msra.mxu0 %v12821_v22  ;;  %11100 = vmatprep.mubr.msk.bf16.mxu0 %vm4207_vm0, %v2441_v45  ;;  %v1063_v22 = vmul.f32 %v15810_v46, %v15686_v20  ;;  %v15818_v45 = vrot.slane %v15798_v35, %v13821_v21  ;;  %v12838_v20 = vld [vmem:[%s13564_s30 + $0xd4c] sm:$0xff]  }
 0x30c   : > { %7888 = vmatprep.subr.bf16.mxu0 %v13390_v3  ;;  %12376 = vset.pattern.permute.xlu1 %v13390_v3 }
 0x30d   : > { %11813 = vmatpush3.bf16.msra.mxu1 %v12823_v9  ;;  %v12836_v9 = vld [vmem:[%s13564_s30 + $0xddc] sm:$0xff]   ;;  %v2151_v16 = vcombine.high %v15818_v45, %v15818_v45 }
 0x30e   : > { %11814 = vmatprep.subr.bf16.mxu1 %v12825_v44  ;;  %v15829_v44 = vld [vmem:[%s16992_s0 + $0x44] sm:$0xf] }
 0x30f   : > { %7889 = vmatpush1.bf16.msra.mxu0 %v12824_v30  ;;  %v1194_v59 = vmul.f32 %v15829_v44, %v15694_v25  ;;  %v12840_v30 = vld [vmem:[%s13564_s30 + $0xeb0] sm:$0xff]   ;;  %v2443_v34 = vpack.c.bf16 %v2151_v16, %v2151_v16 }
 0x310   : > { %7890 = vmatprep.subr.bf16.mxu0 %v13390_v3 }
 0x311   : > { %11815 = vmatpush3.bf16.msra.mxu1 %v12826_v8  ;;  %v12839_v8 = vld [vmem:[%s13564_s30 + $0xdd4] sm:$0xff]  }
 0x312   : > { %v6324_v57 = vpop.f32.mrf.mxu0  ;;  %11816 = vmatprep.subr.bf16.mxu1 %v12828_v56  ;;  %v15845_v56 = vld [vmem:[%s16992_s0 + $0x50] sm:$0xf] }
 0x313   : > { %v6325_v31 = vadd.f32 %v6324_v57, %v15691_v7  ;;  %7891 = vmatpush1.bf16.msra.mxu0 %v12827_v32  ;;  %v932_v7 = vmul.f32 %v15789_v36, %v15676_v62  ;;  %v1325_v50 = vmul.f32 %v15845_v56, %v15712_v28  ;;  %v2438_v32 = vpack.c.bf16 %v15697_v51, %v15697_v51  ;;  %v12845_v57 = vld [vmem:[%s13564_s30 + $0xe34] ss:$0 sps:$4 sm:$0xff]   ;;  %v15859_v51 = vld [vmem:[%s16992_s0 + $0x5c] sm:$0xf] }
 0x314   : > { %v6326_v26 = vpop.f32.mrf.mxu0  ;;  %7892 = vmatprep.subr.bf16.mxu0 %v13390_v3  ;;  %v11670_v52 = vpop.f32.mrf.mxu1  ;;  %v1456_v28 = vmul.f32 %v15859_v51, %v15724_v43  ;;  %v12849_v43 = vld [vmem:[%s13564_s30 + $0xe98] sm:$0xff]  }
 0x315   : > { %v10331_v27 = vsel %vm10321_vm2, %v6325_v31, 0.0  ;;  %11817 = vmatpush3.bf16.msra.mxu1 %v12829_v29  ;;  %v964_v55 = vadd.f32 %v932_v7, %v833_v4  ;;  %v12843_v29 = vld [vmem:[%s13564_s30 + $0xea8] sm:$0xff]   ;;  %v12846_v31 = vld [vmem:[%s13564_s30 + $0xea0] sm:$0xff]   ;;  %v7804_v26 = vsel %vm4211_vm1, %v12845_v57, 0 }
 0x316   : > { %v15794_v19 = vadd.f32 %v10331_v27, %v15599_v53  ;;  %v6327_v60 = vpop.f32.mrf.mxu0  ;;  %11818 = vmatprep.subr.bf16.mxu1 %v12831_v47  ;;  %v11671_v58 = vpop.f32.mrf.mxu1  ;;  %v12844_v47 = vld [vmem:[%s13564_s30 + $0xe68] sm:$0xff]   ;;  %v12847_v27 = vld [vmem:[%s13564_s30 + $0xe60] sm:$0xff]  }
 0x317   : > { %7893 = vmatpush1.bf16.msra.mxu0 %v12830_v10  ;;  %v15800_v14 = vadd.f32 %v11671_v58, %v11670_v52  ;;  %v1095_v0 = vadd.f32 %v1063_v22, %v964_v55  ;;  %v15864_v10 = vpop.permute.xlu1 %630  ;;  %v15870_v52 = vpop.permute.xlu0 %499  ;;  %v15877_v4 = vld [vmem:[%s16992_s0 + $0x68] sm:$0xf]  ;;  %v12848_v60 = vld [vmem:[%s13564_s30 + $0xe2c] sm:$0xff]  }
 0x318   : > { %v6328_v62 = vpop.f32.mrf.mxu0  ;;  %7894 = vmatprep.subr.bf16.mxu0 %v13390_v3  ;;  %v11673_v53 = vpop.f32.mrf.mxu1  ;;  %v1587_v7 = vmul.f32 %v15877_v4, %v15736_v54  ;;  %v15885_v58 = vld [vmem:[%s16992_s0 + $0xc] sm:$0xff]  ;;  %v12858_v57 = vld [vmem:[%s13564_s30 + $0xe80] sm:$0xff]  }
 0x319   : > { %11819 = vmatpush3.bf16.msra.mxu1 %v12832_v42  ;;  %v1226_v25 = vadd.f32 %v1194_v59, %v1095_v0  ;;  %v12850_v53 = vld [vmem:[%s13564_s30 + $0xe58] sm:$0xff]   ;;  %v12852_v55 = vld [vmem:[%s13564_s30 + $0xe90] sm:$0xff]  }
 0x31a   : > { %11820 = vmatprep.subr.bf16.mxu1 %v12834_v40  ;;  %v11674_v33 = vpop.f32.mrf.mxu1  ;;  %v671_v40 = vmul.f32 %v15885_v58, %v15864_v10  ;;  %v12853_v59 = vld [vmem:[%s13564_s30 + $0xe50] sm:$0xff]  }
 0x31b   : > { %7895 = vmatpush1.bf16.msra.mxu0 %v12833_v15  ;;  %v1357_v1 = vadd.f32 %v1325_v50, %v1226_v25  ;;  %v15892_v15 = vld [vmem:[%s16992_s0] sm:$0xff]  ;;  %v15898_v54 = vpop.permute.xlu1 %761 }
 0x31c   : > { %7896 = vmatprep.subr.bf16.mxu0 %v13390_v3  ;;  %v540_v62 = vmul.f32 %v15892_v15, %v15870_v52  ;;  %v12851_v33 = vld [vmem:[%s13564_s30 + $0xe24] sm:$0xff]  }
 0x31d   : > { %11821 = vmatpush3.bf16.msra.mxu1 %v12835_v49  ;;  %v1488_v42 = vadd.f32 %v1456_v28, %v1357_v1  ;;  %v10629_v49 = vld [vmem:[%s13583_s11 + $0xe] ss:$0 sm:$0xff]  ;;  %v15926_v50 = vld [vmem:[%s16992_s0 + $0x24] sm:$0xff]  ;;  %v12857_v1 = vld [vmem:[%s13564_s30 + $0xe14] sm:$0xff]  }
 0x31e   : > { %11822 = vmatprep.subr.bf16.mxu1 %v12837_v38  ;;  %1783 = vperm.xlu0 %12375, %v10629_v49   ;;  %v15908_v38 = vld [vmem:[%s16992_s0 + $0x18] sm:$0xff] }
 0x31f   : > { %7897 = vmatpush1.bf16.msra.mxu0 %v12836_v9  ;;  %v1619_v22 = vadd.f32 %v1587_v7, %v1488_v42  ;;  %v802_v23 = vmul.f32 %v15908_v38, %v15898_v54  ;;  %v703_v9 = vadd.f32 %v671_v40, %v540_v62  ;;  %v12861_v7 = vld [vmem:[%s13564_s30 + $0xe78] sm:$0xff]   ;;  %v12860_v40 = vld [vmem:[%s13564_s30 + $0xe0c] sm:$0xff]  }
 0x320   : > { %7898 = vmatprep.subr.bf16.mxu0 %v13390_v3 }
 0x321   : > { %11823 = vmatpush3.bf16.msra.mxu1 %v12838_v20  ;;  %v15913_v20 = vpop.permute.xlu0 %892  ;;  %v1811_v16 = vadd.f32 %v15762_v63, %v1619_v22  ;;  %v834_v25 = vadd.f32 %v802_v23, %v703_v9  ;;  %v12856_v63 = vld [vmem:[%s13564_s30 + $0xe48] sm:$0xff]  }
 0x322   : > { %11830 = vmatprep.subr.bf16.mxu1 %v12840_v30  ;;  %v12855_v30 = vld [vmem:[%s13564_s30 + $0xe88] sm:$0xff]   ;;  %12378 = vset.pattern.permute.xlu0 %v13389_v2  ;;  %v2136_v2 = vcombine.high %v15798_v35, %v15798_v35 }
 0x323   : > { %7899 = vmatpush1.bf16.msra.mxu0 %v12839_v8  ;;  %v15918_v8 = vpop.permute.xlu1 %1023 }
 0x324   : > { %7879 = vmatmul.mubr.bf16.vlgmr.msra.gmra.mxu1 %v2438_v32  ;;  %7900 = vmatprep.subr.bf16.mxu0 %v13390_v3  ;;  %v933_v32 = vmul.f32 %v15926_v50, %v15913_v20 }
 0x325   : > { %11831 = vmatpush3.bf16.msra.mxu1 %v12841_v48  ;;  %8237 = vmatprep.mubr.bf16.mxu1 %v2443_v34  ;;  %v12854_v48 = vld [vmem:[%s13564_s30 + $0xe1c] sm:$0xff]   ;;  %v15967_v22 = vpop.permute.xlu0 %1285 }
 0x326   : > { %11832 = vmatprep.subr.bf16.mxu1 %v12843_v29 }
 0x327   : > { %7901 = vmatpush1.bf16.msra.mxu0 %v12842_v39  ;;  %v15947_v42 = vpop.permute.xlu1 %1154 }
 0x328   : > { %7906 = vmatprep.subr.bf16.mxu0 %v13390_v3 }
 0x329   : > { %11833 = vmatpush3.bf16.msra.mxu1 %v12844_v47  ;;  %v1843_v47 = vmax.f32 %v1811_v16, 0.0  ;;  %v15980_v16 = vld [vmem:[%s16992_s0 + $0x48] sm:$0xff] }
 0x32a   : > { %11834 = vmatprep.subr.bf16.mxu1 %v12846_v31  ;;  %v15942_v31 = vld [vmem:[%s16992_s0 + $0x30] sm:$0xff] }
 0x32b   : > { %7907 = vmatpush2.bf16.msra.mxu0 %v7804_v26  ;;  %v1064_v35 = vmul.f32 %v15942_v31, %v15918_v8  ;;  %v965_v26 = vadd.f32 %v933_v32, %v834_v25  ;;  %v15972_v9 = vpop.permute.xlu1 %1416  ;;  %v15985_v25 = vld [vmem:[%s13578_s22 + $0xf] ss:$0 sm:$0xff]  ;;  %v2440_v32 = vpack.c.bf16 %v15715_v61, %v15715_v61 }
 0x32c   : > { %7908 = vmatprep.subr.bf16.mxu0 %v13390_v3  ;;  %515 = vperm.xlu1 %12376, %v15985_v25   ;;  %v12867_v61 = vld [vmem:[%s13564_s30 + $0xee8] sm:$0xff]  }
 0x32d   : > { %11835 = vmatpush3.bf16.msra.mxu1 %v12847_v27  ;;  %v1096_v62 = vadd.f32 %v1064_v35, %v965_v26  ;;  %777 = vperm.xlu0 %12378, %v15985_v25   ;;  %v12868_v26 = vld [vmem:[%s13564_s30 + $0xf68] sm:$0xff]  }
 0x32e   : > { %11836 = vmatprep.subr.bf16.mxu1 %v12849_v43  ;;  %v15950_v43 = vrot.slane %v2136_v2, %v13821_v21 }
 0x32f   : > { %7909 = vmatpush2.bf16.msra.mxu0 %v12848_v60  ;;  %v15955_v60 = vrot.slane %v1843_v47, %v13821_v21  ;;  %v16005_v35 = vpop.permute.xlu1 %1547 }
 0x330   : > { %7910 = vmatprep.subr.bf16.mxu0 %v13390_v3  ;;  %v2152_v23 = vcombine.high %v15950_v43, %v15950_v43  ;;  %12377 = vset.pattern.permute.xlu1 %v13392_v6  ;;  %v12871_v6 = vld [vmem:[%s13564_s30 + $0xf60] sm:$0xff]  }
 0x331   : > { %11837 = vmatpush3.bf16.msra.mxu1 %v12850_v53  ;;  %v15961_v53 = vld [vmem:[%s16992_s0 + $0x3c] sm:$0xff]  ;;  %646 = vperm.xlu1 %12377, %v15985_v25  }
 0x332   : > { %v11692_v0 = vpop.f32.mrf.mxu0  ;;  %11838 = vmatprep.subr.bf16.mxu1 %v12852_v55  ;;  %v1195_v49 = vmul.f32 %v15961_v53, %v15947_v42  ;;  %v12863_v55 = vld [vmem:[%s13564_s30 + $0xf30] sm:$0xff]   ;;  %v2445_v2 = vpack.c.bf16 %v2152_v23, %v2152_v23  ;;  %12381 = vset.pattern.permute.xlu0 %v13394_v12 }
 0x333   : > { %7911 = vmatpush2.bf16.msra.mxu0 %v12851_v33  ;;  %v12862_v33 = vld [vmem:[%s13564_s30 + $0xe38] sm:$0xff]   ;;  %1170 = vperm.xlu0 %12381, %v15985_v25   ;;  %v12875_v23 = vld [vmem:[%s13564_s30 + $0xf10] sm:$0xff]  }
 0x334   : > { %v11693_v29 = vpop.f32.mrf.mxu0  ;;  %7912 = vmatprep.subr.bf16.mxu0 %v13390_v3 }
 0x335   : > { %v11694_v34 = vadd.f32 %v11693_v29, %v11692_v0  ;;  %11839 = vmatpush3.bf16.msra.mxu1 %v12853_v59  ;;  %v2160_v59 = vcombine.high %v15955_v60, %v15955_v60  ;;  %v12864_v0 = vld [vmem:[%s13564_s30 + $0xef0] sm:$0xff]   ;;  %v12866_v29 = vld [vmem:[%s13564_s30 + $0xf28] sm:$0xff]   ;;  %12379 = vset.pattern.permute.xlu1 %v13391_v5  ;;  %v541_v5 = vmul.f32 %v15749_v13, %v15870_v52 }
 0x336   : > { %v11695_v39 = vpop.f32.mrf.mxu0  ;;  %11840 = vmatprep.subr.bf16.mxu1 %v12855_v30  ;;  %v1227_v30 = vadd.f32 %v1195_v49, %v1096_v62  ;;  %v12872_v62 = vld [vmem:[%s13564_s30 + $0xf18] sm:$0xff]   ;;  %908 = vperm.xlu1 %12379, %v15985_v25   ;;  %v12878_v52 = vld [vmem:[%s13564_s30 + $0xf08] sm:$0xff]  }
 0x337   : > { %7913 = vmatpush2.bf16.msra.mxu0 %v12854_v48  ;;  %v15937_v28 = vadd.f32 %v11694_v34, %v15800_v14  ;;  %v12859_v14 = vld [vmem:[%s13564_s30 + $0xe40] sm:$0xff]   ;;  %v1326_v48 = vmul.f32 %v15980_v16, %v15967_v22  ;;  %v12865_v34 = vld [vmem:[%s13564_s30 + $0xf70] sm:$0xff]   ;;  %v2447_v39 = vpack.c.bf16 %v2160_v59, %v2160_v59  ;;  %v12873_v49 = vld [vmem:[%s13564_s30 + $0xed8] sm:$0xff]   ;;  %v16028_v59 = vpop.permute.xlu0 %1771  ;;  %12384 = vset.pattern.permute.xlu0 %v13396_v18 }
 0x338   : > { %v11696_v27 = vpop.f32.mrf.mxu0  ;;  %7914 = vmatprep.subr.bf16.mxu0 %v13390_v3  ;;  %1563 = vperm.xlu0 %12384, %v15985_v25   ;;  %v12877_v18 = vld [vmem:[%s13564_s30 + $0xf50] sm:$0xff]  }
 0x339   : > { %11841 = vmatpush3.bf16.msra.mxu1 %v12856_v63  ;;  %v2442_v63 = vpack.c.bf16 %v15818_v45, %v15818_v45  ;;  %v12869_v45 = vld [vmem:[%s13564_s30 + $0xf20] sm:$0xff]  }
 0x33a   : > { %11842 = vmatprep.subr.bf16.mxu1 %v12858_v57  ;;  %v16000_v57 = vld [vmem:[%s16992_s0 + $0x54] sm:$0xff]  ;;  %v12870_v27 = vld [vmem:[%s13564_s30 + $0xee0] sm:$0xff]   ;;  %12380 = vset.pattern.permute.xlu1 %v13393_v11 }
 0x33b   : > { %7915 = vmatpush2.bf16.msra.mxu0 %v12857_v1  ;;  %v1457_v47 = vmul.f32 %v16000_v57, %v15972_v9  ;;  %v1358_v1 = vadd.f32 %v1326_v48, %v1227_v30  ;;  %v672_v30 = vmul.f32 %v15756_v37, %v15864_v10  ;;  %1039 = vperm.xlu1 %12380, %v15985_v25  }
 0x33c   : > { %7916 = vmatprep.subr.bf16.mxu0 %v13390_v3  ;;  %12386 = vset.pattern.permute.xlu0 %v13390_v3 }
 0x33d   : > { %11843 = vmatpush3.bf16.msra.mxu1 %v12859_v14  ;;  %v16015_v14 = vld [vmem:[%s16992_s0 + $0x60] sm:$0xff] }
 0x33e   : > { %11844 = vmatprep.subr.bf16.mxu1 %v12861_v7  ;;  %v1588_v7 = vmul.f32 %v16015_v14, %v16005_v35 }
 0x33f   : > { %7917 = vmatpush2.bf16.msra.mxu0 %v12860_v40  ;;  %v1489_v40 = vadd.f32 %v1457_v47, %v1358_v1  ;;  %v12881_v1 = vld [vmem:[%s13564_s30 + $0xf00] sm:$0xff]   ;;  %12382 = vset.pattern.permute.xlu1 %v13395_v17  ;;  %v1065_v17 = vmul.f32 %v15810_v46, %v15918_v8  ;;  %v16082_v8 = vpop.permute.xlu1 %503 }
 0x340   : > { %11852 = vmatprep.subr.bf16.mxu0 %v12863_v55  ;;  %1301 = vperm.xlu1 %12382, %v15985_v25  }
 0x341   : > { %11845 = vmatpush3.bf16.msra.mxu1 %v12862_v33  ;;  %v1620_v55 = vadd.f32 %v1588_v7, %v1489_v40  ;;  %v12882_v40 = vld [vmem:[%s13564_s30 + $0xec0] sm:$0xff]  }
 0x342   : > { %7919 = vmatmul.mubr.bf16.vlgmr.msra.gmra.mxu0 %v2440_v32  ;;  %8285 = vmatprep.subr.bf16.mxu1 %v13390_v3 }
 0x343   : > { %11853 = vmatpush3.bf16.msra.mxu0 %v12864_v0  ;;  %8277 = vmatprep.mubr.bf16.mxu0 %v2445_v2  ;;  %v12874_v0 = vld [vmem:[%s13564_s30 + $0xf58] sm:$0xff]  }
 0x344   : > { %8238 = vmatmul.mubr.bf16.vlgmr.msra.gmra.mxu1 %v2442_v63  ;;  %11854 = vmatprep.subr.bf16.mxu0 %v12866_v29  ;;  %v1812_v29 = vadd.f32 %v16028_v59, %v1620_v55  ;;  %v704_v63 = vadd.f32 %v672_v30, %v541_v5  ;;  %v1196_v30 = vmul.f32 %v15829_v44, %v15947_v42  ;;  %v12886_v5 = vld [vmem:[%s13564_s30 + $0xf38] sm:$0xff]  }
 0x345   : > { %8286 = vmatpush1.bf16.msra.mxu1 %v12865_v34  ;;  %11147 = vmatprep.mubr.msk.bf16.mxu1 %vm4207_vm0, %v2447_v39  ;;  %v803_v34 = vmul.f32 %v15773_v41, %v15898_v54  ;;  %v12880_v54 = vld [vmem:[%s13564_s30 + $0xf48] sm:$0xff]  }
 0x346   : > { %8287 = vmatprep.subr.bf16.mxu1 %v13390_v3  ;;  %v16055_v47 = vmax.f32 %v1812_v29, 0.0  ;;  %12383 = vset.pattern.permute.xlu1 %v13397_v24  ;;  %v10630_v24 = vld [vmem:[%s13583_s11 + $0xf] ss:$0 sm:$0xff]  ;;  %v12890_v29 = vld [vmem:[%s13564_s30 + $0x1014] sm:$0xff]  }
 0x347   : > { %11855 = vmatpush3.bf16.msra.mxu0 %v12867_v61  ;;  %1432 = vperm.xlu1 %12383, %v15985_v25   ;;  %v2444_v25 = vpack.c.bf16 %v15950_v43, %v15950_v43  ;;  %v12891_v43 = vld [vmem:[%s13564_s30 + $0xfd4] sm:$0xff]  }
 0x348   : > { %11856 = vmatprep.subr.bf16.mxu0 %v12869_v45 }
 0x349   : > { %8288 = vmatpush1.bf16.msra.mxu1 %v12868_v26  ;;  %v835_v26 = vadd.f32 %v803_v34, %v704_v63  ;;  %v12893_v34 = vld [vmem:[%s13564_s30 + $0x100c] sm:$0xff]   ;;  %v1458_v63 = vmul.f32 %v15859_v51, %v15972_v9  ;;  %v12896_v9 = vld [vmem:[%s13564_s30 + $0x1004] sm:$0xff]  }
 0x34a   : > { %8289 = vmatprep.subr.bf16.mxu1 %v13390_v3 }
 0x34b   : > { %11857 = vmatpush3.bf16.msra.mxu0 %v12870_v27  ;;  %v934_v27 = vmul.f32 %v15789_v36, %v15913_v20  ;;  %v12883_v20 = vld [vmem:[%s13564_s30 + $0xf40] sm:$0xff]   ;;  %12385 = vset.pattern.permute.xlu1 %v13390_v3 }
 0x34c   : > { %v6723_v33 = vpop.f32.mrf.mxu1  ;;  %11858 = vmatprep.subr.bf16.mxu0 %v12872_v62  ;;  %v16069_v62 = vrot.slane %v16055_v47, %v13821_v21  ;;  %1787 = vperm.xlu1 %12385, %v10630_v24   ;;  %v12900_v24 = vld [vmem:[%s13564_s30 + $0xfbc] sm:$0xff]  }
 0x34d   : > { %v6724_v12 = vadd.f32 %v6723_v33, %v15937_v28  ;;  %8290 = vmatpush1.bf16.msra.mxu1 %v12871_v6  ;;  %v12876_v28 = vld [vmem:[%s13564_s30 + $0xed0] sm:$0xff]   ;;  %v966_v55 = vadd.f32 %v934_v27, %v835_v26  ;;  %v12885_v33 = vld [vmem:[%s13564_s30 + $0xeb8] sm:$0xff]   ;;  %v1589_v26 = vmul.f32 %v15877_v4, %v16005_v35  ;;  %v12898_v35 = vld [vmem:[%s13564_s30 + $0xf88] sm:$0xff]  }
 0x34e   : > { %v6725_v48 = vpop.f32.mrf.mxu1  ;;  %8291 = vmatprep.subr.bf16.mxu1 %v13390_v3 }
 0x34f   : > { %v10333_v32 = vsel %vm10321_vm2, %v6724_v12, 0.0  ;;  %11859 = vmatpush3.bf16.msra.mxu0 %v12873_v49  ;;  %v12884_v49 = vld [vmem:[%s13564_s30 + $0xef8] sm:$0xff]   ;;  %v12889_v48 = vld [vmem:[%s13564_s30 + $0xfa0] ss:$0 sps:$4 sm:$0xff]  }
 0x350   : > { %v16044_v10 = vadd.f32 %v10333_v32, %v15794_v19  ;;  %v6726_v2 = vpop.f32.mrf.mxu1  ;;  %11860 = vmatprep.subr.bf16.mxu0 %v12875_v23  ;;  %v12879_v19 = vld [vmem:[%s13564_s30 + $0xec8] sm:$0xff]   ;;  %v2176_v23 = vcombine.high %v16069_v62, %v16069_v62  ;;  %v12887_v12 = vld [vmem:[%s13564_s30 + $0x101c] sm:$0xff]  }
 0x351   : > { %8292 = vmatpush1.bf16.msra.mxu1 %v12874_v0  ;;  %v1097_v0 = vadd.f32 %v1065_v17, %v966_v55  ;;  %v12888_v32 = vld [vmem:[%s13564_s30 + $0xfdc] sm:$0xff]   ;;  %v1327_v2 = vmul.f32 %v15845_v56, %v15967_v22 }
 0x352   : > { %v6727_v39 = vpop.f32.mrf.mxu1  ;;  %v11714_v61 = vpop.f32.mrf.mxu0  ;;  %8293 = vmatprep.subr.bf16.mxu1 %v13390_v3  ;;  %v12892_v22 = vld [vmem:[%s13564_s30 + $0xf98] sm:$0xff]  }
 0x353   : > { %11861 = vmatpush3.bf16.msra.mxu0 %v12876_v28  ;;  %v2449_v28 = vpack.c.bf16 %v2176_v23, %v2176_v23  ;;  %v1228_v42 = vadd.f32 %v1196_v30, %v1097_v0  ;;  %v2161_v30 = vcombine.high %v16055_v47, %v16055_v47 }
 0x354   : > { %v11715_v11 = vpop.f32.mrf.mxu0  ;;  %11862 = vmatprep.subr.bf16.mxu0 %v12878_v52  ;;  %v8203_v52 = vsel %vm4211_vm1, %v12889_v48, 0 }
 0x355   : > { %v16058_v45 = vadd.f32 %v11715_v11, %v11714_v61  ;;  %8294 = vmatpush1.bf16.msra.mxu1 %v12877_v18  ;;  %v16099_v18 = vpop.permute.xlu1 %634  ;;  %v1359_v39 = vadd.f32 %v1327_v2, %v1228_v42  ;;  %v542_v61 = vmul.f32 %v15892_v15, %v16082_v8  ;;  %v16111_v11 = vpop.permute.xlu0 %765 }
 0x356   : > { %v11717_v7 = vpop.f32.mrf.mxu0  ;;  %8295 = vmatprep.subr.bf16.mxu1 %v13390_v3 }
 0x357   : > { %11863 = vmatpush3.bf16.msra.mxu0 %v12879_v19  ;;  %v673_v19 = vmul.f32 %v15885_v58, %v16099_v18  ;;  %v1490_v27 = vadd.f32 %v1458_v63, %v1359_v39  ;;  %v12895_v7 = vld [vmem:[%s13564_s30 + $0xf90] sm:$0xff]   ;;  %v12904_v39 = vld [vmem:[%s13564_s30 + $0xf78] sm:$0xff]  }
 0x358   : > { %v11718_v6 = vpop.f32.mrf.mxu0  ;;  %11864 = vmatprep.subr.bf16.mxu0 %v12881_v1  ;;  %v12894_v1 = vld [vmem:[%s13564_s30 + $0xfcc] sm:$0xff]  }
 0x359   : > { %8296 = vmatpush1.bf16.msra.mxu1 %v12880_v54  ;;  %v16115_v54 = vpop.permute.xlu1 %896  ;;  %v804_v6 = vmul.f32 %v15908_v38, %v16111_v11  ;;  %v1621_v55 = vadd.f32 %v1589_v26, %v1490_v27  ;;  %v12909_v26 = vld [vmem:[%s13564_s30 + $0xfe4] sm:$0xff]  }
 0x35a   : > { %8297 = vmatprep.subr.bf16.mxu1 %v13390_v3 }
 0x35b   : > { %11865 = vmatpush3.bf16.msra.mxu0 %v12882_v40  ;;  %v705_v40 = vadd.f32 %v673_v19, %v542_v61  ;;  %v12907_v19 = vld [vmem:[%s13564_s30 + $0x109c] sm:$0xff]  }
 0x35c   : > { %11866 = vmatprep.subr.bf16.mxu0 %v12884_v49  ;;  %v12897_v49 = vld [vmem:[%s13564_s30 + $0xfc4] sm:$0xff]  }
 0x35d   : > { %8298 = vmatpush1.bf16.msra.mxu1 %v12883_v20  ;;  %v12899_v20 = vld [vmem:[%s13564_s30 + $0xffc] sm:$0xff]   ;;  %v836_v23 = vadd.f32 %v804_v6, %v705_v40  ;;  %v16129_v0 = vpop.permute.xlu1 %1027 }
 0x35e   : > { %8299 = vmatprep.subr.bf16.mxu1 %v13390_v3  ;;  %v1066_v47 = vmul.f32 %v15942_v31, %v16129_v0 }
 0x35f   : > { %11867 = vmatpush3.bf16.msra.mxu0 %v12885_v33  ;;  %v935_v33 = vmul.f32 %v15926_v50, %v16115_v54 }
 0x360   : > { %11874 = vmatprep.subr.bf16.mxu0 %v12887_v12 }
 0x361   : > { %8300 = vmatpush1.bf16.msra.mxu1 %v12886_v5  ;;  %v967_v42 = vadd.f32 %v935_v33, %v836_v23  ;;  %v12912_v23 = vld [vmem:[%s13564_s30 + $0x1054] sm:$0xff]  }
 0x362   : > { %8278 = vmatmul.mubr.bf16.vlgmr.msra.gmra.mxu0 %v2444_v25  ;;  %8305 = vmatprep.subr.bf16.mxu1 %v13390_v3  ;;  %v12901_v25 = vld [vmem:[%s13564_s30 + $0xf80] sm:$0xff]  }
 0x363   : > { %11875 = vmatpush3.bf16.msra.mxu0 %v12888_v32  ;;  %8636 = vmatprep.mubr.bf16.mxu0 %v2449_v28  ;;  %v12902_v32 = vld [vmem:[%s13564_s30 + $0xff4] sm:$0xff]   ;;  %v1813_v28 = vadd.f32 %v16028_v59, %v1621_v55 }
 0x364   : > { %11876 = vmatprep.subr.bf16.mxu0 %v12890_v29  ;;  %v12903_v59 = vld [vmem:[%s13564_s30 + $0xfb4] sm:$0xff]  }
 0x365   : > { %8306 = vmatpush2.bf16.msra.mxu1 %v8203_v52  ;;  %v16143_v52 = vpop.permute.xlu0 %1158  ;;  %v1845_v63 = vmax.f32 %v1813_v28, 0.0  ;;  %v12915_v28 = vld [vmem:[%s13564_s30 + $0x104c] sm:$0xff]  }
 0x366   : > { %8307 = vmatprep.subr.bf16.mxu1 %v13390_v3  ;;  %v1197_v61 = vmul.f32 %v15961_v53, %v16143_v52 }
 0x367   : > { %11877 = vmatpush3.bf16.msra.mxu0 %v12891_v43  ;;  %v16146_v43 = vrot.slane %v2161_v30, %v13821_v21  ;;  %v16162_v27 = vrot.slane %v1845_v63, %v13821_v21  ;;  %v12914_v30 = vld [vmem:[%s13564_s30 + $0x108c] sm:$0xff]  }
 0x368   : > { %11878 = vmatprep.subr.bf16.mxu0 %v12893_v34  ;;  %v16150_v34 = vpop.permute.xlu1 %1289 }
 0x369   : > { %8308 = vmatpush2.bf16.msra.mxu1 %v12892_v22  ;;  %v1098_v22 = vadd.f32 %v1066_v47, %v967_v42  ;;  %v1328_v40 = vmul.f32 %v15980_v16, %v16150_v34  ;;  %v2185_v33 = vcombine.high %v16162_v27, %v16162_v27  ;;  %v12917_v47 = vld [vmem:[%s13564_s30 + $0x1084] sm:$0xff]  }
 0x36a   : > { %8309 = vmatprep.subr.bf16.mxu1 %v13390_v3 }
 0x36b   : > { %11879 = vmatpush3.bf16.msra.mxu0 %v12894_v1  ;;  %v12906_v1 = vld [vmem:[%s13564_s30 + $0xfac] sm:$0xff]   ;;  %v1229_v6 = vadd.f32 %v1197_v61, %v1098_v22 }
 0x36c   : > { %v11736_v17 = vpop.f32.mrf.mxu1  ;;  %11880 = vmatprep.subr.bf16.mxu0 %v12896_v9  ;;  %v2177_v9 = vcombine.high %v16146_v43, %v16146_v43  ;;  %v12919_v61 = vld [vmem:[%s13564_s30 + $0x10cc] sm:$0xff]  }
 0x36d   : > { %8310 = vmatpush2.bf16.msra.mxu1 %v12895_v7  ;;  %v12908_v7 = vld [vmem:[%s13564_s30 + $0x105c] sm:$0xff]  }
 0x36e   : > { %v11737_v12 = vpop.f32.mrf.mxu1  ;;  %8311 = vmatprep.subr.bf16.mxu1 %v13390_v3  ;;  %v2451_v55 = vpack.c.bf16 %v2177_v9, %v2177_v9 }
 0x36f   : > { %v11738_v5 = vadd.f32 %v11737_v12, %v11736_v17  ;;  %11881 = vmatpush3.bf16.msra.mxu0 %v12897_v49  ;;  %v2446_v49 = vpack.c.bf16 %v15955_v60, %v15955_v60  ;;  %v12911_v17 = vld [vmem:[%s13564_s30 + $0x1094] sm:$0xff]   ;;  %v1360_v12 = vadd.f32 %v1328_v40, %v1229_v6 }
 0x370   : > { %v11739_v48 = vpop.f32.mrf.mxu1  ;;  %11882 = vmatprep.subr.bf16.mxu0 %v12899_v20  ;;  %v16170_v20 = vpop.permute.xlu1 %1420 }
 0x371   : > { %8312 = vmatpush2.bf16.msra.mxu1 %v12898_v35  ;;  %v16138_v29 = vadd.f32 %v11738_v5, %v16058_v45  ;;  %v12905_v45 = vld [vmem:[%s13564_s30 + $0xfec] sm:$0xff]   ;;  %v12910_v35 = vld [vmem:[%s13564_s30 + $0xfa4] sm:$0xff]   ;;  %v1459_v60 = vmul.f32 %v16000_v57, %v16170_v20  ;;  %v16179_v5 = vpop.permute.xlu0 %1551  ;;  %v2448_v48 = vpack.c.bf16 %v16069_v62, %v16069_v62 }
 0x372   : > { %v11740_v2 = vpop.f32.mrf.mxu1  ;;  %8313 = vmatprep.subr.bf16.mxu1 %v13390_v3  ;;  %v1590_v42 = vmul.f32 %v16015_v14, %v16179_v5  ;;  %v12918_v62 = vld [vmem:[%s13564_s30 + $0x1044] sm:$0xff]  }
 0x373   : > { %11883 = vmatpush3.bf16.msra.mxu0 %v12900_v24  ;;  %v12913_v24 = vld [vmem:[%s13564_s30 + $0x10dc] sm:$0xff]   ;;  %v12916_v2 = vld [vmem:[%s13564_s30 + $0x10d4] sm:$0xff]  }
 0x374   : > { %11884 = vmatprep.subr.bf16.mxu0 %v12902_v32  ;;  %v2453_v32 = vpack.c.bf16 %v2185_v33, %v2185_v33  ;;  %v16198_v22 = vpop.permute.xlu1 %1775  ;;  %v12926_v33 = vld [vmem:[%s13564_s30 + $0x106c] sm:$0xff]  }
 0x375   : > { %8314 = vmatpush2.bf16.msra.mxu1 %v12901_v25  ;;  %v1491_v25 = vadd.f32 %v1459_v60, %v1360_v12  ;;  %v12925_v12 = vld [vmem:[%s13564_s30 + $0x10bc] sm:$0xff]  }
 0x376   : > { %8315 = vmatprep.subr.bf16.mxu1 %v13390_v3 }
 0x377   : > { %11885 = vmatpush3.bf16.msra.mxu0 %v12903_v59  ;;  %v543_v59 = vmul.f32 %v15749_v13, %v16082_v8  ;;  %v1622_v63 = vadd.f32 %v1590_v42, %v1491_v25  ;;  %v805_v13 = vmul.f32 %v15773_v41, %v16111_v11  ;;  %v936_v41 = vmul.f32 %v15789_v36, %v16115_v54  ;;  %v12927_v54 = vld [vmem:[%s13564_s30 + $0x102c] sm:$0xff]   ;;  %v12930_v25 = vld [vmem:[%s13564_s30 + $0x1024] sm:$0xff]  }
 0x378   : > { %11886 = vmatprep.subr.bf16.mxu0 %v12905_v45  ;;  %v674_v45 = vmul.f32 %v15756_v37, %v16099_v18  ;;  %v12923_v18 = vld [vmem:[%s13564_s30 + $0x1074] sm:$0xff]  }
 0x379   : > { %8316 = vmatpush2.bf16.msra.mxu1 %v12904_v39  ;;  %v12920_v39 = vld [vmem:[%s13564_s30 + $0x107c] sm:$0xff]   ;;  %v1814_v8 = vadd.f32 %v16198_v22, %v1622_v63 }
 0x37a   : > { %11896 = vmatprep.subr.bf16.mxu1 %v12907_v19  ;;  %v12921_v19 = vld [vmem:[%s13564_s30 + $0x103c] sm:$0xff]  }
 0x37b   : > { %11887 = vmatpush3.bf16.msra.mxu0 %v12906_v1  ;;  %v706_v1 = vadd.f32 %v674_v45, %v543_v59  ;;  %v1329_v59 = vmul.f32 %v15845_v56, %v16150_v34  ;;  %v12936_v56 = vld [vmem:[%s13564_s30 + $0x1140] sm:$0xff]  }
 0x37c   : > { %8318 = vmatmul.mubr.bf16.vlgmr.msra.gmra.mxu1 %v2446_v49  ;;  %11888 = vmatprep.subr.bf16.mxu0 %v12909_v26  ;;  %v12922_v26 = vld [vmem:[%s13564_s30 + $0x10c4] sm:$0xff]   ;;  %v12924_v49 = vld [vmem:[%s13564_s30 + $0x1034] sm:$0xff]  }
 0x37d   : > { %11897 = vmatpush3.bf16.msra.mxu1 %v12908_v7  ;;  %8676 = vmatprep.mubr.bf16.mxu1 %v2451_v55  ;;  %v837_v11 = vadd.f32 %v805_v13, %v706_v1  ;;  %v1460_v1 = vmul.f32 %v15859_v51, %v16170_v20  ;;  %v1591_v51 = vmul.f32 %v15877_v4, %v16179_v5  ;;  %v12941_v20 = vld [vmem:[%s13564_s30 + $0x1170] sm:$0xff]   ;;  %v12944_v4 = vld [vmem:[%s13564_s30 + $0x1168] sm:$0xff]   ;;  %v12943_v5 = vld [vmem:[%s13564_s30 + $0x10fc] sm:$0xff]  }
 0x37e   : > { %11898 = vmatprep.subr.bf16.mxu1 %v12911_v17  ;;  %v16214_v17 = vmax.f32 %v1814_v8, 0.0  ;;  %v16259_v8 = vpop.permute.xlu0 %638 }
 0x37f   : > { %11889 = vmatpush3.bf16.msra.mxu0 %v12910_v35 }
 0x380   : > { %8684 = vmatprep.subr.bf16.mxu0 %v13390_v3 }
 0x381   : > { %11899 = vmatpush3.bf16.msra.mxu1 %v12912_v23 }
 0x382   : > { %8637 = vmatmul.mubr.bf16.vlgmr.msra.gmra.mxu0 %v2448_v48  ;;  %11900 = vmatprep.subr.bf16.mxu1 %v12914_v30  ;;  %v1067_v30 = vmul.f32 %v15810_v46, %v16129_v0  ;;  %v1198_v46 = vmul.f32 %v15829_v44, %v16143_v52  ;;  %v2450_v44 = vpack.c.bf16 %v16146_v43, %v16146_v43  ;;  %v12935_v52 = vld [vmem:[%s13564_s30 + $0x1180] sm:$0xff]   ;;  %v12938_v43 = vld [vmem:[%s13564_s30 + $0x1178] sm:$0xff]  }
 0x383   : > { %8685 = vmatpush1.bf16.msra.mxu0 %v12913_v24  ;;  %11194 = vmatprep.mubr.msk.bf16.mxu0 %vm4207_vm0, %v2453_v32  ;;  %v16229_v24 = vrot.slane %v16214_v17, %v13821_v21  ;;  %v12929_v32 = vld [vmem:[%s13564_s30 + $0x1064] sm:$0xff]  }
 0x384   : > { %8686 = vmatprep.subr.bf16.mxu0 %v13390_v3 }
 0x385   : > { %11901 = vmatpush3.bf16.msra.mxu1 %v12915_v28  ;;  %v12928_v28 = vld [vmem:[%s13564_s30 + $0x10b4] sm:$0xff]   ;;  %v2201_v0 = vcombine.high %v16229_v24, %v16229_v24 }
 0x386   : > { %11902 = vmatprep.subr.bf16.mxu1 %v12917_v47  ;;  %v12932_v47 = vld [vmem:[%s13564_s30 + $0x1188] sm:$0xff]  }
 0x387   : > { %8687 = vmatpush1.bf16.msra.mxu0 %v12916_v2  ;;  %v12931_v2 = vld [vmem:[%s13564_s30 + $0x10ac] sm:$0xff]   ;;  %v2455_v63 = vpack.c.bf16 %v2201_v0, %v2201_v0 }
 0x388   : > { %8688 = vmatprep.subr.bf16.mxu0 %v13390_v3 }
 0x389   : > { %11903 = vmatpush3.bf16.msra.mxu1 %v12918_v62  ;;  %v12933_v62 = vld [vmem:[%s13564_s30 + $0x1148] sm:$0xff]  }
 0x38a   : > { %v7122_v37 = vpop.f32.mrf.mxu0  ;;  %11904 = vmatprep.subr.bf16.mxu1 %v12920_v39  ;;  %v12934_v39 = vld [vmem:[%s13564_s30 + $0x10a4] sm:$0xff]  }
 0x38b   : > { %v7123_v9 = vadd.f32 %v7122_v37, %v16138_v29  ;;  %8689 = vmatpush1.bf16.msra.mxu0 %v12919_v61  ;;  %v12937_v61 = vld [vmem:[%s13564_s30 + $0x110c] ss:$0 sps:$4 sm:$0xff]   ;;  %v12939_v37 = vld [vmem:[%s13564_s30 + $0x1138] sm:$0xff]  }
 0x38c   : > { %v7124_v7 = vpop.f32.mrf.mxu0  ;;  %8690 = vmatprep.subr.bf16.mxu0 %v13390_v3  ;;  %v11758_v40 = vpop.f32.mrf.mxu1  ;;  %v8602_v13 = vsel %vm4211_vm1, %v12937_v61, 0  ;;  %v12954_v61 = vld [vmem:[%s13564_s30 + $0x1110] sm:$0xff]  }
 0x38d   : > { %v10335_v6 = vsel %vm10321_vm2, %v7123_v9, 0.0  ;;  %11905 = vmatpush3.bf16.msra.mxu1 %v12921_v19  ;;  %v16251_v19 = vpop.permute.xlu1 %507 }
 0x38e   : > { %v16217_v29 = vadd.f32 %v10335_v6, %v16044_v10  ;;  %v7125_v55 = vpop.f32.mrf.mxu0  ;;  %11906 = vmatprep.subr.bf16.mxu1 %v12923_v18  ;;  %v11759_v35 = vpop.f32.mrf.mxu1  ;;  %v968_v10 = vadd.f32 %v936_v41, %v837_v11  ;;  %v544_v7 = vmul.f32 %v15892_v15, %v16251_v19  ;;  %v12942_v6 = vld [vmem:[%s13564_s30 + $0x1130] sm:$0xff]  }
 0x38f   : > { %8691 = vmatpush1.bf16.msra.mxu0 %v12922_v26  ;;  %v16220_v23 = vadd.f32 %v11759_v35, %v11758_v40  ;;  %v12940_v26 = vld [vmem:[%s13564_s30 + $0x1104] sm:$0xff]   ;;  %v675_v40 = vmul.f32 %v15885_v58, %v16259_v8 }
 0x390   : > { %v7126_v60 = vpop.f32.mrf.mxu0  ;;  %8692 = vmatprep.subr.bf16.mxu0 %v13390_v3  ;;  %v11761_v36 = vpop.f32.mrf.mxu1  ;;  %v1099_v42 = vadd.f32 %v1067_v30, %v968_v10  ;;  %v12945_v58 = vld [vmem:[%s13564_s30 + $0x1128] sm:$0xff]  }
 0x391   : > { %11907 = vmatpush3.bf16.msra.mxu1 %v12924_v49  ;;  %v16265_v9 = vpop.permute.xlu1 %769  ;;  %v707_v11 = vadd.f32 %v675_v40, %v544_v7  ;;  %v2186_v60 = vcombine.high %v16214_v17, %v16214_v17  ;;  %v16290_v10 = vpop.permute.xlu0 %1031  ;;  %v12960_v40 = vld [vmem:[%s13564_s30 + $0x1240] sm:$0xff]  }
 0x392   : > { %11908 = vmatprep.subr.bf16.mxu1 %v12926_v33  ;;  %v11762_v48 = vpop.f32.mrf.mxu1  ;;  %v1230_v45 = vadd.f32 %v1198_v46, %v1099_v42  ;;  %v806_v41 = vmul.f32 %v15908_v38, %v16265_v9  ;;  %v12947_v33 = vld [vmem:[%s13564_s30 + $0x1160] sm:$0xff]   ;;  %v1068_v0 = vmul.f32 %v15942_v31, %v16290_v10 }
 0x393   : > { %8693 = vmatpush1.bf16.msra.mxu0 %v12925_v12  ;;  %v12946_v12 = vld [vmem:[%s13564_s30 + $0x10f4] sm:$0xff]   ;;  %v12948_v48 = vld [vmem:[%s13564_s30 + $0x1120] sm:$0xff]  }
 0x394   : > { %8694 = vmatprep.subr.bf16.mxu0 %v13390_v3  ;;  %v1361_v34 = vadd.f32 %v1329_v59, %v1230_v45  ;;  %v838_v38 = vadd.f32 %v806_v41, %v707_v11  ;;  %v12953_v59 = vld [vmem:[%s13564_s30 + $0x1150] sm:$0xff]  }
 0x395   : > { %11909 = vmatpush3.bf16.msra.mxu1 %v12927_v54  ;;  %v16279_v15 = vpop.permute.xlu1 %900  ;;  %v12965_v41 = vld [vmem:[%s13564_s30 + $0x11b0] sm:$0xff]  }
 0x396   : > { %11910 = vmatprep.subr.bf16.mxu1 %v12929_v32  ;;  %v1492_v18 = vadd.f32 %v1460_v1, %v1361_v34  ;;  %v937_v36 = vmul.f32 %v15926_v50, %v16279_v15  ;;  %v16297_v50 = vrot.slane %v2186_v60, %v13821_v21  ;;  %v12966_v60 = vld [vmem:[%s13564_s30 + $0x1230] sm:$0xff]  }
 0x397   : > { %8695 = vmatpush1.bf16.msra.mxu0 %v12928_v28  ;;  %v12950_v28 = vld [vmem:[%s13564_s30 + $0x1158] sm:$0xff]  }
 0x398   : > { %8696 = vmatprep.subr.bf16.mxu0 %v13390_v3  ;;  %v1623_v49 = vadd.f32 %v1591_v51, %v1492_v18  ;;  %v969_v46 = vadd.f32 %v937_v36, %v838_v38  ;;  %v2202_v45 = vcombine.high %v16297_v50, %v16297_v50  ;;  %v16331_v18 = vpop.permute.xlu0 %1424  ;;  %v16366_v38 = vld [vmem:[%s16992_s0 + $0x14] sm:$0xf] }
 0x399   : > { %11911 = vmatpush3.bf16.msra.mxu1 %v12930_v25  ;;  %v16294_v17 = vpop.permute.xlu1 %1162  ;;  %v12949_v25 = vld [vmem:[%s13564_s30 + $0x10ec] sm:$0xff]   ;;  %v676_v36 = vmul.f32 %v16366_v38, %v16259_v8  ;;  %v16381_v8 = vld [vmem:[%s16992_s0 + $0x20] sm:$0xf] }
 0x39a   : > { %11918 = vmatprep.subr.bf16.mxu1 %v12932_v47  ;;  %v1815_v55 = vadd.f32 %v16198_v22, %v1623_v49  ;;  %v1199_v31 = vmul.f32 %v15961_v53, %v16294_v17  ;;  %v2457_v34 = vpack.c.bf16 %v2202_v45, %v2202_v45 }
 0x39b   : > { %8697 = vmatpush1.bf16.msra.mxu0 %v12931_v2 }
 0x39c   : > { %8677 = vmatmul.mubr.bf16.vlgmr.msra.gmra.mxu1 %v2450_v44  ;;  %8698 = vmatprep.subr.bf16.mxu0 %v13390_v3  ;;  %v1847_v30 = vmax.f32 %v1815_v55, 0.0  ;;  %v12955_v44 = vld [vmem:[%s13564_s30 + $0x1208] sm:$0xff]  }
 0x39d   : > { %11919 = vmatpush3.bf16.msra.mxu1 %v12933_v62  ;;  %9035 = vmatprep.mubr.bf16.mxu1 %v2455_v63  ;;  %v12951_v62 = vld [vmem:[%s13564_s30 + $0x1118] sm:$0xff]   ;;  %v1100_v63 = vadd.f32 %v1068_v0, %v969_v46  ;;  %v12967_v55 = vld [vmem:[%s13564_s30 + $0x11e8] sm:$0xff]  }
 0x39e   : > { %11920 = vmatprep.subr.bf16.mxu1 %v12935_v52  ;;  %v16307_v2 = vrot.slane %v1847_v30, %v13821_v21  ;;  %v16318_v52 = vpop.permute.xlu1 %1293  ;;  %v12969_v46 = vld [vmem:[%s13564_s30 + $0x1228] sm:$0xff]  }
 0x39f   : > { %8699 = vmatpush1.bf16.msra.mxu0 %v12934_v39  ;;  %v1231_v1 = vadd.f32 %v1199_v31, %v1100_v63  ;;  %v1330_v53 = vmul.f32 %v15980_v16, %v16318_v52  ;;  %v12959_v16 = vld [vmem:[%s13564_s30 + $0x11c0] sm:$0xff]  }
 0x3a0   : > { %8704 = vmatprep.subr.bf16.mxu0 %v13390_v3  ;;  %v2210_v39 = vcombine.high %v16307_v2, %v16307_v2 }
 0x3a1   : > { %11921 = vmatpush3.bf16.msra.mxu1 %v12936_v56  ;;  %v12956_v56 = vld [vmem:[%s13564_s30 + $0x11c8] sm:$0xff]  }
 0x3a2   : > { %11922 = vmatprep.subr.bf16.mxu1 %v12938_v43  ;;  %v2452_v43 = vpack.c.bf16 %v16162_v27, %v16162_v27  ;;  %v2459_v51 = vpack.c.bf16 %v2210_v39, %v2210_v39  ;;  %v1362_v27 = vadd.f32 %v1330_v53, %v1231_v1  ;;  %v16339_v7 = vpop.permute.xlu1 %1555  ;;  %v12976_v1 = vld [vmem:[%s13564_s30 + $0x11d0] sm:$0xff]  }
 0x3a3   : > { %8705 = vmatpush2.bf16.msra.mxu0 %v8602_v13  ;;  %v2454_v13 = vpack.c.bf16 %v16229_v24, %v16229_v24  ;;  %v1461_v24 = vmul.f32 %v16000_v57, %v16331_v18  ;;  %v1592_v57 = vmul.f32 %v16015_v14, %v16339_v7  ;;  %v16357_v14 = vld [vmem:[%s16992_s0 + $0x8] sm:$0xf]  ;;  %v16411_v53 = vld [vmem:[%s16992_s0 + $0x38] sm:$0xf] }
 0x3a4   : > { %8706 = vmatprep.subr.bf16.mxu0 %v13390_v3 }
 0x3a5   : > { %11923 = vmatpush3.bf16.msra.mxu1 %v12939_v37  ;;  %v12958_v37 = vld [vmem:[%s13564_s30 + $0x1200] sm:$0xff]   ;;  %v1493_v49 = vadd.f32 %v1461_v24, %v1362_v27  ;;  %v12978_v24 = vld [vmem:[%s13564_s30 + $0x1210] sm:$0xff]  }
 0x3a6   : > { %11924 = vmatprep.subr.bf16.mxu1 %v12941_v20  ;;  %v12957_v20 = vld [vmem:[%s13564_s30 + $0x1248] sm:$0xff]  }
 0x3a7   : > { %8707 = vmatpush2.bf16.msra.mxu0 %v12940_v26  ;;  %v12961_v26 = vld [vmem:[%s13564_s30 + $0x11f8] sm:$0xff]   ;;  %v1624_v11 = vadd.f32 %v1592_v57, %v1493_v49  ;;  %v2456_v49 = vpack.c.bf16 %v16297_v50, %v16297_v50  ;;  %v12982_v57 = vld [vmem:[%s13564_s30 + $0x12ec] sm:$0xff]  }
 0x3a8   : > { %8708 = vmatprep.subr.bf16.mxu0 %v13390_v3 }
 0x3a9   : > { %11925 = vmatpush3.bf16.msra.mxu1 %v12942_v6  ;;  %v12962_v6 = vld [vmem:[%s13564_s30 + $0x11b8] sm:$0xff]  }
 0x3aa   : > { %v11780_v35 = vpop.f32.mrf.mxu0  ;;  %11926 = vmatprep.subr.bf16.mxu1 %v12944_v4  ;;  %v12964_v4 = vld [vmem:[%s13564_s30 + $0x11f0] sm:$0xff]  }
 0x3ab   : > { %8709 = vmatpush2.bf16.msra.mxu0 %v12943_v5  ;;  %v12963_v5 = vld [vmem:[%s13564_s30 + $0x1238] sm:$0xff]  }
 0x3ac   : > { %v11781_v54 = vpop.f32.mrf.mxu0  ;;  %8710 = vmatprep.subr.bf16.mxu0 %v13390_v3 }
 0x3ad   : > { %v11782_v22 = vadd.f32 %v11781_v54, %v11780_v35  ;;  %11927 = vmatpush3.bf16.msra.mxu1 %v12945_v58  ;;  %v16352_v35 = vpop.permute.xlu1 %1779 }
 0x3ae   : > { %v11783_v32 = vpop.f32.mrf.mxu0  ;;  %11928 = vmatprep.subr.bf16.mxu1 %v12947_v33  ;;  %v545_v33 = vmul.f32 %v16357_v14, %v16251_v19  ;;  %v12968_v19 = vld [vmem:[%s13564_s30 + $0x11a8] sm:$0xff]   ;;  %v1816_v30 = vadd.f32 %v16352_v35, %v1624_v11  ;;  %v16446_v11 = vpop.permute.xlu0 %511 }
 0x3af   : > { %8711 = vmatpush2.bf16.msra.mxu0 %v12946_v12  ;;  %v16301_v42 = vadd.f32 %v11782_v22, %v16220_v23  ;;  %v12952_v23 = vld [vmem:[%s13564_s30 + $0x10e4] sm:$0xff]  }
 0x3b0   : > { %v11784_v47 = vpop.f32.mrf.mxu0  ;;  %8712 = vmatprep.subr.bf16.mxu0 %v13390_v3 }
 0x3b1   : > { %11929 = vmatpush3.bf16.msra.mxu1 %v12948_v48 }
 0x3b2   : > { %11930 = vmatprep.subr.bf16.mxu1 %v12950_v28  ;;  %v12970_v28 = vld [vmem:[%s13564_s30 + $0x11e0] sm:$0xff]  }
 0x3b3   : > { %8713 = vmatpush2.bf16.msra.mxu0 %v12949_v25  ;;  %v807_v25 = vmul.f32 %v16381_v8, %v16265_v9  ;;  %v16394_v9 = vld [vmem:[%s16992_s0 + $0x2c] sm:$0xf] }
 0x3b4   : > { %8714 = vmatprep.subr.bf16.mxu0 %v13390_v3  ;;  %v938_v31 = vmul.f32 %v16394_v9, %v16279_v15 }
 0x3b5   : > { %11931 = vmatpush3.bf16.msra.mxu1 %v12951_v62  ;;  %v16388_v62 = vmax.f32 %v1816_v30, 0.0  ;;  %v12986_v30 = vld [vmem:[%s13564_s30 + $0x12a4] sm:$0xff]  }
 0x3b6   : > { %11932 = vmatprep.subr.bf16.mxu1 %v12953_v59 }
 0x3b7   : > { %8715 = vmatpush2.bf16.msra.mxu0 %v12952_v23  ;;  %v12973_v23 = vld [vmem:[%s13564_s30 + $0x11d8] sm:$0xff]  }
 0x3b8   : > { %11940 = vmatprep.subr.bf16.mxu0 %v12955_v44  ;;  %v12972_v44 = vld [vmem:[%s13564_s30 + $0x1220] sm:$0xff]  }
 0x3b9   : > { %11933 = vmatpush3.bf16.msra.mxu1 %v12954_v61  ;;  %v12974_v61 = vld [vmem:[%s13564_s30 + $0x1198] sm:$0xff]  }
 0x3ba   : > { %8717 = vmatmul.mubr.bf16.vlgmr.msra.gmra.mxu0 %v2452_v43  ;;  %9083 = vmatprep.subr.bf16.mxu1 %v13390_v3  ;;  %v1069_v43 = vmul.f32 %v16411_v53, %v16290_v10 }
 0x3bb   : > { %11941 = vmatpush3.bf16.msra.mxu0 %v12956_v56  ;;  %9075 = vmatprep.mubr.bf16.mxu0 %v2457_v34  ;;  %v16405_v56 = vrot.slane %v16388_v62, %v13821_v21 }
 0x3bc   : > { %9036 = vmatmul.mubr.bf16.vlgmr.msra.gmra.mxu1 %v2454_v13  ;;  %11942 = vmatprep.subr.bf16.mxu0 %v12958_v37  ;;  %v12975_v13 = vld [vmem:[%s13564_s30 + $0x1218] sm:$0xff]   ;;  %v12977_v37 = vld [vmem:[%s13564_s30 + $0x1190] sm:$0xff]  }
 0x3bd   : > { %9084 = vmatpush1.bf16.msra.mxu1 %v12957_v20  ;;  %11241 = vmatprep.mubr.msk.bf16.mxu1 %vm4207_vm0, %v2459_v51  ;;  %v2226_v51 = vcombine.high %v16405_v56, %v16405_v56  ;;  %v12979_v20 = vld [vmem:[%s13564_s30 + $0x12f4] sm:$0xff]  }
 0x3be   : > { %9085 = vmatprep.subr.bf16.mxu1 %v13390_v3 }
 0x3bf   : > { %11943 = vmatpush3.bf16.msra.mxu0 %v12959_v16  ;;  %v16424_v16 = vld [vmem:[%s16992_s0 + $0x44] sm:$0xf] }
 0x3c0   : > { %11944 = vmatprep.subr.bf16.mxu0 %v12961_v26  ;;  %v1200_v10 = vmul.f32 %v16424_v16, %v16294_v17  ;;  %v12981_v26 = vld [vmem:[%s13564_s30 + $0x1278] ss:$0 sps:$4 sm:$0xff]   ;;  %v16440_v17 = vld [vmem:[%s16992_s0 + $0x50] sm:$0xf] }
 0x3c1   : > { %9086 = vmatpush1.bf16.msra.mxu1 %v12960_v40  ;;  %v12980_v40 = vld [vmem:[%s13564_s30 + $0x12b4] sm:$0xff]   ;;  %v9001_v50 = vsel %vm4211_vm1, %v12981_v26, 0 }
 0x3c2   : > { %9087 = vmatprep.subr.bf16.mxu1 %v13390_v3 }
 0x3c3   : > { %11945 = vmatpush3.bf16.msra.mxu0 %v12962_v6  ;;  %v2461_v6 = vpack.c.bf16 %v2226_v51, %v2226_v51 }
 0x3c4   : > { %v7521_v58 = vpop.f32.mrf.mxu1  ;;  %11946 = vmatprep.subr.bf16.mxu0 %v12964_v4  ;;  %v16435_v4 = vpop.permute.xlu1 %642 }
 0x3c5   : > { %v7522_v12 = vadd.f32 %v7521_v58, %v16301_v42  ;;  %9088 = vmatpush1.bf16.msra.mxu1 %v12963_v5  ;;  %v708_v42 = vadd.f32 %v676_v36, %v545_v33  ;;  %v12983_v58 = vld [vmem:[%s13564_s30 + $0x12ac] sm:$0xff]  }
 0x3c6   : > { %v7523_v54 = vpop.f32.mrf.mxu1  ;;  %9089 = vmatprep.subr.bf16.mxu1 %v13390_v3  ;;  %v16461_v36 = vld [vmem:[%s16992_s0 + $0xc] sm:$0xff] }
 0x3c7   : > { %v10337_v22 = vsel %vm10321_vm2, %v7522_v12, 0.0  ;;  %11947 = vmatpush3.bf16.msra.mxu0 %v12965_v41  ;;  %v839_v45 = vadd.f32 %v807_v25, %v708_v42  ;;  %v1331_v41 = vmul.f32 %v16440_v17, %v16318_v52  ;;  %v16453_v52 = vld [vmem:[%s16992_s0 + $0x5c] sm:$0xf]  ;;  %v677_v54 = vmul.f32 %v16461_v36, %v16435_v4  ;;  %v16480_v25 = vld [vmem:[%s16992_s0 + $0x68] sm:$0xf] }
 0x3c8   : > { %v16375_v48 = vadd.f32 %v10337_v22, %v16217_v29  ;;  %v7524_v32 = vpop.f32.mrf.mxu1  ;;  %11948 = vmatprep.subr.bf16.mxu0 %v12967_v55  ;;  %v12971_v29 = vld [vmem:[%s13564_s30 + $0x11a0] sm:$0xff]   ;;  %v1462_v12 = vmul.f32 %v16453_v52, %v16331_v18  ;;  %v16473_v18 = vpop.permute.xlu1 %773  ;;  %v1593_v42 = vmul.f32 %v16480_v25, %v16339_v7 }
 0x3c9   : > { %9090 = vmatpush1.bf16.msra.mxu1 %v12966_v60  ;;  %v970_v15 = vadd.f32 %v938_v31, %v839_v45  ;;  %v12985_v55 = vld [vmem:[%s13564_s30 + $0x12e4] sm:$0xff]   ;;  %v12984_v60 = vld [vmem:[%s13564_s30 + $0x1270] sm:$0xff]   ;;  %v12988_v32 = vld [vmem:[%s13564_s30 + $0x12dc] sm:$0xff]  }
 0x3ca   : > { %v7525_v0 = vpop.f32.mrf.mxu1  ;;  %v11802_v47 = vpop.f32.mrf.mxu0  ;;  %9091 = vmatprep.subr.bf16.mxu1 %v13390_v3  ;;  %v16468_v22 = vld [vmem:[%s16992_s0] sm:$0xff]  ;;  %v12991_v45 = vld [vmem:[%s13564_s30 + $0x12d4] sm:$0xff]  }
 0x3cb   : > { %11949 = vmatpush3.bf16.msra.mxu0 %v12968_v19  ;;  %v1101_v27 = vadd.f32 %v1069_v43, %v970_v15  ;;  %v546_v19 = vmul.f32 %v16468_v22, %v16446_v11  ;;  %v16488_v0 = vld [vmem:[%s16992_s0 + $0x18] sm:$0xff]  ;;  %v2211_v43 = vcombine.high %v16388_v62, %v16388_v62  ;;  %v16520_v62 = vld [vmem:[%s16992_s0 + $0x30] sm:$0xff] }
 0x3cc   : > { %v11803_v59 = vpop.f32.mrf.mxu0  ;;  %11950 = vmatprep.subr.bf16.mxu0 %v12970_v28  ;;  %v16497_v31 = vpop.permute.xlu1 %1035 }
 0x3cd   : > { %v16398_v63 = vadd.f32 %v11803_v59, %v11802_v47  ;;  %9092 = vmatpush1.bf16.msra.mxu1 %v12969_v46  ;;  %v1232_v5 = vadd.f32 %v1200_v10, %v1101_v27  ;;  %v12987_v46 = vld [vmem:[%s13564_s30 + $0x1268] sm:$0xff]   ;;  %v808_v47 = vmul.f32 %v16488_v0, %v16473_v18  ;;  %v16493_v59 = vpop.permute.xlu0 %904  ;;  %v12993_v27 = vld [vmem:[%s13564_s30 + $0x1258] sm:$0xff]   ;;  %v1070_v26 = vmul.f32 %v16520_v62, %v16497_v31 }
 0x3ce   : > { %v11805_v39 = vpop.f32.mrf.mxu0  ;;  %9093 = vmatprep.subr.bf16.mxu1 %v13390_v3 }
 0x3cf   : > { %11951 = vmatpush3.bf16.msra.mxu0 %v12971_v29  ;;  %v1363_v33 = vadd.f32 %v1331_v41, %v1232_v5  ;;  %v709_v29 = vadd.f32 %v677_v54, %v546_v19  ;;  %v12990_v39 = vld [vmem:[%s13564_s30 + $0x1260] sm:$0xff]   ;;  %v12996_v41 = vld [vmem:[%s13564_s30 + $0x1250] sm:$0xff]  }
 0x3d0   : > { %v11806_v34 = vpop.f32.mrf.mxu0  ;;  %11952 = vmatprep.subr.bf16.mxu0 %v12973_v23  ;;  %v12989_v23 = vld [vmem:[%s13564_s30 + $0x129c] sm:$0xff]  }
 0x3d1   : > { %9094 = vmatpush1.bf16.msra.mxu1 %v12972_v44  ;;  %v1494_v28 = vadd.f32 %v1462_v12, %v1363_v33  ;;  %v16503_v34 = vld [vmem:[%s16992_s0 + $0x24] sm:$0xff]  ;;  %v12999_v33 = vld [vmem:[%s13564_s30 + $0x1374] sm:$0xff]   ;;  %v16542_v12 = vpop.permute.xlu0 %1297 }
 0x3d2   : > { %9095 = vmatprep.subr.bf16.mxu1 %v13390_v3  ;;  %v13001_v19 = vld [vmem:[%s13564_s30 + $0x12bc] sm:$0xff]  }
 0x3d3   : > { %11953 = vmatpush3.bf16.msra.mxu0 %v12974_v61  ;;  %v1625_v44 = vadd.f32 %v1593_v42, %v1494_v28  ;;  %v840_v61 = vadd.f32 %v808_v47, %v709_v29  ;;  %v13000_v28 = vld [vmem:[%s13564_s30 + $0x1334] sm:$0xff]   ;;  %v2458_v29 = vpack.c.bf16 %v16307_v2, %v16307_v2 }
 0x3d4   : > { %11954 = vmatprep.subr.bf16.mxu0 %v12976_v1  ;;  %v939_v1 = vmul.f32 %v16503_v34, %v16493_v59  ;;  %v16571_v2 = vld [vmem:[%s16992_s0 + $0x54] sm:$0xff] }
 0x3d5   : > { %9096 = vmatpush1.bf16.msra.mxu1 %v12975_v13  ;;  %v1817_v10 = vadd.f32 %v16352_v35, %v1625_v44  ;;  %v16525_v35 = vpop.permute.xlu1 %1166 }
 0x3d6   : > { %9097 = vmatprep.subr.bf16.mxu1 %v13390_v3 }
 0x3d7   : > { %11955 = vmatpush3.bf16.msra.mxu0 %v12977_v37  ;;  %v12992_v37 = vld [vmem:[%s13564_s30 + $0x1294] sm:$0xff]   ;;  %v1849_v5 = vmax.f32 %v1817_v10, 0.0  ;;  %v16586_v10 = vld [vmem:[%s16992_s0 + $0x60] sm:$0xff] }
 0x3d8   : > { %11962 = vmatprep.subr.bf16.mxu0 %v12979_v20  ;;  %v12994_v20 = vld [vmem:[%s13564_s30 + $0x12cc] sm:$0xff]  }
 0x3d9   : > { %9098 = vmatpush1.bf16.msra.mxu1 %v12978_v24 }
 0x3da   : > { %9076 = vmatmul.mubr.bf16.vlgmr.msra.gmra.mxu0 %v2456_v49  ;;  %9103 = vmatprep.subr.bf16.mxu1 %v13390_v3  ;;  %v16528_v49 = vrot.slane %v2211_v43, %v13821_v21 }
 0x3db   : > { %11963 = vmatpush3.bf16.msra.mxu0 %v12980_v40  ;;  %9434 = vmatprep.mubr.bf16.mxu0 %v2461_v6  ;;  %v971_v40 = vadd.f32 %v939_v1, %v840_v61 }
 0x3dc   : > { %11964 = vmatprep.subr.bf16.mxu0 %v12982_v57  ;;  %v12997_v57 = vld [vmem:[%s13564_s30 + $0x12c4] sm:$0xff]   ;;  %v2227_v54 = vcombine.high %v16528_v49, %v16528_v49 }
 0x3dd   : > { %9104 = vmatpush2.bf16.msra.mxu1 %v9001_v50  ;;  %v1102_v50 = vadd.f32 %v1070_v26, %v971_v40  ;;  %v13008_v40 = vld [vmem:[%s13564_s30 + $0x13ac] sm:$0xff]  }
 0x3de   : > { %9105 = vmatprep.subr.bf16.mxu1 %v13390_v3 }
 0x3df   : > { %11965 = vmatpush3.bf16.msra.mxu0 %v12983_v58  ;;  %v16536_v58 = vld [vmem:[%s16992_s0 + $0x3c] sm:$0xff] }
 0x3e0   : > { %11966 = vmatprep.subr.bf16.mxu0 %v12985_v55  ;;  %v1201_v55 = vmul.f32 %v16536_v58, %v16525_v35 }
 0x3e1   : > { %9106 = vmatpush2.bf16.msra.mxu1 %v12984_v60  ;;  %v12998_v60 = vld [vmem:[%s13564_s30 + $0x1284] sm:$0xff]  }
 0x3e2   : > { %9107 = vmatprep.subr.bf16.mxu1 %v13390_v3  ;;  %v1233_v42 = vadd.f32 %v1201_v55, %v1102_v50  ;;  %v16600_v50 = vpop.permute.xlu0 %1783  ;;  %v13011_v55 = vld [vmem:[%s13564_s30 + $0x13a4] sm:$0xff]  }
 0x3e3   : > { %11967 = vmatpush3.bf16.msra.mxu0 %v12986_v30  ;;  %v16548_v30 = vpop.permute.xlu1 %1428 }
 0x3e4   : > { %v11824_v7 = vpop.f32.mrf.mxu1  ;;  %11968 = vmatprep.subr.bf16.mxu0 %v12988_v32  ;;  %v16551_v32 = vrot.slane %v1849_v5, %v13821_v21  ;;  %v1463_v61 = vmul.f32 %v16571_v2, %v16548_v30 }
 0x3e5   : > { %9108 = vmatpush2.bf16.msra.mxu1 %v12987_v46  ;;  %v16557_v46 = vld [vmem:[%s16992_s0 + $0x48] sm:$0xff] }
 0x3e6   : > { %v11825_v15 = vpop.f32.mrf.mxu1  ;;  %9109 = vmatprep.subr.bf16.mxu1 %v13390_v3  ;;  %v1332_v47 = vmul.f32 %v16557_v46, %v16542_v12  ;;  %v2235_v44 = vcombine.high %v16551_v32, %v16551_v32 }
 0x3e7   : > { %v11826_v13 = vadd.f32 %v11825_v15, %v11824_v7  ;;  %11969 = vmatpush3.bf16.msra.mxu0 %v12989_v23  ;;  %v13003_v23 = vld [vmem:[%s13564_s30 + $0x136c] sm:$0xff]   ;;  %v2463_v7 = vpack.c.bf16 %v2227_v54, %v2227_v54  ;;  %v13006_v15 = vld [vmem:[%s13564_s30 + $0x1364] sm:$0xff]   ;;  %v16576_v43 = vpop.permute.xlu1 %1559 }
 0x3e8   : > { %v11827_v51 = vpop.f32.mrf.mxu1  ;;  %11970 = vmatprep.subr.bf16.mxu0 %v12991_v45  ;;  %v13002_v45 = vld [vmem:[%s13564_s30 + $0x127c] sm:$0xff]   ;;  %v1364_v1 = vadd.f32 %v1332_v47, %v1233_v42 }
 0x3e9   : > { %9110 = vmatpush2.bf16.msra.mxu1 %v12990_v39  ;;  %v16515_v24 = vadd.f32 %v11826_v13, %v16398_v63  ;;  %v12995_v63 = vld [vmem:[%s13564_s30 + $0x128c] sm:$0xff]   ;;  %v13005_v13 = vld [vmem:[%s13564_s30 + $0x13b4] sm:$0xff]   ;;  %v2465_v51 = vpack.c.bf16 %v2235_v44, %v2235_v44  ;;  %v13014_v42 = vld [vmem:[%s13564_s30 + $0x139c] sm:$0xff]  }
 0x3ea   : > { %v11828_v6 = vpop.f32.mrf.mxu1  ;;  %9111 = vmatprep.subr.bf16.mxu1 %v13390_v3  ;;  %v13004_v39 = vld [vmem:[%s13564_s30 + $0x132c] sm:$0xff]   ;;  %v1495_v26 = vadd.f32 %v1463_v61, %v1364_v1  ;;  %v13018_v1 = vld [vmem:[%s13564_s30 + $0x1344] sm:$0xff]  }
 0x3eb   : > { %11971 = vmatpush3.bf16.msra.mxu0 %v12992_v37  ;;  %v2460_v37 = vpack.c.bf16 %v16405_v56, %v16405_v56  ;;  %v13009_v56 = vld [vmem:[%s13564_s30 + $0x135c] sm:$0xff]  }
 0x3ec   : > { %11972 = vmatprep.subr.bf16.mxu0 %v12994_v20  ;;  %v13007_v20 = vld [vmem:[%s13564_s30 + $0x1324] sm:$0xff]   ;;  %v13010_v6 = vld [vmem:[%s13564_s30 + $0x131c] sm:$0xff]  }
 0x3ed   : > { %9112 = vmatpush2.bf16.msra.mxu1 %v12993_v27  ;;  %v1594_v27 = vmul.f32 %v16586_v10, %v16576_v43 }
 0x3ee   : > { %9113 = vmatprep.subr.bf16.mxu1 %v13390_v3 }
 0x3ef   : > { %11973 = vmatpush3.bf16.msra.mxu0 %v12995_v63  ;;  %v678_v63 = vmul.f32 %v16366_v38, %v16435_v4  ;;  %v1626_v5 = vadd.f32 %v1594_v27, %v1495_v26  ;;  %v809_v4 = vmul.f32 %v16381_v8, %v16473_v18  ;;  %v13016_v18 = vld [vmem:[%s13564_s30 + $0x130c] sm:$0xff]  }
 0x3f0   : > { %11974 = vmatprep.subr.bf16.mxu0 %v12997_v57  ;;  %v547_v57 = vmul.f32 %v16357_v14, %v16446_v11 }
 0x3f1   : > { %9114 = vmatpush2.bf16.msra.mxu1 %v12996_v41  ;;  %v13012_v41 = vld [vmem:[%s13564_s30 + $0x1354] sm:$0xff]   ;;  %v1818_v54 = vadd.f32 %v16600_v50, %v1626_v5  ;;  %v13024_v5 = vld [vmem:[%s13564_s30 + $0x1460] sm:$0xff]  }
 0x3f2   : > { %11984 = vmatprep.subr.bf16.mxu1 %v12999_v33  ;;  %v13013_v33 = vld [vmem:[%s13564_s30 + $0x1314] sm:$0xff]  }
 0x3f3   : > { %11975 = vmatpush3.bf16.msra.mxu0 %v12998_v60  ;;  %v710_v60 = vadd.f32 %v678_v63, %v547_v57  ;;  %v16616_v44 = vmax.f32 %v1818_v54, 0.0  ;;  %v13027_v54 = vld [vmem:[%s13564_s30 + $0x1458] sm:$0xff]  }
 0x3f4   : > { %9116 = vmatmul.mubr.bf16.vlgmr.msra.gmra.mxu1 %v2458_v29  ;;  %11976 = vmatprep.subr.bf16.mxu0 %v13001_v19  ;;  %v13015_v19 = vld [vmem:[%s13564_s30 + $0x134c] sm:$0xff]  }
 0x3f5   : > { %11985 = vmatpush3.bf16.msra.mxu1 %v13000_v28  ;;  %9474 = vmatprep.mubr.bf16.mxu1 %v2463_v7  ;;  %v841_v7 = vadd.f32 %v809_v4, %v710_v60  ;;  %v16631_v27 = vrot.slane %v16616_v44, %v13821_v21  ;;  %v1333_v4 = vmul.f32 %v16440_v17, %v16542_v12 }
 0x3f6   : > { %11986 = vmatprep.subr.bf16.mxu1 %v13003_v23  ;;  %v1464_v12 = vmul.f32 %v16453_v52, %v16548_v30 }
 0x3f7   : > { %11977 = vmatpush3.bf16.msra.mxu0 %v13002_v45  ;;  %v940_v45 = vmul.f32 %v16394_v9, %v16493_v59  ;;  %v13019_v59 = vld [vmem:[%s13564_s30 + $0x1304] sm:$0xff]   ;;  %v2251_v57 = vcombine.high %v16631_v27, %v16631_v27 }
 0x3f8   : > { %9482 = vmatprep.subr.bf16.mxu0 %v13390_v3 }
 0x3f9   : > { %11987 = vmatpush3.bf16.msra.mxu1 %v13004_v39  ;;  %v2467_v60 = vpack.c.bf16 %v2251_v57, %v2251_v57 }
 0x3fa   : > { %9435 = vmatmul.mubr.bf16.vlgmr.msra.gmra.mxu0 %v2460_v37  ;;  %11988 = vmatprep.subr.bf16.mxu1 %v13006_v15 }
 0x3fb   : > { %9483 = vmatpush1.bf16.msra.mxu0 %v13005_v13  ;;  %11288 = vmatprep.mubr.msk.bf16.mxu0 %vm4207_vm0, %v2465_v51  ;;  %v13017_v13 = vld [vmem:[%s13564_s30 + $0x1394] sm:$0xff]  }
 0x3fc   : > { %9484 = vmatprep.subr.bf16.mxu0 %v13390_v3 }
 0x3fd   : > { %11989 = vmatpush3.bf16.msra.mxu1 %v13007_v20  ;;  %v972_v20 = vadd.f32 %v940_v45, %v841_v7  ;;  %v1595_v7 = vmul.f32 %v16480_v25, %v16576_v43  ;;  %v13033_v45 = vld [vmem:[%s13564_s30 + $0x1448] sm:$0xff]  }
 0x3fe   : > { %11990 = vmatprep.subr.bf16.mxu1 %v13009_v56  ;;  %v13021_v56 = vld [vmem:[%s13564_s30 + $0x133c] sm:$0xff]   ;;  %v13034_v43 = vld [vmem:[%s13564_s30 + $0x1408] sm:$0xff]  }
 0x3ff   : > { %9485 = vmatpush1.bf16.msra.mxu0 %v13008_v40  ;;  %v13020_v40 = vld [vmem:[%s13564_s30 + $0x138c] sm:$0xff]  }
 0x400   : > { %9486 = vmatprep.subr.bf16.mxu0 %v13390_v3 }
 0x401   : > { %11991 = vmatpush3.bf16.msra.mxu1 %v13010_v6  ;;  %v13022_v6 = vld [vmem:[%s13564_s30 + $0x12fc] sm:$0xff]  }
 0x402   : > { %v7920_v11 = vpop.f32.mrf.mxu0  ;;  %11992 = vmatprep.subr.bf16.mxu1 %v13012_v41  ;;  %v13023_v41 = vld [vmem:[%s13564_s30 + $0x1384] sm:$0xff]  }
 0x403   : > { %v7921_v28 = vadd.f32 %v7920_v11, %v16515_v24  ;;  %9487 = vmatpush1.bf16.msra.mxu0 %v13011_v55  ;;  %v13025_v55 = vld [vmem:[%s13564_s30 + $0x1420] sm:$0xff]   ;;  %v16650_v11 = vpop.permute.xlu1 %515 }
 0x404   : > { %v7922_v47 = vpop.f32.mrf.mxu0  ;;  %v11846_v29 = vpop.f32.mrf.mxu1  ;;  %9488 = vmatprep.subr.bf16.mxu0 %v13390_v3 }
 0x405   : > { %v10339_v23 = vsel %vm10321_vm2, %v7921_v28, 0.0  ;;  %11993 = vmatpush3.bf16.msra.mxu1 %v13013_v33  ;;  %v13029_v28 = vld [vmem:[%s13564_s30 + $0x13e4] ss:$0 sps:$4 sm:$0xff]  }
 0x406   : > { %v16619_v24 = vadd.f32 %v10339_v23, %v16375_v48  ;;  %v7923_v39 = vpop.f32.mrf.mxu0  ;;  %v11847_v61 = vpop.f32.mrf.mxu1  ;;  %11994 = vmatprep.subr.bf16.mxu1 %v13015_v19  ;;  %v1071_v48 = vmul.f32 %v16411_v53, %v16497_v31  ;;  %v1202_v31 = vmul.f32 %v16424_v16, %v16525_v35  ;;  %v2462_v35 = vpack.c.bf16 %v16528_v49, %v16528_v49  ;;  %v13026_v19 = vld [vmem:[%s13564_s30 + $0x137c] sm:$0xff]   ;;  %v13030_v49 = vld [vmem:[%s13564_s30 + $0x1450] sm:$0xff]  }
 0x407   : > { %v16622_v15 = vadd.f32 %v11847_v61, %v11846_v29  ;;  %9489 = vmatpush1.bf16.msra.mxu0 %v13014_v42  ;;  %v13028_v42 = vld [vmem:[%s13564_s30 + $0x1418] sm:$0xff]   ;;  %v9400_v29 = vsel %vm4211_vm1, %v13029_v28, 0  ;;  %v16661_v23 = vpop.permute.xlu1 %646  ;;  %v548_v61 = vmul.f32 %v16468_v22, %v16650_v11 }
 0x408   : > { %v7924_v37 = vpop.f32.mrf.mxu0  ;;  %v11849_v51 = vpop.f32.mrf.mxu1  ;;  %9490 = vmatprep.subr.bf16.mxu0 %v13390_v3  ;;  %v1103_v63 = vadd.f32 %v1071_v48, %v972_v20  ;;  %v13032_v39 = vld [vmem:[%s13564_s30 + $0x13dc] sm:$0xff]   ;;  %v13035_v48 = vld [vmem:[%s13564_s30 + $0x13d4] sm:$0xff]  }
 0x409   : > { %11995 = vmatpush3.bf16.msra.mxu1 %v13016_v18  ;;  %v13031_v18 = vld [vmem:[%s13564_s30 + $0x1410] sm:$0xff]   ;;  %v13036_v51 = vld [vmem:[%s13564_s30 + $0x1440] sm:$0xff]  }
 0x40a   : > { %v11850_v26 = vpop.f32.mrf.mxu1  ;;  %11996 = vmatprep.subr.bf16.mxu1 %v13018_v1  ;;  %v1234_v33 = vadd.f32 %v1202_v31, %v1103_v63  ;;  %v679_v1 = vmul.f32 %v16461_v36, %v16661_v23  ;;  %v13037_v36 = vld [vmem:[%s13564_s30 + $0x1400] sm:$0xff]   ;;  %v2236_v63 = vcombine.high %v16616_v44, %v16616_v44 }
 0x40b   : > { %9491 = vmatpush1.bf16.msra.mxu0 %v13017_v13  ;;  %v16673_v13 = vpop.permute.xlu0 %777 }
 0x40c   : > { %9492 = vmatprep.subr.bf16.mxu0 %v13390_v3  ;;  %v1365_v47 = vadd.f32 %v1333_v4, %v1234_v33  ;;  %v711_v22 = vadd.f32 %v679_v1, %v548_v61  ;;  %v810_v20 = vmul.f32 %v16488_v0, %v16673_v13  ;;  %v13042_v4 = vld [vmem:[%s13564_s30 + $0x1430] sm:$0xff]   ;;  %v16697_v44 = vrot.slane %v2236_v63, %v13821_v21  ;;  %v13056_v63 = vld [vmem:[%s13564_s30 + $0x14c8] sm:$0xff]  }
 0x40d   : > { %11997 = vmatpush3.bf16.msra.mxu1 %v13019_v59  ;;  %v16677_v59 = vpop.permute.xlu1 %908 }
 0x40e   : > { %11998 = vmatprep.subr.bf16.mxu1 %v13021_v56  ;;  %v1496_v30 = vadd.f32 %v1464_v12, %v1365_v47  ;;  %v941_v0 = vmul.f32 %v16503_v34, %v16677_v59  ;;  %v842_v31 = vadd.f32 %v810_v20, %v711_v22  ;;  %v13041_v34 = vld [vmem:[%s13564_s30 + $0x13c4] sm:$0xff]   ;;  %v13043_v12 = vld [vmem:[%s13564_s30 + $0x13f0] sm:$0xff]  }
 0x40f   : > { %9493 = vmatpush1.bf16.msra.mxu0 %v13020_v40  ;;  %v13039_v40 = vld [vmem:[%s13564_s30 + $0x1438] sm:$0xff]   ;;  %v16706_v28 = vpop.permute.xlu0 %1170  ;;  %v13049_v20 = vld [vmem:[%s13564_s30 + $0x1520] sm:$0xff]  }
 0x410   : > { %9494 = vmatprep.subr.bf16.mxu0 %v13390_v3  ;;  %v1627_v37 = vadd.f32 %v1595_v7, %v1496_v30  ;;  %v13047_v7 = vld [vmem:[%s13564_s30 + $0x14e0] sm:$0xff]  }
 0x411   : > { %11999 = vmatpush3.bf16.msra.mxu1 %v13022_v6  ;;  %v13038_v6 = vld [vmem:[%s13564_s30 + $0x13cc] sm:$0xff]  }
 0x412   : > { %12006 = vmatprep.subr.bf16.mxu1 %v13024_v5  ;;  %v1819_v26 = vadd.f32 %v16600_v50, %v1627_v37  ;;  %v16692_v5 = vpop.permute.xlu1 %1039  ;;  %v2466_v37 = vpack.c.bf16 %v16631_v27, %v16631_v27 }
 0x413   : > { %9495 = vmatpush1.bf16.msra.mxu0 %v13023_v41  ;;  %v13040_v41 = vld [vmem:[%s13564_s30 + $0x13f8] sm:$0xff]  }
 0x414   : > { %9475 = vmatmul.mubr.bf16.vlgmr.msra.gmra.mxu1 %v2462_v35  ;;  %9496 = vmatprep.subr.bf16.mxu0 %v13390_v3  ;;  %v973_v35 = vadd.f32 %v941_v0, %v842_v31  ;;  %v13055_v0 = vld [vmem:[%s13564_s30 + $0x1510] sm:$0xff]   ;;  %v13057_v31 = vld [vmem:[%s13564_s30 + $0x1488] sm:$0xff]  }
 0x415   : > { %12007 = vmatpush3.bf16.msra.mxu1 %v13025_v55  ;;  %9833 = vmatprep.mubr.bf16.mxu1 %v2467_v60  ;;  %v1851_v55 = vmax.f32 %v1819_v26, 0.0  ;;  %v16741_v26 = vpop.permute.xlu0 %1563 }
 0x416   : > { %12008 = vmatprep.subr.bf16.mxu1 %v13027_v54  ;;  %v1072_v54 = vmul.f32 %v16520_v62, %v16692_v5  ;;  %v16713_v47 = vpop.permute.xlu1 %1301  ;;  %v2252_v62 = vcombine.high %v16697_v44, %v16697_v44 }
 0x417   : > { %9497 = vmatpush1.bf16.msra.mxu0 %v13026_v19  ;;  %v1334_v1 = vmul.f32 %v16557_v46, %v16713_v47  ;;  %v13051_v46 = vld [vmem:[%s13564_s30 + $0x1498] sm:$0xff]  }
 0x418   : > { %9502 = vmatprep.subr.bf16.mxu0 %v13390_v3  ;;  %v2469_v61 = vpack.c.bf16 %v2252_v62, %v2252_v62 }
 0x419   : > { %12009 = vmatpush3.bf16.msra.mxu1 %v13028_v42  ;;  %v16709_v42 = vrot.slane %v1851_v55, %v13821_v21 }
 0x41a   : > { %12010 = vmatprep.subr.bf16.mxu1 %v13030_v49  ;;  %v13044_v49 = vld [vmem:[%s13564_s30 + $0x13bc] sm:$0xff]  }
 0x41b   : > { %9503 = vmatpush2.bf16.msra.mxu0 %v9400_v29  ;;  %v1104_v29 = vadd.f32 %v1072_v54, %v973_v35  ;;  %v2260_v30 = vcombine.high %v16709_v42, %v16709_v42 }
 0x41c   : > { %9504 = vmatprep.subr.bf16.mxu0 %v13390_v3 }
 0x41d   : > { %12011 = vmatpush3.bf16.msra.mxu1 %v13031_v18  ;;  %v1203_v18 = vmul.f32 %v16536_v58, %v16706_v28  ;;  %v2464_v58 = vpack.c.bf16 %v16551_v32, %v16551_v32  ;;  %v2471_v22 = vpack.c.bf16 %v2260_v30, %v2260_v30 }
 0x41e   : > { %12012 = vmatprep.subr.bf16.mxu1 %v13033_v45  ;;  %v13046_v45 = vld [vmem:[%s13564_s30 + $0x13e8] sm:$0xff]  }
 0x41f   : > { %9505 = vmatpush2.bf16.msra.mxu0 %v13032_v39  ;;  %v13048_v39 = vld [vmem:[%s13564_s30 + $0x14a0] sm:$0xff]  }
 0x420   : > { %9506 = vmatprep.subr.bf16.mxu0 %v13390_v3 }
 0x421   : > { %12013 = vmatpush3.bf16.msra.mxu1 %v13034_v43  ;;  %v1235_v43 = vadd.f32 %v1203_v18, %v1104_v29  ;;  %v13063_v29 = vld [vmem:[%s13564_s30 + $0x1478] sm:$0xff]  }
 0x422   : > { %v11868_v56 = vpop.f32.mrf.mxu0  ;;  %12014 = vmatprep.subr.bf16.mxu1 %v13036_v51  ;;  %v13050_v51 = vld [vmem:[%s13564_s30 + $0x14d8] sm:$0xff]  }
 0x423   : > { %9507 = vmatpush2.bf16.msra.mxu0 %v13035_v48  ;;  %v16733_v48 = vpop.permute.xlu1 %1432  ;;  %v1366_v32 = vadd.f32 %v1334_v1, %v1235_v43 }
 0x424   : > { %v11869_v57 = vpop.f32.mrf.mxu0  ;;  %9508 = vmatprep.subr.bf16.mxu0 %v13390_v3  ;;  %v1465_v27 = vmul.f32 %v16571_v2, %v16733_v48  ;;  %v1596_v2 = vmul.f32 %v16586_v10, %v16741_v26  ;;  %v549_v10 = vmul.f32 %v16357_v14, %v16650_v11  ;;  %v13062_v14 = vld [vmem:[%s13564_s30 + $0x14b8] sm:$0xff]   ;;  %v13061_v11 = vld [vmem:[%s13564_s30 + $0x1500] sm:$0xff]  }
 0x425   : > { %v11870_v50 = vadd.f32 %v11869_v57, %v11868_v56  ;;  %12015 = vmatpush3.bf16.msra.mxu1 %v13037_v36  ;;  %v13053_v36 = vld [vmem:[%s13564_s30 + $0x14d0] sm:$0xff]   ;;  %v13052_v56 = vld [vmem:[%s13564_s30 + $0x1518] sm:$0xff]  }
 0x426   : > { %v11871_v33 = vpop.f32.mrf.mxu0  ;;  %12016 = vmatprep.subr.bf16.mxu1 %v13039_v40  ;;  %v13054_v40 = vld [vmem:[%s13564_s30 + $0x1490] sm:$0xff]  }
 0x427   : > { %9509 = vmatpush2.bf16.msra.mxu0 %v13038_v6  ;;  %v16701_v60 = vadd.f32 %v11870_v50, %v16622_v15  ;;  %v13045_v15 = vld [vmem:[%s13564_s30 + $0x1428] sm:$0xff]   ;;  %v1497_v6 = vadd.f32 %v1465_v27, %v1366_v32  ;;  %v16754_v55 = vpop.permute.xlu1 %1787  ;;  %v1204_v32 = vmul.f32 %v16424_v16, %v16706_v28 }
 0x428   : > { %v11872_v19 = vpop.f32.mrf.mxu0  ;;  %9510 = vmatprep.subr.bf16.mxu0 %v13390_v3  ;;  %v13070_v27 = vld [vmem:[%s13564_s30 + $0x14e8] sm:$0xff]  }
 0x429   : > { %12017 = vmatpush3.bf16.msra.mxu1 %v13040_v41  ;;  %v1628_v57 = vadd.f32 %v1596_v2, %v1497_v6  ;;  %v13059_v41 = vld [vmem:[%s13564_s30 + $0x14c0] sm:$0xff]   ;;  %v1335_v6 = vmul.f32 %v16440_v17, %v16713_v47  ;;  %v1466_v17 = vmul.f32 %v16453_v52, %v16733_v48  ;;  %v13076_v47 = vld [vmem:[%s13564_s30 + $0x1548] sm:$0xff]   ;;  %v13081_v52 = vld [vmem:[%s13564_s30 + $0x1574] sm:$0xff]  }
 0x42a   : > { %12018 = vmatprep.subr.bf16.mxu1 %v13042_v4  ;;  %v13058_v4 = vld [vmem:[%s13564_s30 + $0x1508] sm:$0xff]   ;;  %v13060_v19 = vld [vmem:[%s13564_s30 + $0x1480] sm:$0xff]  }
 0x42b   : > { %9511 = vmatpush2.bf16.msra.mxu0 %v13041_v34  ;;  %v680_v34 = vmul.f32 %v16366_v38, %v16661_v23  ;;  %v811_v23 = vmul.f32 %v16381_v8, %v16673_v13  ;;  %v942_v8 = vmul.f32 %v16394_v9, %v16677_v59  ;;  %v13064_v13 = vld [vmem:[%s13564_s30 + $0x14f8] sm:$0xff]   ;;  %v1073_v59 = vmul.f32 %v16411_v53, %v16692_v5  ;;  %v13073_v53 = vld [vmem:[%s13564_s30 + $0x1550] ss:$0 sps:$4 sm:$0xff]   ;;  %v13075_v28 = vld [vmem:[%s13564_s30 + $0x1584] sm:$0xff]  }
 0x42c   : > { %9512 = vmatprep.subr.bf16.mxu0 %v13390_v3  ;;  %v13072_v5 = vld [vmem:[%s13564_s30 + $0x158c] sm:$0xff]   ;;  %v9799_v16 = vsel %vm4211_vm1, %v13073_v53, 0  ;;  %v13107_v53 = vld [vmem:[%s13564_s30 + $0x1624] sm:$0xff]  }
 0x42d   : > { %12019 = vmatpush3.bf16.msra.mxu1 %v13043_v12  ;;  %v1820_v12 = vadd.f32 %v16754_v55, %v1628_v57  ;;  %v712_v38 = vadd.f32 %v680_v34, %v549_v10 }
 0x42e   : > { %12020 = vmatprep.subr.bf16.mxu1 %v13045_v15 }
 0x42f   : > { %9513 = vmatpush2.bf16.msra.mxu0 %v13044_v49 }
 0x430   : > { %12028 = vmatprep.subr.bf16.mxu0 %v13047_v7  ;;  %v13065_v7 = vld [vmem:[%s13564_s30 + $0x14b0] sm:$0xff]  }
 0x431   : > { %12021 = vmatpush3.bf16.msra.mxu1 %v13046_v45  ;;  %v843_v45 = vadd.f32 %v811_v23, %v712_v38  ;;  %v13087_v23 = vld [vmem:[%s13564_s30 + $0x1564] sm:$0xff]  }
 0x432   : > { %9515 = vmatmul.mubr.bf16.vlgmr.msra.gmra.mxu0 %v2464_v58  ;;  %9881 = vmatprep.subr.bf16.mxu1 %v13390_v3  ;;  %v13068_v58 = vld [vmem:[%s13564_s30 + $0x14a8] sm:$0xff]  }
 0x433   : > { %12029 = vmatpush3.bf16.msra.mxu0 %v13048_v39  ;;  %9873 = vmatprep.mubr.bf16.mxu0 %v2469_v61  ;;  %v13066_v61 = vld [vmem:[%s13564_s30 + $0x1470] sm:$0xff]   ;;  %v974_v9 = vadd.f32 %v942_v8, %v843_v45  ;;  %v13095_v45 = vld [vmem:[%s13564_s30 + $0x1644] sm:$0xff]  }
 0x434   : > { %9834 = vmatmul.mubr.bf16.vlgmr.msra.gmra.mxu1 %v2466_v37  ;;  %12030 = vmatprep.subr.bf16.mxu0 %v13050_v51  ;;  %v13067_v37 = vld [vmem:[%s13564_s30 + $0x14f0] sm:$0xff]   ;;  %v13069_v51 = vld [vmem:[%s13564_s30 + $0x1468] sm:$0xff]  }
 0x435   : > { %9882 = vmatpush1.bf16.msra.mxu1 %v13049_v20  ;;  %11335 = vmatprep.mubr.msk.bf16.mxu1 %vm4207_vm0, %v2471_v22  ;;  %v13071_v20 = vld [vmem:[%s13564_s30 + $0x15cc] sm:$0xff]  }
 0x436   : > { %9883 = vmatprep.subr.bf16.mxu1 %v13390_v3  ;;  %v13092_v8 = vld [vmem:[%s13564_s30 + $0x160c] sm:$0xff]  }
 0x437   : > { %12031 = vmatpush3.bf16.msra.mxu0 %v13051_v46  ;;  %v1105_v46 = vadd.f32 %v1073_v59, %v974_v9 }
 0x438   : > { %12032 = vmatprep.subr.bf16.mxu0 %v13053_v36 }
 0x439   : > { %9884 = vmatpush1.bf16.msra.mxu1 %v13052_v56  ;;  %v2468_v56 = vpack.c.bf16 %v16697_v44, %v16697_v44  ;;  %v1236_v2 = vadd.f32 %v1204_v32, %v1105_v46  ;;  %v13077_v44 = vld [vmem:[%s13564_s30 + $0x15bc] sm:$0xff]   ;;  %v13105_v32 = vld [vmem:[%s13564_s30 + $0x15ec] sm:$0xff]  }
 0x43a   : > { %9885 = vmatprep.subr.bf16.mxu1 %v13390_v3  ;;  %v13103_v46 = vld [vmem:[%s13564_s30 + $0x167c] sm:$0xff]  }
 0x43b   : > { %12033 = vmatpush3.bf16.msra.mxu0 %v13054_v40  ;;  %v13074_v40 = vld [vmem:[%s13564_s30 + $0x15c4] sm:$0xff]  }
 0x43c   : > { %v8319_v50 = vpop.f32.mrf.mxu1  ;;  %12034 = vmatprep.subr.bf16.mxu0 %v13056_v63  ;;  %v1367_v63 = vadd.f32 %v1335_v6, %v1236_v2  ;;  %v13108_v2 = vld [vmem:[%s13564_s30 + $0x15e4] sm:$0xff]  }
 0x43d   : > { %v8320_v33 = vadd.f32 %v8319_v50, %v16701_v60  ;;  %9886 = vmatpush1.bf16.msra.mxu1 %v13055_v0  ;;  %v13078_v0 = vld [vmem:[%s13564_s30 + $0x157c] sm:$0xff]   ;;  %v1597_v50 = vmul.f32 %v16480_v25, %v16741_v26 }
 0x43e   : > { %v8321_v35 = vpop.f32.mrf.mxu1  ;;  %9887 = vmatprep.subr.bf16.mxu1 %v13390_v3  ;;  %v1498_v57 = vadd.f32 %v1466_v17, %v1367_v63  ;;  %v13110_v63 = vld [vmem:[%s13564_s30 + $0x161c] sm:$0xff]  }
 0x43f   : > { %v10341_v54 = vsel %vm10321_vm2, %v8320_v33, 0.0  ;;  %12035 = vmatpush3.bf16.msra.mxu0 %v13057_v31  ;;  %v13080_v31 = vld [vmem:[%s13564_s30 + $0x15b4] sm:$0xff]   ;;  %v13083_v33 = vld [vmem:[%s13564_s30 + $0x15ac] sm:$0xff]  }
 0x440   : > { %v16767_v60 = vadd.f32 %v10341_v54, %v16619_v24  ;;  %v8322_v15 = vpop.f32.mrf.mxu1  ;;  %12036 = vmatprep.subr.bf16.mxu0 %v13059_v41  ;;  %v16775_v24 = vmax.f32 %v1820_v12, 0.0  ;;  %v13079_v41 = vld [vmem:[%s13564_s30 + $0x1540] sm:$0xff]   ;;  %v1629_v10 = vadd.f32 %v1597_v50, %v1498_v57  ;;  %v13084_v35 = vld [vmem:[%s13564_s30 + $0x156c] sm:$0xff]   ;;  %v13113_v50 = vld [vmem:[%s13564_s30 + $0x1614] sm:$0xff]  }
 0x441   : > { %9888 = vmatpush1.bf16.msra.mxu1 %v13058_v4  ;;  %v13082_v4 = vld [vmem:[%s13564_s30 + $0x1538] sm:$0xff]   ;;  %v13085_v15 = vld [vmem:[%s13564_s30 + $0x1530] sm:$0xff]  }
 0x442   : > { %v8323_v49 = vpop.f32.mrf.mxu1  ;;  %v11890_v62 = vpop.f32.mrf.mxu0  ;;  %9889 = vmatprep.subr.bf16.mxu1 %v13390_v3  ;;  %v16787_v1 = vrot.slane %v16775_v24, %v13821_v21  ;;  %v2261_v25 = vcombine.high %v16775_v24, %v16775_v24  ;;  %v1821_v12 = vadd.f32 %v16754_v55, %v1629_v10  ;;  %v13088_v55 = vld [vmem:[%s13564_s30 + $0x1528] sm:$0xff]   ;;  %v13090_v24 = vld [vmem:[%s13564_s30 + $0x155c] sm:$0xff]   ;;  %v13116_v10 = vld [vmem:[%s13564_s30 + $0x1654] sm:$0xff]  }
 0x443   : > { %12037 = vmatpush3.bf16.msra.mxu0 %v13060_v19  ;;  %v13086_v19 = vld [vmem:[%s13564_s30 + $0x15a4] sm:$0xff]   ;;  %v13089_v49 = vld [vmem:[%s13564_s30 + $0x159c] sm:$0xff]  }
 0x444   : > { %v11891_v18 = vpop.f32.mrf.mxu0  ;;  %12038 = vmatprep.subr.bf16.mxu0 %v13062_v14  ;;  %v2276_v22 = vcombine.high %v16787_v1, %v16787_v1  ;;  %v2472_v9 = vpack.c.bf16 %v16787_v1, %v16787_v1  ;;  %v13102_v1 = vld [vmem:[%s13564_s30 + $0x15f4] sm:$0xff]   ;;  %v13111_v57 = vld [vmem:[%s13564_s30 + $0x15dc] sm:$0xff]  }
 0x445   : > { %v16778_v30 = vadd.f32 %v11891_v18, %v11890_v62  ;;  %9890 = vmatpush1.bf16.msra.mxu1 %v13061_v11  ;;  %v16836_v11 = vrot.slane %v2261_v25, %v13821_v21  ;;  %v1853_v62 = vmax.f32 %v1821_v12, 0.0  ;;  %v13118_v25 = vld [vmem:[%s13564_s30 + $0x16b4] sm:$0xff]  }
 0x446   : > { %v11893_v39 = vpop.f32.mrf.mxu0  ;;  %9891 = vmatprep.subr.bf16.mxu1 %v13390_v3  ;;  %v2473_v36 = vpack.c.bf16 %v2276_v22, %v2276_v22  ;;  %v13100_v22 = vld [vmem:[%s13564_s30 + $0x1684] sm:$0xff]  }
 0x447   : > { %12039 = vmatpush3.bf16.msra.mxu0 %v13063_v29  ;;  %v13091_v29 = vld [vmem:[%s13564_s30 + $0x164c] sm:$0xff]   ;;  %v2277_v18 = vcombine.high %v16836_v11, %v16836_v11 }
 0x448   : > { %v11894_v43 = vpop.f32.mrf.mxu0  ;;  %12040 = vmatprep.subr.bf16.mxu0 %v13065_v7  ;;  %v13093_v7 = vld [vmem:[%s13564_s30 + $0x1594] sm:$0xff]  }
 0x449   : > { %9892 = vmatpush1.bf16.msra.mxu1 %v13064_v13  ;;  %v2470_v13 = vpack.c.bf16 %v16709_v42, %v16709_v42  ;;  %v2475_v39 = vpack.c.bf16 %v2277_v18, %v2277_v18  ;;  %v13096_v43 = vld [vmem:[%s13564_s30 + $0x1604] sm:$0xff]   ;;  %v13097_v42 = vld [vmem:[%s13564_s30 + $0x168c] sm:$0xff]  }
 0x44a   : > { %9893 = vmatprep.subr.bf16.mxu1 %v13390_v3 }
 0x44b   : > { %12041 = vmatpush3.bf16.msra.mxu0 %v13066_v61  ;;  %v13094_v61 = vld [vmem:[%s13564_s30 + $0x1554] sm:$0xff]  }
 0x44c   : > { %12042 = vmatprep.subr.bf16.mxu0 %v13068_v58  ;;  %v13098_v58 = vld [vmem:[%s13564_s30 + $0x163c] sm:$0xff]  }
 0x44d   : > { %9894 = vmatpush1.bf16.msra.mxu1 %v13067_v37  ;;  %v13099_v37 = vld [vmem:[%s13564_s30 + $0x15fc] sm:$0xff]  }
 0x44e   : > { %9895 = vmatprep.subr.bf16.mxu1 %v13390_v3 }
 0x44f   : > { %12043 = vmatpush3.bf16.msra.mxu0 %v13069_v51  ;;  %v13101_v51 = vld [vmem:[%s13564_s30 + $0x1634] sm:$0xff]  }
 0x450   : > { %12050 = vmatprep.subr.bf16.mxu0 %v13071_v20  ;;  %v13104_v20 = vld [vmem:[%s13564_s30 + $0x162c] sm:$0xff]  }
 0x451   : > { %9896 = vmatpush1.bf16.msra.mxu1 %v13070_v27 }
 0x452   : > { %9874 = vmatmul.mubr.bf16.vlgmr.msra.gmra.mxu0 %v2468_v56  ;;  %9901 = vmatprep.subr.bf16.mxu1 %v13390_v3 }
 0x453   : > { %12051 = vmatpush3.bf16.msra.mxu0 %v13072_v5  ;;  %10232 = vmatprep.mubr.bf16.mxu0 %v2473_v36  ;;  %v13106_v36 = vld [vmem:[%s13564_s30 + $0x1674] sm:$0xff]  }
 0x454   : > { %12052 = vmatprep.subr.bf16.mxu0 %v13074_v40 }
 0x455   : > { %9902 = vmatpush2.bf16.msra.mxu1 %v9799_v16 }
 0x456   : > { %9903 = vmatprep.subr.bf16.mxu1 %v13390_v3 }
 0x457   : > { %12053 = vmatpush3.bf16.msra.mxu0 %v13075_v28 }
 0x458   : > { %12054 = vmatprep.subr.bf16.mxu0 %v13077_v44 }
 0x459   : > { %9904 = vmatpush2.bf16.msra.mxu1 %v13076_v47  ;;  %v13109_v47 = vld [vmem:[%s13564_s30 + $0x166c] sm:$0xff]  }
 0x45a   : > { %9905 = vmatprep.subr.bf16.mxu1 %v13390_v3 }
 0x45b   : > { %12055 = vmatpush3.bf16.msra.mxu0 %v13078_v0 }
 0x45c   : > { %v11912_v48 = vpop.f32.mrf.mxu1  ;;  %12056 = vmatprep.subr.bf16.mxu0 %v13080_v31 }
 0x45d   : > { %9906 = vmatpush2.bf16.msra.mxu1 %v13079_v41  ;;  %v13112_v41 = vld [vmem:[%s13564_s30 + $0x1664] sm:$0xff]  }
 0x45e   : > { %v11913_v34 = vpop.f32.mrf.mxu1  ;;  %9907 = vmatprep.subr.bf16.mxu1 %v13390_v3 }
 0x45f   : > { %v11914_v26 = vadd.f32 %v11913_v34, %v11912_v48  ;;  %12057 = vmatpush3.bf16.msra.mxu0 %v13081_v52  ;;  %v13114_v52 = vld [vmem:[%s13564_s30 + $0x15d4] sm:$0xff]   ;;  %v13115_v48 = vld [vmem:[%s13564_s30 + $0x165c] sm:$0xff]  }
 0x460   : > { %v11915_v54 = vpop.f32.mrf.mxu1  ;;  %12058 = vmatprep.subr.bf16.mxu0 %v13083_v33  ;;  %v2474_v33 = vpack.c.bf16 %v16836_v11, %v16836_v11 }
 0x461   : > { %9908 = vmatpush2.bf16.msra.mxu1 %v13082_v4  ;;  %v8679_v14 = vadd.f32 %v11914_v26, %v16778_v30  ;;  %v16848_v30 = vrot.slane %v1853_v62, %v13821_v21  ;;  %v13117_v4 = vld [vmem:[%s13564_s30 + $0x16bc] ss:$0 sps:$4 sm:$0xff]   ;;  %v13119_v26 = vld [vmem:[%s13564_s30 + $0x16ac] sm:$0xff]   ;;  %v13120_v54 = vld [vmem:[%s13564_s30 + $0x16a4] sm:$0xff]  }
 0x462   : > { %v11916_v38 = vpop.f32.mrf.mxu1  ;;  %9909 = vmatprep.subr.bf16.mxu1 %v13390_v3  ;;  %v10198_v34 = vsel %vm4211_vm1, %v13117_v4, 0 }
 0x463   : > { %12059 = vmatpush3.bf16.msra.mxu0 %v13084_v35  ;;  %v2285_v21 = vcombine.high %v16848_v30, %v16848_v30 }
 0x464   : > { %12060 = vmatprep.subr.bf16.mxu0 %v13086_v19 }
 0x465   : > { %9910 = vmatpush2.bf16.msra.mxu1 %v13085_v15  ;;  %v2477_v59 = vpack.c.bf16 %v2285_v21, %v2285_v21 }
 0x466   : > { %9911 = vmatprep.subr.bf16.mxu1 %v13390_v3 }
 0x467   : > { %12061 = vmatpush3.bf16.msra.mxu0 %v13087_v23  ;;  %v13122_v23 = vld [vmem:[%s13564_s30 + $0x1694] sm:$0xff]  }
 0x468   : > { %12062 = vmatprep.subr.bf16.mxu0 %v13089_v49  ;;  %v2476_v49 = vpack.c.bf16 %v16848_v30, %v16848_v30 }
 0x469   : > { %9912 = vmatpush2.bf16.msra.mxu1 %v13088_v55 }
 0x46a   : > { %12072 = vmatprep.subr.bf16.mxu1 %v13091_v29 }
 0x46b   : > { %12063 = vmatpush3.bf16.msra.mxu0 %v13090_v24 }
 0x46c   : > { %9914 = vmatmul.mubr.bf16.vlgmr.msra.gmra.mxu1 %v2470_v13  ;;  %12064 = vmatprep.subr.bf16.mxu0 %v13093_v7 }
 0x46d   : > { %12073 = vmatpush3.bf16.msra.mxu1 %v13092_v8  ;;  %10272 = vmatprep.mubr.bf16.mxu1 %v2475_v39 }
 0x46e   : > { %12074 = vmatprep.subr.bf16.mxu1 %v13095_v45 }
 0x46f   : > { %12065 = vmatpush3.bf16.msra.mxu0 %v13094_v61 }
 0x470   : > { %10280 = vmatprep.subr.bf16.mxu0 %v13390_v3 }
 0x471   : > { %12075 = vmatpush3.bf16.msra.mxu1 %v13096_v43 }
 0x472   : > { %10233 = vmatmul.mubr.bf16.vlgmr.msra.gmra.mxu0 %v2472_v9  ;;  %12076 = vmatprep.subr.bf16.mxu1 %v13098_v58 }
 0x473   : > { %10281 = vmatpush1.bf16.msra.mxu0 %v13097_v42  ;;  %11382 = vmatprep.mubr.msk.bf16.mxu0 %vm4207_vm0, %v2477_v59 }
 0x474   : > { %10282 = vmatprep.subr.bf16.mxu0 %v13390_v3 }
 0x475   : > { %12077 = vmatpush3.bf16.msra.mxu1 %v13099_v37 }
 0x476   : > { %12078 = vmatprep.subr.bf16.mxu1 %v13101_v51 }
 0x477   : > { %10283 = vmatpush1.bf16.msra.mxu0 %v13100_v22 }
 0x478   : > { %10284 = vmatprep.subr.bf16.mxu0 %v13390_v3 }
 0x479   : > { %12079 = vmatpush3.bf16.msra.mxu1 %v13102_v1 }
 0x47a   : > { %v8718_v27 = vpop.f32.mrf.mxu0  ;;  %12080 = vmatprep.subr.bf16.mxu1 %v13104_v20 }
 0x47b   : > { %v8719_v5 = vadd.f32 %v8718_v27, %v8679_v14  ;;  %10285 = vmatpush1.bf16.msra.mxu0 %v13103_v46  ;;  %v13121_v14 = vld [vmem:[%s13564_s30 + $0x169c] sm:$0xff]  }
 0x47c   : > { %v8720_v56 = vpop.f32.mrf.mxu0  ;;  %10286 = vmatprep.subr.bf16.mxu0 %v13390_v3  ;;  %v11934_v40 = vpop.f32.mrf.mxu1 }
 0x47d   : > { %v10343_v6 = vsel %vm10321_vm2, %v8719_v5, 0.0  ;;  %12081 = vmatpush3.bf16.msra.mxu1 %v13105_v32 }
 0x47e   : > { %v16879_v16 = vadd.f32 %v10343_v6, %v16767_v60  ;;  %v8721_v28 = vpop.f32.mrf.mxu0  ;;  %12082 = vmatprep.subr.bf16.mxu1 %v13107_v53  ;;  %v11935_v44 = vpop.f32.mrf.mxu1 }
 0x47f   : > { %10287 = vmatpush1.bf16.msra.mxu0 %v13106_v36  ;;  %v11936_v17 = vadd.f32 %v11935_v44, %v11934_v40 }
 0x480   : > { %v8722_v0 = vpop.f32.mrf.mxu0  ;;  %10288 = vmatprep.subr.bf16.mxu0 %v13390_v3  ;;  %v11937_v31 = vpop.f32.mrf.mxu1 }
 0x481   : > { %12083 = vmatpush3.bf16.msra.mxu1 %v13108_v2 }
 0x482   : > { %12084 = vmatprep.subr.bf16.mxu1 %v13110_v63  ;;  %v11938_v60 = vpop.f32.mrf.mxu1 }
 0x483   : > { %10289 = vmatpush1.bf16.msra.mxu0 %v13109_v47 }
 0x484   : > { %10290 = vmatprep.subr.bf16.mxu0 %v13390_v3 }
 0x485   : > { %12085 = vmatpush3.bf16.msra.mxu1 %v13111_v57 }
 0x486   : > { %12086 = vmatprep.subr.bf16.mxu1 %v13113_v50 }
 0x487   : > { %10291 = vmatpush1.bf16.msra.mxu0 %v13112_v41 }
 0x488   : > { %10292 = vmatprep.subr.bf16.mxu0 %v13390_v3 }
 0x489   : > { %12087 = vmatpush3.bf16.msra.mxu1 %v13114_v52 }
 0x48b   : > { %10293 = vmatpush1.bf16.msra.mxu0 %v13115_v48 }
 0x48c   : > { %10273 = vmatmul.mubr.bf16.vlgmr.msra.gmra.mxu1 %v2474_v33  ;;  %10294 = vmatprep.subr.bf16.mxu0 %v13390_v3 }
 0x48f   : > { %10295 = vmatpush1.bf16.msra.mxu0 %v13116_v10 }
 0x490   : > { %10300 = vmatprep.subr.bf16.mxu0 %v13390_v3 }
 0x493   : > { %10301 = vmatpush2.bf16.msra.mxu0 %v10198_v34 }
 0x494   : > { %10302 = vmatprep.subr.bf16.mxu0 %v13390_v3 }
 0x497   : > { %10303 = vmatpush2.bf16.msra.mxu0 %v13118_v25 }
 0x498   : > { %10304 = vmatprep.subr.bf16.mxu0 %v13390_v3 }
 0x49a   : > { %v11956_v35 = vpop.f32.mrf.mxu0 }
 0x49b   : > { %10305 = vmatpush2.bf16.msra.mxu0 %v13119_v26 }
 0x49c   : > { %v11957_v19 = vpop.f32.mrf.mxu0  ;;  %10306 = vmatprep.subr.bf16.mxu0 %v13390_v3 }
 0x49d   : > { %v11958_v12 = vadd.f32 %v11957_v19, %v11956_v35 }
 0x49e   : > { %v11959_v15 = vpop.f32.mrf.mxu0 }
 0x49f   : > { %10307 = vmatpush2.bf16.msra.mxu0 %v13120_v54  ;;  %v9078_v38 = vadd.f32 %v11958_v12, %v11936_v17  ;;  %v10320_v12 = vld [vmem:[#allocation2] sm:$0x3] }
 0x4a0   : > { %v11960_v11 = vpop.f32.mrf.mxu0  ;;  %10308 = vmatprep.subr.bf16.mxu0 %v13390_v3 }
 0x4a3   : > { %10309 = vmatpush2.bf16.msra.mxu0 %v13121_v14 }
 0x4a4   : > { %10310 = vmatprep.subr.bf16.mxu0 %v13390_v3 }
 0x4a7   : > { %10311 = vmatpush2.bf16.msra.mxu0 %v13122_v23 }
 0x4aa   : > { %10313 = vmatmul.mubr.bf16.vlgmr.msra.gmra.mxu0 %v2476_v49 }
 0x4b4   : > { %v9117_v62 = vpop.f32.mrf.mxu1 }
 0x4b5   : > { %v9118_v55 = vadd.f32 %v9117_v62, %v9078_v38 }
 0x4b6   : > { %v9119_v29 = vpop.f32.mrf.mxu1 }
 0x4b7   : > { %v10345_v24 = vsel %vm10321_vm2, %v9118_v55, 0.0 }
 0x4b8   : > { %v10346_v18 = vadd.f32 %v10345_v24, %v16879_v16  ;;  %v9120_v7 = vpop.f32.mrf.mxu1 }
 0x4ba   : > { %v9121_v8 = vpop.f32.mrf.mxu1  ;;  %v11978_v13 = vpop.f32.mrf.mxu0 }
 0x4bc   : > { %v11979_v45 = vpop.f32.mrf.mxu0 }
 0x4bd   : > { %v11980_v39 = vadd.f32 %v11979_v45, %v11978_v13 }
 0x4be   : > { %v11981_v61 = vpop.f32.mrf.mxu0 }
 0x4c0   : > { %v11982_v21 = vpop.f32.mrf.mxu0 }
 0x4d4   : > { %v12000_v3 = vpop.f32.mrf.mxu1 }
 0x4d6   : > { %v12001_v43 = vpop.f32.mrf.mxu1 }
 0x4d7   : > { %v12002_v58 = vadd.f32 %v12001_v43, %v12000_v3 }
 0x4d8   : > { %v12003_v42 = vpop.f32.mrf.mxu1 }
 0x4d9   : > { %v9477_v30 = vadd.f32 %v12002_v58, %v11980_v39 }
 0x4da   : > { %v12004_v9 = vpop.f32.mrf.mxu1 }
 0x4f2   : > { %v9516_v59 = vpop.f32.mrf.mxu0 }
 0x4f3   : > { %v9517_v37 = vadd.f32 %v9516_v59, %v9477_v30 }
 0x4f4   : > { %v9518_v51 = vpop.f32.mrf.mxu0  ;;  %v12022_v22 = vpop.f32.mrf.mxu1 }
 0x4f5   : > { %v10347_v1 = vsel %vm10321_vm2, %v9517_v37, 0.0 }
 0x4f6   : > { %v10348_v20 = vadd.f32 %v10347_v1, %v10346_v18  ;;  %v9519_v46 = vpop.f32.mrf.mxu0  ;;  %v12023_v32 = vpop.f32.mrf.mxu1 }
 0x4f7   : > { %v12024_v27 = vadd.f32 %v12023_v32, %v12022_v22 }
 0x4f8   : > { %v9520_v53 = vpop.f32.mrf.mxu0  ;;  %v12025_v5 = vpop.f32.mrf.mxu1 }
 0x4fa   : > { %v12026_v36 = vpop.f32.mrf.mxu1 }
 0x512   : > { %v12044_v56 = vpop.f32.mrf.mxu0 }
 0x514   : > { %v12045_v40 = vpop.f32.mrf.mxu0 }
 0x515   : > { %v12046_v6 = vadd.f32 %v12045_v40, %v12044_v56 }
 0x516   : > { %v12047_v2 = vpop.f32.mrf.mxu0 }
 0x517   : > { %v9876_v16 = vadd.f32 %v12046_v6, %v12024_v27 }
 0x518   : > { %v12048_v28 = vpop.f32.mrf.mxu0 }
 0x52c   : > { %v9915_v44 = vpop.f32.mrf.mxu1 }
 0x52d   : > { %v9916_v63 = vadd.f32 %v9915_v44, %v9876_v16 }
 0x52e   : > { %v9917_v17 = vpop.f32.mrf.mxu1 }
 0x52f   : > { %v10349_v47 = vsel %vm10321_vm2, %v9916_v63, 0.0 }
 0x530   : > { %v10350_v0 = vadd.f32 %v10349_v47, %v10348_v20  ;;  %v9918_v31 = vpop.f32.mrf.mxu1 }
 0x532   : > { %v9919_v57 = vpop.f32.mrf.mxu1  ;;  %v12066_v60 = vpop.f32.mrf.mxu0 }
 0x534   : > { %v12067_v50 = vpop.f32.mrf.mxu0 }
 0x535   : > { %v12068_v25 = vadd.f32 %v12067_v50, %v12066_v60 }
 0x536   : > { %v12069_v41 = vpop.f32.mrf.mxu0 }
 0x538   : > { %v12070_v52 = vpop.f32.mrf.mxu0 }
 0x54c   : > { %v12088_v48 = vpop.f32.mrf.mxu1 }
 0x54e   : > { %v12089_v33 = vpop.f32.mrf.mxu1 }
 0x54f   : > { %v12090_v34 = vadd.f32 %v12089_v33, %v12088_v48 }
 0x550   : > { %v12091_v10 = vpop.f32.mrf.mxu1 }
 0x551   : > { %v10275_v26 = vadd.f32 %v12090_v34, %v12068_v25 }
 0x552   : > { %v12092_v4 = vpop.f32.mrf.mxu1 }
 0x56a   : > { %v10314_v35 = vpop.f32.mrf.mxu0 }
 0x56b   : > { %v10315_v54 = vadd.f32 %v10314_v35, %v10275_v26 }
 0x56c   : > { %v10316_v19 = vpop.f32.mrf.mxu0 }
 0x56d   : > { %v10351_v15 = vsel %vm10321_vm2, %v10315_v54, 0.0 }
 0x56e   : > { %v10352_v14 = vadd.f32 %v10351_v15, %v10350_v0  ;;  %v10317_v38 = vpop.f32.mrf.mxu0  ;;  %10358 = sbr.rel (%p11383_p11) target bundleno = 1936 (0x790), region = 68 }
 0x570   : > { %v10353_v11 = vadd.f32 %v10352_v14, %v10320_v12  ;;  %v10318_v23 = vpop.f32.mrf.mxu0 }
 0x572   : > { %10354 = vst [vmem:[#allocation2] sm:$0x3] %v10353_v11 }
 0x573   : > { %v10384_v49 = vld [vmem:[%s16997_s5 + $0x78] sm:$0xff]  ;;  %v13399_v62 = vmov 0.0   ;;  %v10383_v55 = vld [vmem:[%s16997_s5 + $0x70] sm:$0xff]  ;;  %vm13400_vm3 = vmmov 0   ;;  %v10382_v29 = vld [vmem:[%s16997_s5 + $0x68] sm:$0xff]  ;;  %vm10462_vm4 = vcmask 74752  }
 0x574   : > { %12111 = vmatprep.subr.mxu0 %v13399_v62  ;;  %12143 = vmatprep.mubr.msk.f32.mxu0 %vm13400_vm3, %v13399_v62  ;;  %v10381_v24 = vld [vmem:[%s16997_s5 + $0x60] sm:$0xff]  ;;  %v10380_v18 = vld [vmem:[%s16997_s5 + $0x58] sm:$0xff]  ;;  %v10379_v7 = vld [vmem:[%s16997_s5 + $0x50] sm:$0xff] }
 0x575   : > { %12112 = vmatpush3.msra.mxu0 %v10384_v49  ;;  %v10378_v8 = vld [vmem:[%s16997_s5 + $0x48] sm:$0xff]  ;;  %v10377_v13 = vld [vmem:[%s16997_s5 + $0x40] sm:$0xff]  ;;  %v10376_v45 = vld [vmem:[%s16997_s5 + $0x38] sm:$0xff] }
 0x576   : > { %12113 = vmatprep.subr.mxu0 %v13399_v62  ;;  %v10375_v39 = vld [vmem:[%s16997_s5 + $0x30] sm:$0xff]  ;;  %v10374_v61 = vld [vmem:[%s16997_s5 + $0x28] sm:$0xff]  ;;  %v10373_v21 = vld [vmem:[%s16997_s5 + $0x20] sm:$0xff] }
 0x577   : > { %12114 = vmatpush3.msra.mxu0 %v10383_v55  ;;  %v11384_v43 = vld [vmem:[#allocation6] ss:$0 sm:$0xff]  ;;  %v10372_v58 = vld [vmem:[%s16997_s5 + $0x18] sm:$0xff]  ;;  %v10371_v42 = vld [vmem:[%s16997_s5 + $0x10] sm:$0xff] }
 0x578   : > { %12115 = vmatprep.subr.mxu0 %v13399_v62  ;;  %v10370_v9 = vld [vmem:[%s16997_s5 + $0x8] sm:$0xff]  ;;  %v10369_v59 = vld [vmem:[%s16997_s5] sm:$0xff] }
 0x579   : > { %12116 = vmatpush3.msra.mxu0 %v10382_v29  ;;  %v10359_v3 = vld [vmem:[#allocation2] sm:$0x3]  ;;  %v11385_v51 = vld [vmem:[#allocation8] ss:$0 sm:$0xff] }
 0x57a   : > { %12117 = vmatprep.subr.mxu0 %v13399_v62  ;;  %v10367_v30 = vadd.f32 %v11384_v43, %v10359_v3 }
 0x57b   : > { %12118 = vmatpush3.msra.mxu0 %v10381_v24 }
 0x57c   : > { %12119 = vmatprep.subr.mxu0 %v13399_v62  ;;  %v10368_v37 = vmax.f32 %v10367_v30, 0.0 }
 0x57d   : > { %12120 = vmatpush3.msra.mxu0 %v10380_v18 }
 0x57e   : > { %12121 = vmatprep.subr.mxu0 %v13399_v62 }
 0x57f   : > { %12122 = vmatpush3.msra.mxu0 %v10379_v7 }
 0x580   : > { %12123 = vmatprep.subr.mxu0 %v13399_v62 }
 0x581   : > { %12124 = vmatpush3.msra.mxu0 %v10378_v8 }
 0x582   : > { %12125 = vmatprep.subr.mxu0 %v13399_v62 }
 0x583   : > { %12126 = vmatpush3.msra.mxu0 %v10377_v13 }
 0x584   : > { %12127 = vmatprep.subr.mxu0 %v13399_v62 }
 0x585   : > { %12128 = vmatpush3.msra.mxu0 %v10376_v45 }
 0x586   : > { %12129 = vmatprep.subr.mxu0 %v13399_v62 }
 0x587   : > { %12130 = vmatpush3.msra.mxu0 %v10375_v39 }
 0x588   : > { %12131 = vmatprep.subr.mxu0 %v13399_v62 }
 0x589   : > { %12132 = vmatpush3.msra.mxu0 %v10374_v61 }
 0x58a   : > { %12133 = vmatprep.subr.mxu0 %v13399_v62 }
 0x58b   : > { %12134 = vmatpush3.msra.mxu0 %v10373_v21 }
 0x58c   : > { %12135 = vmatprep.subr.mxu0 %v13399_v62 }
 0x58d   : > { %12136 = vmatpush3.msra.mxu0 %v10372_v58 }
 0x58e   : > { %12137 = vmatprep.subr.mxu0 %v13399_v62 }
 0x58f   : > { %12138 = vmatpush3.msra.mxu0 %v10371_v42 }
 0x590   : > { %12139 = vmatprep.subr.mxu0 %v13399_v62 }
 0x591   : > { %12140 = vmatpush3.msra.mxu0 %v10370_v9 }
 0x592   : > { %12141 = vmatprep.subr.mxu0 %v13399_v62 }
 0x593   : > { %12142 = vmatpush3.msra.mxu0 %v10369_v59 }
 0x594   : > { %12144 = vmatmul.mubr.f32.vlgmr.msra.gmra.mxu0 %v10368_v37 }
 0x654   : > { %v10458_v22 = vpop.f32.mrf.mxu0 }
 0x655   : > { %v10459_v1 = vadd.f32 %v11385_v51, %v10458_v22 }
 0x656   : > { %v12145_v20 = vpop.f32.mrf.mxu0 }
 0x657   : > { %v10463_v46 = vsel %vm10462_vm4, %v10459_v1, -inf }
 0x658   : > { %10464 = vmax.xlane.f32.xlu0 %v10463_v46 }
 0x6e1   : > { %v10465_v32 = vpop.xlane.xlu0 %10464 }
 0x6e2   : > { %v10466_v27 = vsub.f32 %v10459_v1, %v10465_v32 }
 0x6e4   : > { %v10467_v53 = vmul.f32 1.442695, %v10466_v27 }
 0x6e6   : > { %13231 = vpow2.f32 %v10467_v53 }
 0x6f3   : > { %v13232_v5 = vpop.eup %13231 }
 0x6f4   : > { %v10469_v36 = vsel %vm10462_vm4, %v13232_v5, 0.0 }
 0x6f5   : > { %10470 = vadd.xlane.f32.xlu0 %v10469_v36 }
 0x77e   : > { %v10471_v56 = vpop.xlane.xlu0 %10470 }
 0x77f   : > { %13233 = vrcp.f32 %v10471_v56 }
 0x78c   : > { %v13234_v40 = vpop.eup %13233 }
 0x78d   : > { %v10473_v6 = vmul.f32 %v13234_v40, %v13232_v5 }
 0x78f   : > { %10474 = vst.msk [vmem:[#allocation9] sm:$0x3] %vm10462_vm4, %v10473_v6 }
 0x790 PF: > { %p12179_p4 = scmp.eq.s32.totalorder %s13461_s28, 1  ;;  %s13401_s14 = smov [#allocation9]  }
 0x791   : > { %s10482_s16 = sshll.u32 %s13401_s14, 4  ;;  %s10483_s16 = int_to_ptr.vmem [resolvable:$true] %s10482_s16 }
 0x792   : > { %s13315_s11 = scalar_lea.vmem %s10483_s16, 32  ;;  %p13322_p7 = scmp.lt.s32.totalorder %s10483_s16, %s10483_s16 }
 0x793   : > { %p13316_p12 = scmp.ne.s32.totalorder %s10483_s16, %s13315_s11  ;;  %p13323_p5 = scmp.lt.s32.totalorder %s13315_s11, %s13315_s11 }
 0x795   : > { %p13317_p2 = pnand %p13316_p12, %p12179_p4  ;;  %p13324_p9 = por %p13323_p5, %p13322_p7 }
 0x797   : > { %p13318_p3 = pneg %p13317_p2 }
 0x799   : > { %p13325_p8 = pnand %p13324_p9, %p13318_p3 }
 0x79b   : > { %13328 = shalt.err (!%p13325_p8)
}
 0x79c   : > { %12160 = dma.vmem_to_hbm [thread:$0]  (%p12179_p4), %s10483_s16, 32, %s16999_s7, [#allocation5]  }
 0x79d   : > { %13364 = dma.done.wait (%p12179_p4), [#allocation5], 32  }
 0x79e   : > { %13366 = vsyncadd (%p12179_p4), [#allocation5], 4294967264 }
 0x79f PF: > { %p19_p10 = scmp.ge.s32.totalorder %s13464_s29, 4   ;;  %s17013_s24 = smov %s13373_s25 }
 0x7a0   : > { %s17014_s25 = smov %s13377_s26  ;;  %s17015_s26 = smov %s13474_s9 }
 0x7a1   : > { %s17016_s27 = smov %s13464_s29  ;;  %21 = sbr.rel (!%p19_p10) target bundleno = 5 (0x5), region = 115 }
 0x7a6   :  { %10495 = vsyncpa [#allocation4], 1 }
 0x7a7   :  { %10497 = vsyncpa [#allocation4 + $0x1], 1 }
 0x7a8   :  { %10498 = vsyncpa [#allocation7], 1 }
 0x7a9   :  { %10499 = vsyncpa [#allocation5], 1 }
 0x7aa   :  { %10501 = vsyncpa [#allocation5 + $0x1], 1 }

</bundles_post_ra>
